<compile_context>
chip_gen: v7x
topology: tpu7x:2x2x1
jax: 0.10.0
libtpu: 0.0.40
codegen_flags: <defaults>
</compile_context>

<pallas_src>
import functools

import jax
import jax.numpy as jnp
import numpy as np
from jax.experimental import pallas as pl
from jax.experimental.pallas import tpu as pltpu


# ------------------------------ helpers ------------------------------------ #
def _round_up(x, m):
    return (x + m - 1) // m * m


def _vmem_bytes():
    try:
        return int(pltpu.get_tpu_info().vmem_capacity_bytes)
    except Exception:
        return 64 * 2**20          # conservative: v7x per-core VMEM


def _choose_time_tile(ow, c_in, c_out, oh, sw, h_pad):
    """Output-time tile: full OW when small; otherwise a multiple of 128 sized
    from a per-generation VMEM budget (smaller cap on v7x's 64 MiB VMEM)."""
    if ow <= 512:
        return ow, 1, ow                       # single tile, no lane padding
    budget = min(_vmem_bytes() // 3, 40 * 2**20)
    # double-buffered bytes per output-time lane: input slab (bf16) + out (bf16)
    per_lane = 2 * (h_pad * c_in * sw) * 2 + 2 * (c_out * oh) * 2 + 64
    cap = max(512, min(4096, (budget // per_lane) // 128 * 128))
    ow128 = _round_up(ow, 128)
    n_tiles = -(-ow128 // cap)
    tile = _round_up(-(-ow128 // n_tiles), 128)   # balance tiles -> small waste
    return tile, n_tiles, tile * n_tiles


# ----------------------------- Pallas kernel ------------------------------- #
def _conv_block_kernel(lens_ref, slab_ref, w_ref, shift_ref, out_ref, *,
                       c_in, kh, kw, sh, sw, oh_total, tile_ow,
                       clip_min, clip_max):
    """Fused conv(+bias) + BN(eval) + Hardtanh + time-mask for one
    (batch, time-tile) grid cell.  Shapes inside the kernel:
        slab_ref : (H_pad*C_in, TILE_W_IN) bf16  raw input slab (h-major,c-minor)
        w_ref    : (KW, C_out, KH*C_in)    bf16  weights, BN scale folded in
        shift_ref: (C_out, 1)              f32   bias*scale + BN shift
        out_ref  : (C_out, OH, TILE_OW)    bf16  NCHW output tile
    The KH*C_in contraction of each (oh, kw) tap is one MXU matmul with f32
    accumulation; no im2col is ever materialized.
    """
    bi = pl.program_id(0)
    j = pl.program_id(1)
    khc = kh * c_in

    length = lens_ref[bi]                                   # scalar from SMEM
    col = jax.lax.broadcasted_iota(jnp.int32, (1, tile_ow), 1) + j * tile_ow
    keep = col < length                                     # (1, TILE_OW)
    shift = shift_ref[...]                                  # (C_out, 1)

    for oh in range(oh_total):                # static loops: taps + output rows
        row0 = oh * sh * c_in
        acc = None
        for kwi in range(kw):
            cs = pl.ds(kwi, tile_ow) if sw == 1 else pl.ds(kwi, tile_ow, sw)
            rhs = slab_ref[pl.ds(row0, khc), cs]            # (KH*C_in, TILE_OW)
            t = jnp.dot(w_ref[kwi], rhs,
                        preferred_element_type=jnp.float32)
            acc = t if acc is None else acc + t
        y = jnp.clip(acc + shift, clip_min, clip_max)       # bias+BN, Hardtanh
        # Single final mask == MaskConv's per-module masking (masked lanes = 0).
        out_ref[:, oh, :] = jnp.where(keep, y, 0.0).astype(out_ref.dtype)


# ------------------------------- glue (JAX) --------------------------------- #
def _conv_bn_htanh_mask_block(x, lengths, W, bias, bn_scale, bn_shift,
                              stride, padding, *, out_dtype=jnp.bfloat16):
    B, C_in, H, T = x.shape
    C_out, _, KH, KW = W.shape
    sh, sw = stride
    ph, pw = padding

    H_pad = H + 2 * ph
    OH = (H_pad - KH) // sh + 1
    OW = (T + 2 * pw - KW) // sw + 1

    TILE_OW, n_tiles, OW_pad = _choose_time_tile(OW, C_in, C_out, OH, sw, H_pad)
    TILE_W_IN = (TILE_OW - 1) * sw + KW
    W_in = max(T + 2 * pw, (OW_pad - 1) * sw + KW)
    R = H_pad * C_in
    KHC = KH * C_in

    # Host-side layout prep: ONE cheap pass over the raw input (no im2col).
    # Cast to bf16 first so pad/transpose/slab extraction move half the bytes.
    # (B,C,H,W) -> (B, H*C, W) puts each output row's receptive field into a
    # contiguous sublane block; then cut overlapping time slabs (halo = KW-sw).
    xb = x.astype(jnp.bfloat16)
    xp = jnp.pad(xb, ((0, 0), (0, 0), (ph, ph), (pw, W_in - T - pw)))
    xr = jnp.transpose(xp, (0, 2, 1, 3)).reshape(B, R, W_in)
    slabs = [jax.lax.slice_in_dim(xr, jt * TILE_OW * sw,
                                  jt * TILE_OW * sw + TILE_W_IN, axis=2)
             for jt in range(n_tiles)]
    xs = jnp.stack(slabs, axis=1).reshape(B * n_tiles, R, TILE_W_IN)

    # Fold conv bias + BN(eval) into weights/shift; weight layout (KW, Cout, KH*Cin)
    # matches the slab's (kh-major, ci-minor) row order.
    wr = jnp.transpose(W, (3, 0, 2, 1)).reshape(KW, C_out, KHC)
    wr = (wr * bn_scale[None, :, None]).astype(jnp.bfloat16)
    shift = (bias * bn_scale + bn_shift).reshape(C_out, 1).astype(jnp.float32)

    # Explicit scoped-VMEM limit derived from the actual double-buffered tiles.
    est = (2 * R * TILE_W_IN * 2 + 2 * C_out * OH * TILE_OW * 2
           + 2 * KW * C_out * KHC * 2 + 2 * C_out * 4 + (1 << 20))
    vmem_limit = int(min(max(32 << 20, 2 * est), _vmem_bytes() - (4 << 20)))

    kernel = functools.partial(
        _conv_block_kernel, c_in=C_in, kh=KH, kw=KW, sh=sh, sw=sw,
        oh_total=OH, tile_ow=TILE_OW, clip_min=0.0, clip_max=20.0)

    out = pl.pallas_call(
        kernel,
        out_shape=jax.ShapeDtypeStruct((B, C_out, OH, OW_pad), out_dtype),
        grid_spec=pltpu.PrefetchScalarGridSpec(
            num_scalar_prefetch=1,                         # x_lengths -> SMEM
            grid=(B, n_tiles),
            in_specs=[
                pl.BlockSpec((None, R, TILE_W_IN),
                             lambda bi, j, lens: (bi * n_tiles + j, 0, 0)),
                pl.BlockSpec((KW, C_out, KHC), lambda bi, j, lens: (0, 0, 0)),
                pl.BlockSpec((C_out, 1), lambda bi, j, lens: (0, 0)),
            ],
            out_specs=pl.BlockSpec((None, C_out, OH, TILE_OW),
                                   lambda bi, j, lens: (bi, 0, 0, j)),
        ),
        compiler_params=pltpu.CompilerParams(
            dimension_semantics=("parallel", "parallel"),
            vmem_limit_bytes=vmem_limit),
    )(lengths, xs, wr, shift)

    if OW_pad != OW:
        out = out[:, :, :, :OW]      # drop lane padding (absent at toy sizes)
    return out


def mask_conv_forward(x, x_lengths, blocks):
    """Pallas implementation of MaskConv.forward for a standard DeepSpeech
    modules_seq = [Conv2d, BatchNorm2d, Hardtanh] * n_blocks (eval-mode BN)."""
    for (W, b, scale, shift, stride, padding) in blocks:
        x = _conv_bn_htanh_mask_block(x, x_lengths, W, b, scale, shift,
                                      stride, padding)
    return x


# --------------------------- pure-JAX reference ----------------------------- #
def _mask_ref(y, lengths):
    T = y.shape[3]
    keep = (jnp.arange(T)[None, :] < lengths[:, None]).astype(y.dtype)
    return y * keep[:, None, None, :]


def mask_conv_reference(x, x_lengths, blocks):
    for (W, b, scale, shift, stride, padding) in blocks:
        y = jax.lax.conv_general_dilated(
            x, W, window_strides=stride,
            padding=[(padding[0], padding[0]), (padding[1], padding[1])],
            dimension_numbers=("NCHW", "OIHW", "NCHW"),
            precision=jax.lax.Precision.HIGHEST)
        y = y + b.reshape(1, -1, 1, 1)
        y = _mask_ref(y, x_lengths)
        y = y * scale.reshape(1, -1, 1, 1) + shift.reshape(1, -1, 1, 1)
        y = _mask_ref(y, x_lengths)
        y = jnp.clip(y, 0.0, 20.0)
        y = _mask_ref(y, x_lengths)
        x = y
    return x


# ------------------------------ parameter init ------------------------------ #
def _init_block(key, c_in, c_out, kh, kw, stride, padding):
    k = jax.random.split(key, 6)
    W = jax.random.normal(k[0], (c_out, c_in, kh, kw), jnp.float32) * 0.3
    b = jax.random.normal(k[1], (c_out,), jnp.float32) * 0.1
    gamma = 1.0 + 0.1 * jax.random.normal(k[2], (c_out,), jnp.float32)
    beta = 0.1 * jax.random.normal(k[3], (c_out,), jnp.float32)
    rmean = 0.1 * jax.random.normal(k[4], (c_out,), jnp.float32)
    rvar = jax.random.uniform(k[5], (c_out,), jnp.float32, 0.5, 1.5)
    scale = gamma / jnp.sqrt(rvar + 1e-5)
    shift = beta - rmean * scale
    return (W, b, scale, shift, stride, padding)


if __name__ == "__main__":
    key = jax.random.PRNGKey(0)
    k_x, k_b1, k_b2 = jax.random.split(key, 3)

    # Small DeepSpeech-like front end: 2 blocks of Conv2d + BN + Hardtanh(0,20)
    blocks = [
        _init_block(k_b1, 1, 8, 3, 3, stride=(2, 1), padding=(1, 1)),
        _init_block(k_b2, 8, 8, 3, 3, stride=(1, 1), padding=(1, 1)),
    ]

    # x: (B, C, Freq, Time) = (2, 1, 16, 16); x_lengths in time steps.
    x = jax.random.normal(k_x, (2, 1, 16, 16), jnp.float32)
    x_lengths = jnp.array([16, 10], dtype=jnp.int32)

    forward = jax.jit(functools.partial(mask_conv_forward, blocks=blocks))
    out = jax.block_until_ready(forward(x, x_lengths))

    ref = jax.block_until_ready(mask_conv_reference(x, x_lengths, blocks))

    # bf16 activations/weights with f32 accumulation vs. f32 HIGHEST reference.
    out_f32 = np.asarray(out.astype(jnp.float32))
    np.testing.assert_allclose(out_f32, np.asarray(ref), rtol=3e-2, atol=2e-2)
    # padded time steps of the second batch element must be exactly zero
    assert np.all(out_f32[1, :, :, 10:] == 0.0)

    print("KERNEL_OK")
</pallas_src>

<mosaic_0001>
module attributes {stable_mosaic.version = 11 : i64} {
  func.func @_conv_block_kernel(%arg0: i32, %arg1: i32, %arg2: memref<2xi32, #tpu.memory_space<smem>>, %arg3: memref<1x18x18xbf16, #tpu.memory_space<vmem>>, %arg4: memref<3x8x3xbf16, #tpu.memory_space<vmem>>, %arg5: memref<8x1xf32, #tpu.memory_space<vmem>>, %arg6: memref<1x8x8x16xbf16, #tpu.memory_space<vmem>>) attributes {dimension_semantics = [#tpu.dimension_semantics<parallel>, #tpu.dimension_semantics<parallel>], iteration_bounds = array<i64: 2, 1>, scalar_prefetch = 1 : i64, scratch_operands = 0 : i64, tpu.core_type = #tpu.core_type<tc>, window_params = [{transform_indices = @transform_0, window_bounds = array<i64: 1, 18, 18>}, {pipeline_mode = #tpu.pipeline_mode<synchronous>, transform_indices = @transform_1, window_bounds = array<i64: 3, 8, 3>}, {pipeline_mode = #tpu.pipeline_mode<synchronous>, transform_indices = @transform_2, window_bounds = array<i64: 8, 1>}, {transform_indices = @transform_3, window_bounds = array<i64: 1, 8, 8, 16>}]} {
    %0 = arith.index_cast %arg0 : i32 to index
    %1 = memref.load %arg2[%0] : memref<2xi32, #tpu.memory_space<smem>>
    %2 = tpu.iota {dimensions = array<i32: 1>} : vector<1x16xi32>
    %c16_i32 = arith.constant 16 : i32
    %3 = arith.muli %arg1, %c16_i32 : i32
    %4 = vector.broadcast %3 : i32 to vector<1x16xi32>
    %5 = arith.addi %2, %4 : vector<1x16xi32>
    %6 = vector.broadcast %1 : i32 to vector<1x16xi32>
    %7 = arith.cmpi slt, %5, %6 : vector<1x16xi32>
    %c0 = arith.constant 0 : index
    %c0_0 = arith.constant 0 : index
    %8 = vector.load %arg5[%c0, %c0_0] : memref<8x1xf32, #tpu.memory_space<vmem>>, vector<8x1xf32>
    %c0_1 = arith.constant 0 : index
    %c0_2 = arith.constant 0 : index
    %c0_3 = arith.constant 0 : index
    %9 = vector.load %arg3[%c0_1, %c0_2, %c0_3] : memref<1x18x18xbf16, #tpu.memory_space<vmem>>, vector<1x3x16xbf16>
    %10 = vector.shape_cast %9 : vector<1x3x16xbf16> to vector<3x16xbf16>
    %c0_4 = arith.constant 0 : index
    %c0_5 = arith.constant 0 : index
    %c0_6 = arith.constant 0 : index
    %11 = vector.load %arg4[%c0_4, %c0_5, %c0_6] : memref<3x8x3xbf16, #tpu.memory_space<vmem>>, vector<1x8x3xbf16>
    %12 = vector.shape_cast %11 : vector<1x8x3xbf16> to vector<8x3xbf16>
    %cst = arith.constant dense<0.000000e+00> : vector<8x16xf32>
    %13 = tpu.matmul %12, %10, %cst {dimension_numbers = #tpu.dot_dimension_numbers<[1], [0], [0], [1], [0, 0, 1, 1], [], []>} : vector<8x3xbf16>, vector<3x16xbf16>, vector<8x16xf32> -> vector<8x16xf32>
    %c0_7 = arith.constant 0 : index
    %c0_8 = arith.constant 0 : index
    %c1 = arith.constant 1 : index
    %14 = vector.load %arg3[%c0_7, %c0_8, %c1] : memref<1x18x18xbf16, #tpu.memory_space<vmem>>, vector<1x3x16xbf16>
    %15 = vector.shape_cast %14 : vector<1x3x16xbf16> to vector<3x16xbf16>
    %c1_9 = arith.constant 1 : index
    %c0_10 = arith.constant 0 : index
    %c0_11 = arith.constant 0 : index
    %16 = vector.load %arg4[%c1_9, %c0_10, %c0_11] : memref<3x8x3xbf16, #tpu.memory_space<vmem>>, vector<1x8x3xbf16>
    %17 = vector.shape_cast %16 : vector<1x8x3xbf16> to vector<8x3xbf16>
    %cst_12 = arith.constant dense<0.000000e+00> : vector<8x16xf32>
    %18 = tpu.matmul %17, %15, %cst_12 {dimension_numbers = #tpu.dot_dimension_numbers<[1], [0], [0], [1], [0, 0, 1, 1], [], []>} : vector<8x3xbf16>, vector<3x16xbf16>, vector<8x16xf32> -> vector<8x16xf32>
    %19 = arith.addf %13, %18 : vector<8x16xf32>
    %c0_13 = arith.constant 0 : index
    %c0_14 = arith.constant 0 : index
    %c2 = arith.constant 2 : index
    %20 = vector.load %arg3[%c0_13, %c0_14, %c2] : memref<1x18x18xbf16, #tpu.memory_space<vmem>>, vector<1x3x16xbf16>
    %21 = vector.shape_cast %20 : vector<1x3x16xbf16> to vector<3x16xbf16>
    %c2_15 = arith.constant 2 : index
    %c0_16 = arith.constant 0 : index
    %c0_17 = arith.constant 0 : index
    %22 = vector.load %arg4[%c2_15, %c0_16, %c0_17] : memref<3x8x3xbf16, #tpu.memory_space<vmem>>, vector<1x8x3xbf16>
    %23 = vector.shape_cast %22 : vector<1x8x3xbf16> to vector<8x3xbf16>
    %cst_18 = arith.constant dense<0.000000e+00> : vector<8x16xf32>
    %24 = tpu.matmul %23, %21, %cst_18 {dimension_numbers = #tpu.dot_dimension_numbers<[1], [0], [0], [1], [0, 0, 1, 1], [], []>} : vector<8x3xbf16>, vector<3x16xbf16>, vector<8x16xf32> -> vector<8x16xf32>
    %25 = arith.addf %19, %24 : vector<8x16xf32>
    %26 = vector.broadcast %8 : vector<8x1xf32> to vector<8x16xf32>
    %27 = arith.addf %25, %26 : vector<8x16xf32>
    %cst_19 = arith.constant 0.000000e+00 : f32
    %cst_20 = arith.constant 2.000000e+01 : f32
    %28 = vector.broadcast %cst_19 : f32 to vector<8x16xf32>
    %29 = arith.maximumf %28, %27 : vector<8x16xf32>
    %30 = vector.broadcast %cst_20 : f32 to vector<8x16xf32>
    %31 = arith.minimumf %30, %29 : vector<8x16xf32>
    %cst_21 = arith.constant 0.000000e+00 : f32
    %32 = vector.shape_cast %7 : vector<1x16xi1> to vector<1x16xi1>
    %33 = vector.broadcast %32 : vector<1x16xi1> to vector<8x16xi1>
    %34 = vector.broadcast %cst_21 : f32 to vector<8x16xf32>
    %35 = arith.select %33, %31, %34 : vector<8x16xi1>, vector<8x16xf32>
    %36 = arith.truncf %35 : vector<8x16xf32> to vector<8x16xbf16>
    %c0_22 = arith.constant 0 : index
    %c0_23 = arith.constant 0 : index
    %c0_24 = arith.constant 0 : index
    %c0_25 = arith.constant 0 : index
    %37 = vector.load %arg6[%c0_22, %c0_23, %c0_24, %c0_25] : memref<1x8x8x16xbf16, #tpu.memory_space<vmem>>, vector<1x8x1x16xbf16>
    %38 = vector.shape_cast %37 : vector<1x8x1x16xbf16> to vector<8x16xbf16>
    %39 = vector.shape_cast %36 : vector<8x16xbf16> to vector<1x8x1x16xbf16>
    tpu.vector_store %arg6[%c0_22, %c0_23, %c0_24, %c0_25], %39 {strides = array<i32>} : memref<1x8x8x16xbf16, #tpu.memory_space<vmem>>, vector<1x8x1x16xbf16>,
    %c0_26 = arith.constant 0 : index
    %c2_27 = arith.constant 2 : index
    %c0_28 = arith.constant 0 : index
    %40 = vector.load %arg3[%c0_26, %c2_27, %c0_28] : memref<1x18x18xbf16, #tpu.memory_space<vmem>>, vector<1x3x16xbf16>
    %41 = vector.shape_cast %40 : vector<1x3x16xbf16> to vector<3x16xbf16>
    %c0_29 = arith.constant 0 : index
    %c0_30 = arith.constant 0 : index
    %c0_31 = arith.constant 0 : index
    %42 = vector.load %arg4[%c0_29, %c0_30, %c0_31] : memref<3x8x3xbf16, #tpu.memory_space<vmem>>, vector<1x8x3xbf16>
    %43 = vector.shape_cast %42 : vector<1x8x3xbf16> to vector<8x3xbf16>
    %cst_32 = arith.constant dense<0.000000e+00> : vector<8x16xf32>
    %44 = tpu.matmul %43, %41, %cst_32 {dimension_numbers = #tpu.dot_dimension_numbers<[1], [0], [0], [1], [0, 0, 1, 1], [], []>} : vector<8x3xbf16>, vector<3x16xbf16>, vector<8x16xf32> -> vector<8x16xf32>
    %c0_33 = arith.constant 0 : index
    %c2_34 = arith.constant 2 : index
    %c1_35 = arith.constant 1 : index
    %45 = vector.load %arg3[%c0_33, %c2_34, %c1_35] : memref<1x18x18xbf16, #tpu.memory_space<vmem>>, vector<1x3x16xbf16>
    %46 = vector.shape_cast %45 : vector<1x3x16xbf16> to vector<3x16xbf16>
    %c1_36 = arith.constant 1 : index
    %c0_37 = arith.constant 0 : index
    %c0_38 = arith.constant 0 : index
    %47 = vector.load %arg4[%c1_36, %c0_37, %c0_38] : memref<3x8x3xbf16, #tpu.memory_space<vmem>>, vector<1x8x3xbf16>
    %48 = vector.shape_cast %47 : vector<1x8x3xbf16> to vector<8x3xbf16>
    %cst_39 = arith.constant dense<0.000000e+00> : vector<8x16xf32>
    %49 = tpu.matmul %48, %46, %cst_39 {dimension_numbers = #tpu.dot_dimension_numbers<[1], [0], [0], [1], [0, 0, 1, 1], [], []>} : vector<8x3xbf16>, vector<3x16xbf16>, vector<8x16xf32> -> vector<8x16xf32>
    %50 = arith.addf %44, %49 : vector<8x16xf32>
    %c0_40 = arith.constant 0 : index
    %c2_41 = arith.constant 2 : index
    %c2_42 = arith.constant 2 : index
    %51 = vector.load %arg3[%c0_40, %c2_41, %c2_42] : memref<1x18x18xbf16, #tpu.memory_space<vmem>>, vector<1x3x16xbf16>
    %52 = vector.shape_cast %51 : vector<1x3x16xbf16> to vector<3x16xbf16>
    %c2_43 = arith.constant 2 : index
    %c0_44 = arith.constant 0 : index
    %c0_45 = arith.constant 0 : index
    %53 = vector.load %arg4[%c2_43, %c0_44, %c0_45] : memref<3x8x3xbf16, #tpu.memory_space<vmem>>, vector<1x8x3xbf16>
    %54 = vector.shape_cast %53 : vector<1x8x3xbf16> to vector<8x3xbf16>
    %cst_46 = arith.constant dense<0.000000e+00> : vector<8x16xf32>
    %55 = tpu.matmul %54, %52, %cst_46 {dimension_numbers = #tpu.dot_dimension_numbers<[1], [0], [0], [1], [0, 0, 1, 1], [], []>} : vector<8x3xbf16>, vector<3x16xbf16>, vector<8x16xf32> -> vector<8x16xf32>
    %56 = arith.addf %50, %55 : vector<8x16xf32>
    %57 = vector.broadcast %8 : vector<8x1xf32> to vector<8x16xf32>
    %58 = arith.addf %56, %57 : vector<8x16xf32>
    %cst_47 = arith.constant 0.000000e+00 : f32
    %cst_48 = arith.constant 2.000000e+01 : f32
    %59 = vector.broadcast %cst_47 : f32 to vector<8x16xf32>
    %60 = arith.maximumf %59, %58 : vector<8x16xf32>
    %61 = vector.broadcast %cst_48 : f32 to vector<8x16xf32>
    %62 = arith.minimumf %61, %60 : vector<8x16xf32>
    %cst_49 = arith.constant 0.000000e+00 : f32
    %63 = vector.shape_cast %7 : vector<1x16xi1> to vector<1x16xi1>
    %64 = vector.broadcast %63 : vector<1x16xi1> to vector<8x16xi1>
    %65 = vector.broadcast %cst_49 : f32 to vector<8x16xf32>
    %66 = arith.select %64, %62, %65 : vector<8x16xi1>, vector<8x16xf32>
    %67 = arith.truncf %66 : vector<8x16xf32> to vector<8x16xbf16>
    %c0_50 = arith.constant 0 : index
    %c0_51 = arith.constant 0 : index
    %c1_52 = arith.constant 1 : index
    %c0_53 = arith.constant 0 : index
    %68 = vector.load %arg6[%c0_50, %c0_51, %c1_52, %c0_53] : memref<1x8x8x16xbf16, #tpu.memory_space<vmem>>, vector<1x8x1x16xbf16>
    %69 = vector.shape_cast %68 : vector<1x8x1x16xbf16> to vector<8x16xbf16>
    %70 = vector.shape_cast %67 : vector<8x16xbf16> to vector<1x8x1x16xbf16>
    tpu.vector_store %arg6[%c0_50, %c0_51, %c1_52, %c0_53], %70 {strides = array<i32>} : memref<1x8x8x16xbf16, #tpu.memory_space<vmem>>, vector<1x8x1x16xbf16>,
    %c0_54 = arith.constant 0 : index
    %c4 = arith.constant 4 : index
    %c0_55 = arith.constant 0 : index
    %71 = vector.load %arg3[%c0_54, %c4, %c0_55] : memref<1x18x18xbf16, #tpu.memory_space<vmem>>, vector<1x3x16xbf16>
    %72 = vector.shape_cast %71 : vector<1x3x16xbf16> to vector<3x16xbf16>
    %c0_56 = arith.constant 0 : index
    %c0_57 = arith.constant 0 : index
    %c0_58 = arith.constant 0 : index
    %73 = vector.load %arg4[%c0_56, %c0_57, %c0_58] : memref<3x8x3xbf16, #tpu.memory_space<vmem>>, vector<1x8x3xbf16>
    %74 = vector.shape_cast %73 : vector<1x8x3xbf16> to vector<8x3xbf16>
    %cst_59 = arith.constant dense<0.000000e+00> : vector<8x16xf32>
    %75 = tpu.matmul %74, %72, %cst_59 {dimension_numbers = #tpu.dot_dimension_numbers<[1], [0], [0], [1], [0, 0, 1, 1], [], []>} : vector<8x3xbf16>, vector<3x16xbf16>, vector<8x16xf32> -> vector<8x16xf32>
    %c0_60 = arith.constant 0 : index
    %c4_61 = arith.constant 4 : index
    %c1_62 = arith.constant 1 : index
    %76 = vector.load %arg3[%c0_60, %c4_61, %c1_62] : memref<1x18x18xbf16, #tpu.memory_space<vmem>>, vector<1x3x16xbf16>
    %77 = vector.shape_cast %76 : vector<1x3x16xbf16> to vector<3x16xbf16>
    %c1_63 = arith.constant 1 : index
    %c0_64 = arith.constant 0 : index
    %c0_65 = arith.constant 0 : index
    %78 = vector.load %arg4[%c1_63, %c0_64, %c0_65] : memref<3x8x3xbf16, #tpu.memory_space<vmem>>, vector<1x8x3xbf16>
    %79 = vector.shape_cast %78 : vector<1x8x3xbf16> to vector<8x3xbf16>
    %cst_66 = arith.constant dense<0.000000e+00> : vector<8x16xf32>
    %80 = tpu.matmul %79, %77, %cst_66 {dimension_numbers = #tpu.dot_dimension_numbers<[1], [0], [0], [1], [0, 0, 1, 1], [], []>} : vector<8x3xbf16>, vector<3x16xbf16>, vector<8x16xf32> -> vector<8x16xf32>
    %81 = arith.addf %75, %80 : vector<8x16xf32>
    %c0_67 = arith.constant 0 : index
    %c4_68 = arith.constant 4 : index
    %c2_69 = arith.constant 2 : index
    %82 = vector.load %arg3[%c0_67, %c4_68, %c2_69] : memref<1x18x18xbf16, #tpu.memory_space<vmem>>, vector<1x3x16xbf16>
    %83 = vector.shape_cast %82 : vector<1x3x16xbf16> to vector<3x16xbf16>
    %c2_70 = arith.constant 2 : index
    %c0_71 = arith.constant 0 : index
    %c0_72 = arith.constant 0 : index
    %84 = vector.load %arg4[%c2_70, %c0_71, %c0_72] : memref<3x8x3xbf16, #tpu.memory_space<vmem>>, vector<1x8x3xbf16>
    %85 = vector.shape_cast %84 : vector<1x8x3xbf16> to vector<8x3xbf16>
    %cst_73 = arith.constant dense<0.000000e+00> : vector<8x16xf32>
    %86 = tpu.matmul %85, %83, %cst_73 {dimension_numbers = #tpu.dot_dimension_numbers<[1], [0], [0], [1], [0, 0, 1, 1], [], []>} : vector<8x3xbf16>, vector<3x16xbf16>, vector<8x16xf32> -> vector<8x16xf32>
    %87 = arith.addf %81, %86 : vector<8x16xf32>
    %88 = vector.broadcast %8 : vector<8x1xf32> to vector<8x16xf32>
    %89 = arith.addf %87, %88 : vector<8x16xf32>
    %cst_74 = arith.constant 0.000000e+00 : f32
    %cst_75 = arith.constant 2.000000e+01 : f32
    %90 = vector.broadcast %cst_74 : f32 to vector<8x16xf32>
    %91 = arith.maximumf %90, %89 : vector<8x16xf32>
    %92 = vector.broadcast %cst_75 : f32 to vector<8x16xf32>
    %93 = arith.minimumf %92, %91 : vector<8x16xf32>
    %cst_76 = arith.constant 0.000000e+00 : f32
    %94 = vector.shape_cast %7 : vector<1x16xi1> to vector<1x16xi1>
    %95 = vector.broadcast %94 : vector<1x16xi1> to vector<8x16xi1>
    %96 = vector.broadcast %cst_76 : f32 to vector<8x16xf32>
    %97 = arith.select %95, %93, %96 : vector<8x16xi1>, vector<8x16xf32>
    %98 = arith.truncf %97 : vector<8x16xf32> to vector<8x16xbf16>
    %c0_77 = arith.constant 0 : index
    %c0_78 = arith.constant 0 : index
    %c2_79 = arith.constant 2 : index
    %c0_80 = arith.constant 0 : index
    %99 = vector.load %arg6[%c0_77, %c0_78, %c2_79, %c0_80] : memref<1x8x8x16xbf16, #tpu.memory_space<vmem>>, vector<1x8x1x16xbf16>
    %100 = vector.shape_cast %99 : vector<1x8x1x16xbf16> to vector<8x16xbf16>
    %101 = vector.shape_cast %98 : vector<8x16xbf16> to vector<1x8x1x16xbf16>
    tpu.vector_store %arg6[%c0_77, %c0_78, %c2_79, %c0_80], %101 {strides = array<i32>} : memref<1x8x8x16xbf16, #tpu.memory_space<vmem>>, vector<1x8x1x16xbf16>,
    %c0_81 = arith.constant 0 : index
    %c6 = arith.constant 6 : index
    %c0_82 = arith.constant 0 : index
    %102 = vector.load %arg3[%c0_81, %c6, %c0_82] : memref<1x18x18xbf16, #tpu.memory_space<vmem>>, vector<1x3x16xbf16>
    %103 = vector.shape_cast %102 : vector<1x3x16xbf16> to vector<3x16xbf16>
    %c0_83 = arith.constant 0 : index
    %c0_84 = arith.constant 0 : index
    %c0_85 = arith.constant 0 : index
    %104 = vector.load %arg4[%c0_83, %c0_84, %c0_85] : memref<3x8x3xbf16, #tpu.memory_space<vmem>>, vector<1x8x3xbf16>
    %105 = vector.shape_cast %104 : vector<1x8x3xbf16> to vector<8x3xbf16>
    %cst_86 = arith.constant dense<0.000000e+00> : vector<8x16xf32>
    %106 = tpu.matmul %105, %103, %cst_86 {dimension_numbers = #tpu.dot_dimension_numbers<[1], [0], [0], [1], [0, 0, 1, 1], [], []>} : vector<8x3xbf16>, vector<3x16xbf16>, vector<8x16xf32> -> vector<8x16xf32>
    %c0_87 = arith.constant 0 : index
    %c6_88 = arith.constant 6 : index
    %c1_89 = arith.constant 1 : index
    %107 = vector.load %arg3[%c0_87, %c6_88, %c1_89] : memref<1x18x18xbf16, #tpu.memory_space<vmem>>, vector<1x3x16xbf16>
    %108 = vector.shape_cast %107 : vector<1x3x16xbf16> to vector<3x16xbf16>
    %c1_90 = arith.constant 1 : index
    %c0_91 = arith.constant 0 : index
    %c0_92 = arith.constant 0 : index
    %109 = vector.load %arg4[%c1_90, %c0_91, %c0_92] : memref<3x8x3xbf16, #tpu.memory_space<vmem>>, vector<1x8x3xbf16>
    %110 = vector.shape_cast %109 : vector<1x8x3xbf16> to vector<8x3xbf16>
    %cst_93 = arith.constant dense<0.000000e+00> : vector<8x16xf32>
    %111 = tpu.matmul %110, %108, %cst_93 {dimension_numbers = #tpu.dot_dimension_numbers<[1], [0], [0], [1], [0, 0, 1, 1], [], []>} : vector<8x3xbf16>, vector<3x16xbf16>, vector<8x16xf32> -> vector<8x16xf32>
    %112 = arith.addf %106, %111 : vector<8x16xf32>
    %c0_94 = arith.constant 0 : index
    %c6_95 = arith.constant 6 : index
    %c2_96 = arith.constant 2 : index
    %113 = vector.load %arg3[%c0_94, %c6_95, %c2_96] : memref<1x18x18xbf16, #tpu.memory_space<vmem>>, vector<1x3x16xbf16>
    %114 = vector.shape_cast %113 : vector<1x3x16xbf16> to vector<3x16xbf16>
    %c2_97 = arith.constant 2 : index
    %c0_98 = arith.constant 0 : index
    %c0_99 = arith.constant 0 : index
    %115 = vector.load %arg4[%c2_97, %c0_98, %c0_99] : memref<3x8x3xbf16, #tpu.memory_space<vmem>>, vector<1x8x3xbf16>
    %116 = vector.shape_cast %115 : vector<1x8x3xbf16> to vector<8x3xbf16>
    %cst_100 = arith.constant dense<0.000000e+00> : vector<8x16xf32>
    %117 = tpu.matmul %116, %114, %cst_100 {dimension_numbers = #tpu.dot_dimension_numbers<[1], [0], [0], [1], [0, 0, 1, 1], [], []>} : vector<8x3xbf16>, vector<3x16xbf16>, vector<8x16xf32> -> vector<8x16xf32>
    %118 = arith.addf %112, %117 : vector<8x16xf32>
    %119 = vector.broadcast %8 : vector<8x1xf32> to vector<8x16xf32>
    %120 = arith.addf %118, %119 : vector<8x16xf32>
    %cst_101 = arith.constant 0.000000e+00 : f32
    %cst_102 = arith.constant 2.000000e+01 : f32
    %121 = vector.broadcast %cst_101 : f32 to vector<8x16xf32>
    %122 = arith.maximumf %121, %120 : vector<8x16xf32>
    %123 = vector.broadcast %cst_102 : f32 to vector<8x16xf32>
    %124 = arith.minimumf %123, %122 : vector<8x16xf32>
    %cst_103 = arith.constant 0.000000e+00 : f32
    %125 = vector.shape_cast %7 : vector<1x16xi1> to vector<1x16xi1>
    %126 = vector.broadcast %125 : vector<1x16xi1> to vector<8x16xi1>
    %127 = vector.broadcast %cst_103 : f32 to vector<8x16xf32>
    %128 = arith.select %126, %124, %127 : vector<8x16xi1>, vector<8x16xf32>
    %129 = arith.truncf %128 : vector<8x16xf32> to vector<8x16xbf16>
    %c0_104 = arith.constant 0 : index
    %c0_105 = arith.constant 0 : index
    %c3 = arith.constant 3 : index
    %c0_106 = arith.constant 0 : index
    %130 = vector.load %arg6[%c0_104, %c0_105, %c3, %c0_106] : memref<1x8x8x16xbf16, #tpu.memory_space<vmem>>, vector<1x8x1x16xbf16>
    %131 = vector.shape_cast %130 : vector<1x8x1x16xbf16> to vector<8x16xbf16>
    %132 = vector.shape_cast %129 : vector<8x16xbf16> to vector<1x8x1x16xbf16>
    tpu.vector_store %arg6[%c0_104, %c0_105, %c3, %c0_106], %132 {strides = array<i32>} : memref<1x8x8x16xbf16, #tpu.memory_space<vmem>>, vector<1x8x1x16xbf16>,
    %c0_107 = arith.constant 0 : index
    %c8 = arith.constant 8 : index
    %c0_108 = arith.constant 0 : index
    %133 = vector.load %arg3[%c0_107, %c8, %c0_108] : memref<1x18x18xbf16, #tpu.memory_space<vmem>>, vector<1x3x16xbf16>
    %134 = vector.shape_cast %133 : vector<1x3x16xbf16> to vector<3x16xbf16>
    %c0_109 = arith.constant 0 : index
    %c0_110 = arith.constant 0 : index
    %c0_111 = arith.constant 0 : index
    %135 = vector.load %arg4[%c0_109, %c0_110, %c0_111] : memref<3x8x3xbf16, #tpu.memory_space<vmem>>, vector<1x8x3xbf16>
    %136 = vector.shape_cast %135 : vector<1x8x3xbf16> to vector<8x3xbf16>
    %cst_112 = arith.constant dense<0.000000e+00> : vector<8x16xf32>
    %137 = tpu.matmul %136, %134, %cst_112 {dimension_numbers = #tpu.dot_dimension_numbers<[1], [0], [0], [1], [0, 0, 1, 1], [], []>} : vector<8x3xbf16>, vector<3x16xbf16>, vector<8x16xf32> -> vector<8x16xf32>
    %c0_113 = arith.constant 0 : index
    %c8_114 = arith.constant 8 : index
    %c1_115 = arith.constant 1 : index
    %138 = vector.load %arg3[%c0_113, %c8_114, %c1_115] : memref<1x18x18xbf16, #tpu.memory_space<vmem>>, vector<1x3x16xbf16>
    %139 = vector.shape_cast %138 : vector<1x3x16xbf16> to vector<3x16xbf16>
    %c1_116 = arith.constant 1 : index
    %c0_117 = arith.constant 0 : index
    %c0_118 = arith.constant 0 : index
    %140 = vector.load %arg4[%c1_116, %c0_117, %c0_118] : memref<3x8x3xbf16, #tpu.memory_space<vmem>>, vector<1x8x3xbf16>
    %141 = vector.shape_cast %140 : vector<1x8x3xbf16> to vector<8x3xbf16>
    %cst_119 = arith.constant dense<0.000000e+00> : vector<8x16xf32>
    %142 = tpu.matmul %141, %139, %cst_119 {dimension_numbers = #tpu.dot_dimension_numbers<[1], [0], [0], [1], [0, 0, 1, 1], [], []>} : vector<8x3xbf16>, vector<3x16xbf16>, vector<8x16xf32> -> vector<8x16xf32>
    %143 = arith.addf %137, %142 : vector<8x16xf32>
    %c0_120 = arith.constant 0 : index
    %c8_121 = arith.constant 8 : index
    %c2_122 = arith.constant 2 : index
    %144 = vector.load %arg3[%c0_120, %c8_121, %c2_122] : memref<1x18x18xbf16, #tpu.memory_space<vmem>>, vector<1x3x16xbf16>
    %145 = vector.shape_cast %144 : vector<1x3x16xbf16> to vector<3x16xbf16>
    %c2_123 = arith.constant 2 : index
    %c0_124 = arith.constant 0 : index
    %c0_125 = arith.constant 0 : index
    %146 = vector.load %arg4[%c2_123, %c0_124, %c0_125] : memref<3x8x3xbf16, #tpu.memory_space<vmem>>, vector<1x8x3xbf16>
    %147 = vector.shape_cast %146 : vector<1x8x3xbf16> to vector<8x3xbf16>
    %cst_126 = arith.constant dense<0.000000e+00> : vector<8x16xf32>
    %148 = tpu.matmul %147, %145, %cst_126 {dimension_numbers = #tpu.dot_dimension_numbers<[1], [0], [0], [1], [0, 0, 1, 1], [], []>} : vector<8x3xbf16>, vector<3x16xbf16>, vector<8x16xf32> -> vector<8x16xf32>
    %149 = arith.addf %143, %148 : vector<8x16xf32>
    %150 = vector.broadcast %8 : vector<8x1xf32> to vector<8x16xf32>
    %151 = arith.addf %149, %150 : vector<8x16xf32>
    %cst_127 = arith.constant 0.000000e+00 : f32
    %cst_128 = arith.constant 2.000000e+01 : f32
    %152 = vector.broadcast %cst_127 : f32 to vector<8x16xf32>
    %153 = arith.maximumf %152, %151 : vector<8x16xf32>
    %154 = vector.broadcast %cst_128 : f32 to vector<8x16xf32>
    %155 = arith.minimumf %154, %153 : vector<8x16xf32>
    %cst_129 = arith.constant 0.000000e+00 : f32
    %156 = vector.shape_cast %7 : vector<1x16xi1> to vector<1x16xi1>
    %157 = vector.broadcast %156 : vector<1x16xi1> to vector<8x16xi1>
    %158 = vector.broadcast %cst_129 : f32 to vector<8x16xf32>
    %159 = arith.select %157, %155, %158 : vector<8x16xi1>, vector<8x16xf32>
    %160 = arith.truncf %159 : vector<8x16xf32> to vector<8x16xbf16>
    %c0_130 = arith.constant 0 : index
    %c0_131 = arith.constant 0 : index
    %c4_132 = arith.constant 4 : index
    %c0_133 = arith.constant 0 : index
    %161 = vector.load %arg6[%c0_130, %c0_131, %c4_132, %c0_133] : memref<1x8x8x16xbf16, #tpu.memory_space<vmem>>, vector<1x8x1x16xbf16>
    %162 = vector.shape_cast %161 : vector<1x8x1x16xbf16> to vector<8x16xbf16>
    %163 = vector.shape_cast %160 : vector<8x16xbf16> to vector<1x8x1x16xbf16>
    tpu.vector_store %arg6[%c0_130, %c0_131, %c4_132, %c0_133], %163 {strides = array<i32>} : memref<1x8x8x16xbf16, #tpu.memory_space<vmem>>, vector<1x8x1x16xbf16>,
    %c0_134 = arith.constant 0 : index
    %c10 = arith.constant 10 : index
    %c0_135 = arith.constant 0 : index
    %164 = vector.load %arg3[%c0_134, %c10, %c0_135] : memref<1x18x18xbf16, #tpu.memory_space<vmem>>, vector<1x3x16xbf16>
    %165 = vector.shape_cast %164 : vector<1x3x16xbf16> to vector<3x16xbf16>
    %c0_136 = arith.constant 0 : index
    %c0_137 = arith.constant 0 : index
    %c0_138 = arith.constant 0 : index
    %166 = vector.load %arg4[%c0_136, %c0_137, %c0_138] : memref<3x8x3xbf16, #tpu.memory_space<vmem>>, vector<1x8x3xbf16>
    %167 = vector.shape_cast %166 : vector<1x8x3xbf16> to vector<8x3xbf16>
    %cst_139 = arith.constant dense<0.000000e+00> : vector<8x16xf32>
    %168 = tpu.matmul %167, %165, %cst_139 {dimension_numbers = #tpu.dot_dimension_numbers<[1], [0], [0], [1], [0, 0, 1, 1], [], []>} : vector<8x3xbf16>, vector<3x16xbf16>, vector<8x16xf32> -> vector<8x16xf32>
    %c0_140 = arith.constant 0 : index
    %c10_141 = arith.constant 10 : index
    %c1_142 = arith.constant 1 : index
    %169 = vector.load %arg3[%c0_140, %c10_141, %c1_142] : memref<1x18x18xbf16, #tpu.memory_space<vmem>>, vector<1x3x16xbf16>
    %170 = vector.shape_cast %169 : vector<1x3x16xbf16> to vector<3x16xbf16>
    %c1_143 = arith.constant 1 : index
    %c0_144 = arith.constant 0 : index
    %c0_145 = arith.constant 0 : index
    %171 = vector.load %arg4[%c1_143, %c0_144, %c0_145] : memref<3x8x3xbf16, #tpu.memory_space<vmem>>, vector<1x8x3xbf16>
    %172 = vector.shape_cast %171 : vector<1x8x3xbf16> to vector<8x3xbf16>
    %cst_146 = arith.constant dense<0.000000e+00> : vector<8x16xf32>
    %173 = tpu.matmul %172, %170, %cst_146 {dimension_numbers = #tpu.dot_dimension_numbers<[1], [0], [0], [1], [0, 0, 1, 1], [], []>} : vector<8x3xbf16>, vector<3x16xbf16>, vector<8x16xf32> -> vector<8x16xf32>
    %174 = arith.addf %168, %173 : vector<8x16xf32>
    %c0_147 = arith.constant 0 : index
    %c10_148 = arith.constant 10 : index
    %c2_149 = arith.constant 2 : index
    %175 = vector.load %arg3[%c0_147, %c10_148, %c2_149] : memref<1x18x18xbf16, #tpu.memory_space<vmem>>, vector<1x3x16xbf16>
    %176 = vector.shape_cast %175 : vector<1x3x16xbf16> to vector<3x16xbf16>
    %c2_150 = arith.constant 2 : index
    %c0_151 = arith.constant 0 : index
    %c0_152 = arith.constant 0 : index
    %177 = vector.load %arg4[%c2_150, %c0_151, %c0_152] : memref<3x8x3xbf16, #tpu.memory_space<vmem>>, vector<1x8x3xbf16>
    %178 = vector.shape_cast %177 : vector<1x8x3xbf16> to vector<8x3xbf16>
    %cst_153 = arith.constant dense<0.000000e+00> : vector<8x16xf32>
    %179 = tpu.matmul %178, %176, %cst_153 {dimension_numbers = #tpu.dot_dimension_numbers<[1], [0], [0], [1], [0, 0, 1, 1], [], []>} : vector<8x3xbf16>, vector<3x16xbf16>, vector<8x16xf32> -> vector<8x16xf32>
    %180 = arith.addf %174, %179 : vector<8x16xf32>
    %181 = vector.broadcast %8 : vector<8x1xf32> to vector<8x16xf32>
    %182 = arith.addf %180, %181 : vector<8x16xf32>
    %cst_154 = arith.constant 0.000000e+00 : f32
    %cst_155 = arith.constant 2.000000e+01 : f32
    %183 = vector.broadcast %cst_154 : f32 to vector<8x16xf32>
    %184 = arith.maximumf %183, %182 : vector<8x16xf32>
    %185 = vector.broadcast %cst_155 : f32 to vector<8x16xf32>
    %186 = arith.minimumf %185, %184 : vector<8x16xf32>
    %cst_156 = arith.constant 0.000000e+00 : f32
    %187 = vector.shape_cast %7 : vector<1x16xi1> to vector<1x16xi1>
    %188 = vector.broadcast %187 : vector<1x16xi1> to vector<8x16xi1>
    %189 = vector.broadcast %cst_156 : f32 to vector<8x16xf32>
    %190 = arith.select %188, %186, %189 : vector<8x16xi1>, vector<8x16xf32>
    %191 = arith.truncf %190 : vector<8x16xf32> to vector<8x16xbf16>
    %c0_157 = arith.constant 0 : index
    %c0_158 = arith.constant 0 : index
    %c5 = arith.constant 5 : index
    %c0_159 = arith.constant 0 : index
    %192 = vector.load %arg6[%c0_157, %c0_158, %c5, %c0_159] : memref<1x8x8x16xbf16, #tpu.memory_space<vmem>>, vector<1x8x1x16xbf16>
    %193 = vector.shape_cast %192 : vector<1x8x1x16xbf16> to vector<8x16xbf16>
    %194 = vector.shape_cast %191 : vector<8x16xbf16> to vector<1x8x1x16xbf16>
    tpu.vector_store %arg6[%c0_157, %c0_158, %c5, %c0_159], %194 {strides = array<i32>} : memref<1x8x8x16xbf16, #tpu.memory_space<vmem>>, vector<1x8x1x16xbf16>,
    %c0_160 = arith.constant 0 : index
    %c12 = arith.constant 12 : index
    %c0_161 = arith.constant 0 : index
    %195 = vector.load %arg3[%c0_160, %c12, %c0_161] : memref<1x18x18xbf16, #tpu.memory_space<vmem>>, vector<1x3x16xbf16>
    %196 = vector.shape_cast %195 : vector<1x3x16xbf16> to vector<3x16xbf16>
    %c0_162 = arith.constant 0 : index
    %c0_163 = arith.constant 0 : index
    %c0_164 = arith.constant 0 : index
    %197 = vector.load %arg4[%c0_162, %c0_163, %c0_164] : memref<3x8x3xbf16, #tpu.memory_space<vmem>>, vector<1x8x3xbf16>
    %198 = vector.shape_cast %197 : vector<1x8x3xbf16> to vector<8x3xbf16>
    %cst_165 = arith.constant dense<0.000000e+00> : vector<8x16xf32>
    %199 = tpu.matmul %198, %196, %cst_165 {dimension_numbers = #tpu.dot_dimension_numbers<[1], [0], [0], [1], [0, 0, 1, 1], [], []>} : vector<8x3xbf16>, vector<3x16xbf16>, vector<8x16xf32> -> vector<8x16xf32>
    %c0_166 = arith.constant 0 : index
    %c12_167 = arith.constant 12 : index
    %c1_168 = arith.constant 1 : index
    %200 = vector.load %arg3[%c0_166, %c12_167, %c1_168] : memref<1x18x18xbf16, #tpu.memory_space<vmem>>, vector<1x3x16xbf16>
    %201 = vector.shape_cast %200 : vector<1x3x16xbf16> to vector<3x16xbf16>
    %c1_169 = arith.constant 1 : index
    %c0_170 = arith.constant 0 : index
    %c0_171 = arith.constant 0 : index
    %202 = vector.load %arg4[%c1_169, %c0_170, %c0_171] : memref<3x8x3xbf16, #tpu.memory_space<vmem>>, vector<1x8x3xbf16>
    %203 = vector.shape_cast %202 : vector<1x8x3xbf16> to vector<8x3xbf16>
    %cst_172 = arith.constant dense<0.000000e+00> : vector<8x16xf32>
    %204 = tpu.matmul %203, %201, %cst_172 {dimension_numbers = #tpu.dot_dimension_numbers<[1], [0], [0], [1], [0, 0, 1, 1], [], []>} : vector<8x3xbf16>, vector<3x16xbf16>, vector<8x16xf32> -> vector<8x16xf32>
    %205 = arith.addf %199, %204 : vector<8x16xf32>
    %c0_173 = arith.constant 0 : index
    %c12_174 = arith.constant 12 : index
    %c2_175 = arith.constant 2 : index
    %206 = vector.load %arg3[%c0_173, %c12_174, %c2_175] : memref<1x18x18xbf16, #tpu.memory_space<vmem>>, vector<1x3x16xbf16>
    %207 = vector.shape_cast %206 : vector<1x3x16xbf16> to vector<3x16xbf16>
    %c2_176 = arith.constant 2 : index
    %c0_177 = arith.constant 0 : index
    %c0_178 = arith.constant 0 : index
    %208 = vector.load %arg4[%c2_176, %c0_177, %c0_178] : memref<3x8x3xbf16, #tpu.memory_space<vmem>>, vector<1x8x3xbf16>
    %209 = vector.shape_cast %208 : vector<1x8x3xbf16> to vector<8x3xbf16>
    %cst_179 = arith.constant dense<0.000000e+00> : vector<8x16xf32>
    %210 = tpu.matmul %209, %207, %cst_179 {dimension_numbers = #tpu.dot_dimension_numbers<[1], [0], [0], [1], [0, 0, 1, 1], [], []>} : vector<8x3xbf16>, vector<3x16xbf16>, vector<8x16xf32> -> vector<8x16xf32>
    %211 = arith.addf %205, %210 : vector<8x16xf32>
    %212 = vector.broadcast %8 : vector<8x1xf32> to vector<8x16xf32>
    %213 = arith.addf %211, %212 : vector<8x16xf32>
    %cst_180 = arith.constant 0.000000e+00 : f32
    %cst_181 = arith.constant 2.000000e+01 : f32
    %214 = vector.broadcast %cst_180 : f32 to vector<8x16xf32>
    %215 = arith.maximumf %214, %213 : vector<8x16xf32>
    %216 = vector.broadcast %cst_181 : f32 to vector<8x16xf32>
    %217 = arith.minimumf %216, %215 : vector<8x16xf32>
    %cst_182 = arith.constant 0.000000e+00 : f32
    %218 = vector.shape_cast %7 : vector<1x16xi1> to vector<1x16xi1>
    %219 = vector.broadcast %218 : vector<1x16xi1> to vector<8x16xi1>
    %220 = vector.broadcast %cst_182 : f32 to vector<8x16xf32>
    %221 = arith.select %219, %217, %220 : vector<8x16xi1>, vector<8x16xf32>
    %222 = arith.truncf %221 : vector<8x16xf32> to vector<8x16xbf16>
    %c0_183 = arith.constant 0 : index
    %c0_184 = arith.constant 0 : index
    %c6_185 = arith.constant 6 : index
    %c0_186 = arith.constant 0 : index
    %223 = vector.load %arg6[%c0_183, %c0_184, %c6_185, %c0_186] : memref<1x8x8x16xbf16, #tpu.memory_space<vmem>>, vector<1x8x1x16xbf16>
    %224 = vector.shape_cast %223 : vector<1x8x1x16xbf16> to vector<8x16xbf16>
    %225 = vector.shape_cast %222 : vector<8x16xbf16> to vector<1x8x1x16xbf16>
    tpu.vector_store %arg6[%c0_183, %c0_184, %c6_185, %c0_186], %225 {strides = array<i32>} : memref<1x8x8x16xbf16, #tpu.memory_space<vmem>>, vector<1x8x1x16xbf16>,
    %c0_187 = arith.constant 0 : index
    %c14 = arith.constant 14 : index
    %c0_188 = arith.constant 0 : index
    %226 = vector.load %arg3[%c0_187, %c14, %c0_188] : memref<1x18x18xbf16, #tpu.memory_space<vmem>>, vector<1x3x16xbf16>
    %227 = vector.shape_cast %226 : vector<1x3x16xbf16> to vector<3x16xbf16>
    %c0_189 = arith.constant 0 : index
    %c0_190 = arith.constant 0 : index
    %c0_191 = arith.constant 0 : index
    %228 = vector.load %arg4[%c0_189, %c0_190, %c0_191] : memref<3x8x3xbf16, #tpu.memory_space<vmem>>, vector<1x8x3xbf16>
    %229 = vector.shape_cast %228 : vector<1x8x3xbf16> to vector<8x3xbf16>
    %cst_192 = arith.constant dense<0.000000e+00> : vector<8x16xf32>
    %230 = tpu.matmul %229, %227, %cst_192 {dimension_numbers = #tpu.dot_dimension_numbers<[1], [0], [0], [1], [0, 0, 1, 1], [], []>} : vector<8x3xbf16>, vector<3x16xbf16>, vector<8x16xf32> -> vector<8x16xf32>
    %c0_193 = arith.constant 0 : index
    %c14_194 = arith.constant 14 : index
    %c1_195 = arith.constant 1 : index
    %231 = vector.load %arg3[%c0_193, %c14_194, %c1_195] : memref<1x18x18xbf16, #tpu.memory_space<vmem>>, vector<1x3x16xbf16>
    %232 = vector.shape_cast %231 : vector<1x3x16xbf16> to vector<3x16xbf16>
    %c1_196 = arith.constant 1 : index
    %c0_197 = arith.constant 0 : index
    %c0_198 = arith.constant 0 : index
    %233 = vector.load %arg4[%c1_196, %c0_197, %c0_198] : memref<3x8x3xbf16, #tpu.memory_space<vmem>>, vector<1x8x3xbf16>
    %234 = vector.shape_cast %233 : vector<1x8x3xbf16> to vector<8x3xbf16>
    %cst_199 = arith.constant dense<0.000000e+00> : vector<8x16xf32>
    %235 = tpu.matmul %234, %232, %cst_199 {dimension_numbers = #tpu.dot_dimension_numbers<[1], [0], [0], [1], [0, 0, 1, 1], [], []>} : vector<8x3xbf16>, vector<3x16xbf16>, vector<8x16xf32> -> vector<8x16xf32>
    %236 = arith.addf %230, %235 : vector<8x16xf32>
    %c0_200 = arith.constant 0 : index
    %c14_201 = arith.constant 14 : index
    %c2_202 = arith.constant 2 : index
    %237 = vector.load %arg3[%c0_200, %c14_201, %c2_202] : memref<1x18x18xbf16, #tpu.memory_space<vmem>>, vector<1x3x16xbf16>
    %238 = vector.shape_cast %237 : vector<1x3x16xbf16> to vector<3x16xbf16>
    %c2_203 = arith.constant 2 : index
    %c0_204 = arith.constant 0 : index
    %c0_205 = arith.constant 0 : index
    %239 = vector.load %arg4[%c2_203, %c0_204, %c0_205] : memref<3x8x3xbf16, #tpu.memory_space<vmem>>, vector<1x8x3xbf16>
    %240 = vector.shape_cast %239 : vector<1x8x3xbf16> to vector<8x3xbf16>
    %cst_206 = arith.constant dense<0.000000e+00> : vector<8x16xf32>
    %241 = tpu.matmul %240, %238, %cst_206 {dimension_numbers = #tpu.dot_dimension_numbers<[1], [0], [0], [1], [0, 0, 1, 1], [], []>} : vector<8x3xbf16>, vector<3x16xbf16>, vector<8x16xf32> -> vector<8x16xf32>
    %242 = arith.addf %236, %241 : vector<8x16xf32>
    %243 = vector.broadcast %8 : vector<8x1xf32> to vector<8x16xf32>
    %244 = arith.addf %242, %243 : vector<8x16xf32>
    %cst_207 = arith.constant 0.000000e+00 : f32
    %cst_208 = arith.constant 2.000000e+01 : f32
    %245 = vector.broadcast %cst_207 : f32 to vector<8x16xf32>
    %246 = arith.maximumf %245, %244 : vector<8x16xf32>
    %247 = vector.broadcast %cst_208 : f32 to vector<8x16xf32>
    %248 = arith.minimumf %247, %246 : vector<8x16xf32>
    %cst_209 = arith.constant 0.000000e+00 : f32
    %249 = vector.shape_cast %7 : vector<1x16xi1> to vector<1x16xi1>
    %250 = vector.broadcast %249 : vector<1x16xi1> to vector<8x16xi1>
    %251 = vector.broadcast %cst_209 : f32 to vector<8x16xf32>
    %252 = arith.select %250, %248, %251 : vector<8x16xi1>, vector<8x16xf32>
    %253 = arith.truncf %252 : vector<8x16xf32> to vector<8x16xbf16>
    %c0_210 = arith.constant 0 : index
    %c0_211 = arith.constant 0 : index
    %c7 = arith.constant 7 : index
    %c0_212 = arith.constant 0 : index
    %254 = vector.load %arg6[%c0_210, %c0_211, %c7, %c0_212] : memref<1x8x8x16xbf16, #tpu.memory_space<vmem>>, vector<1x8x1x16xbf16>
    %255 = vector.shape_cast %254 : vector<1x8x1x16xbf16> to vector<8x16xbf16>
    %256 = vector.shape_cast %253 : vector<8x16xbf16> to vector<1x8x1x16xbf16>
    tpu.vector_store %arg6[%c0_210, %c0_211, %c7, %c0_212], %256 {strides = array<i32>} : memref<1x8x8x16xbf16, #tpu.memory_space<vmem>>, vector<1x8x1x16xbf16>,
    return
  }
  func.func @transform_0(%arg0: i32, %arg1: i32, %arg2: memref<2xi32, #tpu.memory_space<smem>>) -> (i32, i32, i32) {
    %c1_i32 = arith.constant 1 : i32
    %0 = arith.muli %arg0, %c1_i32 : i32
    %1 = arith.addi %0, %arg1 : i32
    %c0_i32 = arith.constant 0 : i32
    %c0_i32_0 = arith.constant 0 : i32
    %c0_i32_1 = arith.constant 0 : i32
    return %1, %c0_i32, %c0_i32_0 : i32, i32, i32
  }
  func.func @transform_1(%arg0: i32, %arg1: i32, %arg2: memref<2xi32, #tpu.memory_space<smem>>) -> (i32, i32, i32) {
    %c0_i32 = arith.constant 0 : i32
    %c0_i32_0 = arith.constant 0 : i32
    %c0_i32_1 = arith.constant 0 : i32
    %c0_i32_2 = arith.constant 0 : i32
    return %c0_i32, %c0_i32_0, %c0_i32_1 : i32, i32, i32
  }
  func.func @transform_2(%arg0: i32, %arg1: i32, %arg2: memref<2xi32, #tpu.memory_space<smem>>) -> (i32, i32) {
    %c0_i32 = arith.constant 0 : i32
    %c0_i32_0 = arith.constant 0 : i32
    %c0_i32_1 = arith.constant 0 : i32
    return %c0_i32, %c0_i32_0 : i32, i32
  }
  func.func @transform_3(%arg0: i32, %arg1: i32, %arg2: memref<2xi32, #tpu.memory_space<smem>>) -> (i32, i32, i32, i32) {
    %c0_i32 = arith.constant 0 : i32
    %c0_i32_0 = arith.constant 0 : i32
    %c0_i32_1 = arith.constant 0 : i32
    return %arg0, %c0_i32, %c0_i32_0, %arg1 : i32, i32, i32, i32
  }
}

module attributes {stable_mosaic.version = 11 : i64} {
  func.func @_conv_block_kernel(%arg0: i32, %arg1: i32, %arg2: memref<2xi32, #tpu.memory_space<smem>>, %arg3: memref<1x80x18xbf16, #tpu.memory_space<vmem>>, %arg4: memref<3x8x24xbf16, #tpu.memory_space<vmem>>, %arg5: memref<8x1xf32, #tpu.memory_space<vmem>>, %arg6: memref<1x8x8x16xbf16, #tpu.memory_space<vmem>>) attributes {dimension_semantics = [#tpu.dimension_semantics<parallel>, #tpu.dimension_semantics<parallel>], iteration_bounds = array<i64: 2, 1>, scalar_prefetch = 1 : i64, scratch_operands = 0 : i64, tpu.core_type = #tpu.core_type<tc>, window_params = [{transform_indices = @transform_0, window_bounds = array<i64: 1, 80, 18>}, {pipeline_mode = #tpu.pipeline_mode<synchronous>, transform_indices = @transform_1, window_bounds = array<i64: 3, 8, 24>}, {pipeline_mode = #tpu.pipeline_mode<synchronous>, transform_indices = @transform_2, window_bounds = array<i64: 8, 1>}, {transform_indices = @transform_3, window_bounds = array<i64: 1, 8, 8, 16>}]} {
    %0 = arith.index_cast %arg0 : i32 to index
    %1 = memref.load %arg2[%0] : memref<2xi32, #tpu.memory_space<smem>>
    %2 = tpu.iota {dimensions = array<i32: 1>} : vector<1x16xi32>
    %c16_i32 = arith.constant 16 : i32
    %3 = arith.muli %arg1, %c16_i32 : i32
    %4 = vector.broadcast %3 : i32 to vector<1x16xi32>
    %5 = arith.addi %2, %4 : vector<1x16xi32>
    %6 = vector.broadcast %1 : i32 to vector<1x16xi32>
    %7 = arith.cmpi slt, %5, %6 : vector<1x16xi32>
    %c0 = arith.constant 0 : index
    %c0_0 = arith.constant 0 : index
    %8 = vector.load %arg5[%c0, %c0_0] : memref<8x1xf32, #tpu.memory_space<vmem>>, vector<8x1xf32>
    %c0_1 = arith.constant 0 : index
    %c0_2 = arith.constant 0 : index
    %c0_3 = arith.constant 0 : index
    %9 = vector.load %arg3[%c0_1, %c0_2, %c0_3] : memref<1x80x18xbf16, #tpu.memory_space<vmem>>, vector<1x24x16xbf16>
    %10 = vector.shape_cast %9 : vector<1x24x16xbf16> to vector<24x16xbf16>
    %c0_4 = arith.constant 0 : index
    %c0_5 = arith.constant 0 : index
    %c0_6 = arith.constant 0 : index
    %11 = vector.load %arg4[%c0_4, %c0_5, %c0_6] : memref<3x8x24xbf16, #tpu.memory_space<vmem>>, vector<1x8x24xbf16>
    %12 = vector.shape_cast %11 : vector<1x8x24xbf16> to vector<8x24xbf16>
    %cst = arith.constant dense<0.000000e+00> : vector<8x16xf32>
    %13 = tpu.matmul %12, %10, %cst {dimension_numbers = #tpu.dot_dimension_numbers<[1], [0], [0], [1], [0, 0, 1, 1], [], []>} : vector<8x24xbf16>, vector<24x16xbf16>, vector<8x16xf32> -> vector<8x16xf32>
    %c0_7 = arith.constant 0 : index
    %c0_8 = arith.constant 0 : index
    %c1 = arith.constant 1 : index
    %14 = vector.load %arg3[%c0_7, %c0_8, %c1] : memref<1x80x18xbf16, #tpu.memory_space<vmem>>, vector<1x24x16xbf16>
    %15 = vector.shape_cast %14 : vector<1x24x16xbf16> to vector<24x16xbf16>
    %c1_9 = arith.constant 1 : index
    %c0_10 = arith.constant 0 : index
    %c0_11 = arith.constant 0 : index
    %16 = vector.load %arg4[%c1_9, %c0_10, %c0_11] : memref<3x8x24xbf16, #tpu.memory_space<vmem>>, vector<1x8x24xbf16>
    %17 = vector.shape_cast %16 : vector<1x8x24xbf16> to vector<8x24xbf16>
    %cst_12 = arith.constant dense<0.000000e+00> : vector<8x16xf32>
    %18 = tpu.matmul %17, %15, %cst_12 {dimension_numbers = #tpu.dot_dimension_numbers<[1], [0], [0], [1], [0, 0, 1, 1], [], []>} : vector<8x24xbf16>, vector<24x16xbf16>, vector<8x16xf32> -> vector<8x16xf32>
    %19 = arith.addf %13, %18 : vector<8x16xf32>
    %c0_13 = arith.constant 0 : index
    %c0_14 = arith.constant 0 : index
    %c2 = arith.constant 2 : index
    %20 = vector.load %arg3[%c0_13, %c0_14, %c2] : memref<1x80x18xbf16, #tpu.memory_space<vmem>>, vector<1x24x16xbf16>
    %21 = vector.shape_cast %20 : vector<1x24x16xbf16> to vector<24x16xbf16>
    %c2_15 = arith.constant 2 : index
    %c0_16 = arith.constant 0 : index
    %c0_17 = arith.constant 0 : index
    %22 = vector.load %arg4[%c2_15, %c0_16, %c0_17] : memref<3x8x24xbf16, #tpu.memory_space<vmem>>, vector<1x8x24xbf16>
    %23 = vector.shape_cast %22 : vector<1x8x24xbf16> to vector<8x24xbf16>
    %cst_18 = arith.constant dense<0.000000e+00> : vector<8x16xf32>
    %24 = tpu.matmul %23, %21, %cst_18 {dimension_numbers = #tpu.dot_dimension_numbers<[1], [0], [0], [1], [0, 0, 1, 1], [], []>} : vector<8x24xbf16>, vector<24x16xbf16>, vector<8x16xf32> -> vector<8x16xf32>
    %25 = arith.addf %19, %24 : vector<8x16xf32>
    %26 = vector.broadcast %8 : vector<8x1xf32> to vector<8x16xf32>
    %27 = arith.addf %25, %26 : vector<8x16xf32>
    %cst_19 = arith.constant 0.000000e+00 : f32
    %cst_20 = arith.constant 2.000000e+01 : f32
    %28 = vector.broadcast %cst_19 : f32 to vector<8x16xf32>
    %29 = arith.maximumf %28, %27 : vector<8x16xf32>
    %30 = vector.broadcast %cst_20 : f32 to vector<8x16xf32>
    %31 = arith.minimumf %30, %29 : vector<8x16xf32>
    %cst_21 = arith.constant 0.000000e+00 : f32
    %32 = vector.shape_cast %7 : vector<1x16xi1> to vector<1x16xi1>
    %33 = vector.broadcast %32 : vector<1x16xi1> to vector<8x16xi1>
    %34 = vector.broadcast %cst_21 : f32 to vector<8x16xf32>
    %35 = arith.select %33, %31, %34 : vector<8x16xi1>, vector<8x16xf32>
    %36 = arith.truncf %35 : vector<8x16xf32> to vector<8x16xbf16>
    %c0_22 = arith.constant 0 : index
    %c0_23 = arith.constant 0 : index
    %c0_24 = arith.constant 0 : index
    %c0_25 = arith.constant 0 : index
    %37 = vector.load %arg6[%c0_22, %c0_23, %c0_24, %c0_25] : memref<1x8x8x16xbf16, #tpu.memory_space<vmem>>, vector<1x8x1x16xbf16>
    %38 = vector.shape_cast %37 : vector<1x8x1x16xbf16> to vector<8x16xbf16>
    %39 = vector.shape_cast %36 : vector<8x16xbf16> to vector<1x8x1x16xbf16>
    tpu.vector_store %arg6[%c0_22, %c0_23, %c0_24, %c0_25], %39 {strides = array<i32>} : memref<1x8x8x16xbf16, #tpu.memory_space<vmem>>, vector<1x8x1x16xbf16>,
    %c0_26 = arith.constant 0 : index
    %c8 = arith.constant 8 : index
    %c0_27 = arith.constant 0 : index
    %40 = vector.load %arg3[%c0_26, %c8, %c0_27] : memref<1x80x18xbf16, #tpu.memory_space<vmem>>, vector<1x24x16xbf16>
    %41 = vector.shape_cast %40 : vector<1x24x16xbf16> to vector<24x16xbf16>
    %c0_28 = arith.constant 0 : index
    %c0_29 = arith.constant 0 : index
    %c0_30 = arith.constant 0 : index
    %42 = vector.load %arg4[%c0_28, %c0_29, %c0_30] : memref<3x8x24xbf16, #tpu.memory_space<vmem>>, vector<1x8x24xbf16>
    %43 = vector.shape_cast %42 : vector<1x8x24xbf16> to vector<8x24xbf16>
    %cst_31 = arith.constant dense<0.000000e+00> : vector<8x16xf32>
    %44 = tpu.matmul %43, %41, %cst_31 {dimension_numbers = #tpu.dot_dimension_numbers<[1], [0], [0], [1], [0, 0, 1, 1], [], []>} : vector<8x24xbf16>, vector<24x16xbf16>, vector<8x16xf32> -> vector<8x16xf32>
    %c0_32 = arith.constant 0 : index
    %c8_33 = arith.constant 8 : index
    %c1_34 = arith.constant 1 : index
    %45 = vector.load %arg3[%c0_32, %c8_33, %c1_34] : memref<1x80x18xbf16, #tpu.memory_space<vmem>>, vector<1x24x16xbf16>
    %46 = vector.shape_cast %45 : vector<1x24x16xbf16> to vector<24x16xbf16>
    %c1_35 = arith.constant 1 : index
    %c0_36 = arith.constant 0 : index
    %c0_37 = arith.constant 0 : index
    %47 = vector.load %arg4[%c1_35, %c0_36, %c0_37] : memref<3x8x24xbf16, #tpu.memory_space<vmem>>, vector<1x8x24xbf16>
    %48 = vector.shape_cast %47 : vector<1x8x24xbf16> to vector<8x24xbf16>
    %cst_38 = arith.constant dense<0.000000e+00> : vector<8x16xf32>
    %49 = tpu.matmul %48, %46, %cst_38 {dimension_numbers = #tpu.dot_dimension_numbers<[1], [0], [0], [1], [0, 0, 1, 1], [], []>} : vector<8x24xbf16>, vector<24x16xbf16>, vector<8x16xf32> -> vector<8x16xf32>
    %50 = arith.addf %44, %49 : vector<8x16xf32>
    %c0_39 = arith.constant 0 : index
    %c8_40 = arith.constant 8 : index
    %c2_41 = arith.constant 2 : index
    %51 = vector.load %arg3[%c0_39, %c8_40, %c2_41] : memref<1x80x18xbf16, #tpu.memory_space<vmem>>, vector<1x24x16xbf16>
    %52 = vector.shape_cast %51 : vector<1x24x16xbf16> to vector<24x16xbf16>
    %c2_42 = arith.constant 2 : index
    %c0_43 = arith.constant 0 : index
    %c0_44 = arith.constant 0 : index
    %53 = vector.load %arg4[%c2_42, %c0_43, %c0_44] : memref<3x8x24xbf16, #tpu.memory_space<vmem>>, vector<1x8x24xbf16>
    %54 = vector.shape_cast %53 : vector<1x8x24xbf16> to vector<8x24xbf16>
    %cst_45 = arith.constant dense<0.000000e+00> : vector<8x16xf32>
    %55 = tpu.matmul %54, %52, %cst_45 {dimension_numbers = #tpu.dot_dimension_numbers<[1], [0], [0], [1], [0, 0, 1, 1], [], []>} : vector<8x24xbf16>, vector<24x16xbf16>, vector<8x16xf32> -> vector<8x16xf32>
    %56 = arith.addf %50, %55 : vector<8x16xf32>
    %57 = vector.broadcast %8 : vector<8x1xf32> to vector<8x16xf32>
    %58 = arith.addf %56, %57 : vector<8x16xf32>
    %cst_46 = arith.constant 0.000000e+00 : f32
    %cst_47 = arith.constant 2.000000e+01 : f32
    %59 = vector.broadcast %cst_46 : f32 to vector<8x16xf32>
    %60 = arith.maximumf %59, %58 : vector<8x16xf32>
    %61 = vector.broadcast %cst_47 : f32 to vector<8x16xf32>
    %62 = arith.minimumf %61, %60 : vector<8x16xf32>
    %cst_48 = arith.constant 0.000000e+00 : f32
    %63 = vector.shape_cast %7 : vector<1x16xi1> to vector<1x16xi1>
    %64 = vector.broadcast %63 : vector<1x16xi1> to vector<8x16xi1>
    %65 = vector.broadcast %cst_48 : f32 to vector<8x16xf32>
    %66 = arith.select %64, %62, %65 : vector<8x16xi1>, vector<8x16xf32>
    %67 = arith.truncf %66 : vector<8x16xf32> to vector<8x16xbf16>
    %c0_49 = arith.constant 0 : index
    %c0_50 = arith.constant 0 : index
    %c1_51 = arith.constant 1 : index
    %c0_52 = arith.constant 0 : index
    %68 = vector.load %arg6[%c0_49, %c0_50, %c1_51, %c0_52] : memref<1x8x8x16xbf16, #tpu.memory_space<vmem>>, vector<1x8x1x16xbf16>
    %69 = vector.shape_cast %68 : vector<1x8x1x16xbf16> to vector<8x16xbf16>
    %70 = vector.shape_cast %67 : vector<8x16xbf16> to vector<1x8x1x16xbf16>
    tpu.vector_store %arg6[%c0_49, %c0_50, %c1_51, %c0_52], %70 {strides = array<i32>} : memref<1x8x8x16xbf16, #tpu.memory_space<vmem>>, vector<1x8x1x16xbf16>,
    %c0_53 = arith.constant 0 : index
    %c16 = arith.constant 16 : index
    %c0_54 = arith.constant 0 : index
    %71 = vector.load %arg3[%c0_53, %c16, %c0_54] : memref<1x80x18xbf16, #tpu.memory_space<vmem>>, vector<1x24x16xbf16>
    %72 = vector.shape_cast %71 : vector<1x24x16xbf16> to vector<24x16xbf16>
    %c0_55 = arith.constant 0 : index
    %c0_56 = arith.constant 0 : index
    %c0_57 = arith.constant 0 : index
    %73 = vector.load %arg4[%c0_55, %c0_56, %c0_57] : memref<3x8x24xbf16, #tpu.memory_space<vmem>>, vector<1x8x24xbf16>
    %74 = vector.shape_cast %73 : vector<1x8x24xbf16> to vector<8x24xbf16>
    %cst_58 = arith.constant dense<0.000000e+00> : vector<8x16xf32>
    %75 = tpu.matmul %74, %72, %cst_58 {dimension_numbers = #tpu.dot_dimension_numbers<[1], [0], [0], [1], [0, 0, 1, 1], [], []>} : vector<8x24xbf16>, vector<24x16xbf16>, vector<8x16xf32> -> vector<8x16xf32>
    %c0_59 = arith.constant 0 : index
    %c16_60 = arith.constant 16 : index
    %c1_61 = arith.constant 1 : index
    %76 = vector.load %arg3[%c0_59, %c16_60, %c1_61] : memref<1x80x18xbf16, #tpu.memory_space<vmem>>, vector<1x24x16xbf16>
    %77 = vector.shape_cast %76 : vector<1x24x16xbf16> to vector<24x16xbf16>
    %c1_62 = arith.constant 1 : index
    %c0_63 = arith.constant 0 : index
    %c0_64 = arith.constant 0 : index
    %78 = vector.load %arg4[%c1_62, %c0_63, %c0_64] : memref<3x8x24xbf16, #tpu.memory_space<vmem>>, vector<1x8x24xbf16>
    %79 = vector.shape_cast %78 : vector<1x8x24xbf16> to vector<8x24xbf16>
    %cst_65 = arith.constant dense<0.000000e+00> : vector<8x16xf32>
    %80 = tpu.matmul %79, %77, %cst_65 {dimension_numbers = #tpu.dot_dimension_numbers<[1], [0], [0], [1], [0, 0, 1, 1], [], []>} : vector<8x24xbf16>, vector<24x16xbf16>, vector<8x16xf32> -> vector<8x16xf32>
    %81 = arith.addf %75, %80 : vector<8x16xf32>
    %c0_66 = arith.constant 0 : index
    %c16_67 = arith.constant 16 : index
    %c2_68 = arith.constant 2 : index
    %82 = vector.load %arg3[%c0_66, %c16_67, %c2_68] : memref<1x80x18xbf16, #tpu.memory_space<vmem>>, vector<1x24x16xbf16>
    %83 = vector.shape_cast %82 : vector<1x24x16xbf16> to vector<24x16xbf16>
    %c2_69 = arith.constant 2 : index
    %c0_70 = arith.constant 0 : index
    %c0_71 = arith.constant 0 : index
    %84 = vector.load %arg4[%c2_69, %c0_70, %c0_71] : memref<3x8x24xbf16, #tpu.memory_space<vmem>>, vector<1x8x24xbf16>
    %85 = vector.shape_cast %84 : vector<1x8x24xbf16> to vector<8x24xbf16>
    %cst_72 = arith.constant dense<0.000000e+00> : vector<8x16xf32>
    %86 = tpu.matmul %85, %83, %cst_72 {dimension_numbers = #tpu.dot_dimension_numbers<[1], [0], [0], [1], [0, 0, 1, 1], [], []>} : vector<8x24xbf16>, vector<24x16xbf16>, vector<8x16xf32> -> vector<8x16xf32>
    %87 = arith.addf %81, %86 : vector<8x16xf32>
    %88 = vector.broadcast %8 : vector<8x1xf32> to vector<8x16xf32>
    %89 = arith.addf %87, %88 : vector<8x16xf32>
    %cst_73 = arith.constant 0.000000e+00 : f32
    %cst_74 = arith.constant 2.000000e+01 : f32
    %90 = vector.broadcast %cst_73 : f32 to vector<8x16xf32>
    %91 = arith.maximumf %90, %89 : vector<8x16xf32>
    %92 = vector.broadcast %cst_74 : f32 to vector<8x16xf32>
    %93 = arith.minimumf %92, %91 : vector<8x16xf32>
    %cst_75 = arith.constant 0.000000e+00 : f32
    %94 = vector.shape_cast %7 : vector<1x16xi1> to vector<1x16xi1>
    %95 = vector.broadcast %94 : vector<1x16xi1> to vector<8x16xi1>
    %96 = vector.broadcast %cst_75 : f32 to vector<8x16xf32>
    %97 = arith.select %95, %93, %96 : vector<8x16xi1>, vector<8x16xf32>
    %98 = arith.truncf %97 : vector<8x16xf32> to vector<8x16xbf16>
    %c0_76 = arith.constant 0 : index
    %c0_77 = arith.constant 0 : index
    %c2_78 = arith.constant 2 : index
    %c0_79 = arith.constant 0 : index
    %99 = vector.load %arg6[%c0_76, %c0_77, %c2_78, %c0_79] : memref<1x8x8x16xbf16, #tpu.memory_space<vmem>>, vector<1x8x1x16xbf16>
    %100 = vector.shape_cast %99 : vector<1x8x1x16xbf16> to vector<8x16xbf16>
    %101 = vector.shape_cast %98 : vector<8x16xbf16> to vector<1x8x1x16xbf16>
    tpu.vector_store %arg6[%c0_76, %c0_77, %c2_78, %c0_79], %101 {strides = array<i32>} : memref<1x8x8x16xbf16, #tpu.memory_space<vmem>>, vector<1x8x1x16xbf16>,
    %c0_80 = arith.constant 0 : index
    %c24 = arith.constant 24 : index
    %c0_81 = arith.constant 0 : index
    %102 = vector.load %arg3[%c0_80, %c24, %c0_81] : memref<1x80x18xbf16, #tpu.memory_space<vmem>>, vector<1x24x16xbf16>
    %103 = vector.shape_cast %102 : vector<1x24x16xbf16> to vector<24x16xbf16>
    %c0_82 = arith.constant 0 : index
    %c0_83 = arith.constant 0 : index
    %c0_84 = arith.constant 0 : index
    %104 = vector.load %arg4[%c0_82, %c0_83, %c0_84] : memref<3x8x24xbf16, #tpu.memory_space<vmem>>, vector<1x8x24xbf16>
    %105 = vector.shape_cast %104 : vector<1x8x24xbf16> to vector<8x24xbf16>
    %cst_85 = arith.constant dense<0.000000e+00> : vector<8x16xf32>
    %106 = tpu.matmul %105, %103, %cst_85 {dimension_numbers = #tpu.dot_dimension_numbers<[1], [0], [0], [1], [0, 0, 1, 1], [], []>} : vector<8x24xbf16>, vector<24x16xbf16>, vector<8x16xf32> -> vector<8x16xf32>
    %c0_86 = arith.constant 0 : index
    %c24_87 = arith.constant 24 : index
    %c1_88 = arith.constant 1 : index
    %107 = vector.load %arg3[%c0_86, %c24_87, %c1_88] : memref<1x80x18xbf16, #tpu.memory_space<vmem>>, vector<1x24x16xbf16>
    %108 = vector.shape_cast %107 : vector<1x24x16xbf16> to vector<24x16xbf16>
    %c1_89 = arith.constant 1 : index
    %c0_90 = arith.constant 0 : index
    %c0_91 = arith.constant 0 : index
    %109 = vector.load %arg4[%c1_89, %c0_90, %c0_91] : memref<3x8x24xbf16, #tpu.memory_space<vmem>>, vector<1x8x24xbf16>
    %110 = vector.shape_cast %109 : vector<1x8x24xbf16> to vector<8x24xbf16>
    %cst_92 = arith.constant dense<0.000000e+00> : vector<8x16xf32>
    %111 = tpu.matmul %110, %108, %cst_92 {dimension_numbers = #tpu.dot_dimension_numbers<[1], [0], [0], [1], [0, 0, 1, 1], [], []>} : vector<8x24xbf16>, vector<24x16xbf16>, vector<8x16xf32> -> vector<8x16xf32>
    %112 = arith.addf %106, %111 : vector<8x16xf32>
    %c0_93 = arith.constant 0 : index
    %c24_94 = arith.constant 24 : index
    %c2_95 = arith.constant 2 : index
    %113 = vector.load %arg3[%c0_93, %c24_94, %c2_95] : memref<1x80x18xbf16, #tpu.memory_space<vmem>>, vector<1x24x16xbf16>
    %114 = vector.shape_cast %113 : vector<1x24x16xbf16> to vector<24x16xbf16>
    %c2_96 = arith.constant 2 : index
    %c0_97 = arith.constant 0 : index
    %c0_98 = arith.constant 0 : index
    %115 = vector.load %arg4[%c2_96, %c0_97, %c0_98] : memref<3x8x24xbf16, #tpu.memory_space<vmem>>, vector<1x8x24xbf16>
    %116 = vector.shape_cast %115 : vector<1x8x24xbf16> to vector<8x24xbf16>
    %cst_99 = arith.constant dense<0.000000e+00> : vector<8x16xf32>
    %117 = tpu.matmul %116, %114, %cst_99 {dimension_numbers = #tpu.dot_dimension_numbers<[1], [0], [0], [1], [0, 0, 1, 1], [], []>} : vector<8x24xbf16>, vector<24x16xbf16>, vector<8x16xf32> -> vector<8x16xf32>
    %118 = arith.addf %112, %117 : vector<8x16xf32>
    %119 = vector.broadcast %8 : vector<8x1xf32> to vector<8x16xf32>
    %120 = arith.addf %118, %119 : vector<8x16xf32>
    %cst_100 = arith.constant 0.000000e+00 : f32
    %cst_101 = arith.constant 2.000000e+01 : f32
    %121 = vector.broadcast %cst_100 : f32 to vector<8x16xf32>
    %122 = arith.maximumf %121, %120 : vector<8x16xf32>
    %123 = vector.broadcast %cst_101 : f32 to vector<8x16xf32>
    %124 = arith.minimumf %123, %122 : vector<8x16xf32>
    %cst_102 = arith.constant 0.000000e+00 : f32
    %125 = vector.shape_cast %7 : vector<1x16xi1> to vector<1x16xi1>
    %126 = vector.broadcast %125 : vector<1x16xi1> to vector<8x16xi1>
    %127 = vector.broadcast %cst_102 : f32 to vector<8x16xf32>
    %128 = arith.select %126, %124, %127 : vector<8x16xi1>, vector<8x16xf32>
    %129 = arith.truncf %128 : vector<8x16xf32> to vector<8x16xbf16>
    %c0_103 = arith.constant 0 : index
    %c0_104 = arith.constant 0 : index
    %c3 = arith.constant 3 : index
    %c0_105 = arith.constant 0 : index
    %130 = vector.load %arg6[%c0_103, %c0_104, %c3, %c0_105] : memref<1x8x8x16xbf16, #tpu.memory_space<vmem>>, vector<1x8x1x16xbf16>
    %131 = vector.shape_cast %130 : vector<1x8x1x16xbf16> to vector<8x16xbf16>
    %132 = vector.shape_cast %129 : vector<8x16xbf16> to vector<1x8x1x16xbf16>
    tpu.vector_store %arg6[%c0_103, %c0_104, %c3, %c0_105], %132 {strides = array<i32>} : memref<1x8x8x16xbf16, #tpu.memory_space<vmem>>, vector<1x8x1x16xbf16>,
    %c0_106 = arith.constant 0 : index
    %c32 = arith.constant 32 : index
    %c0_107 = arith.constant 0 : index
    %133 = vector.load %arg3[%c0_106, %c32, %c0_107] : memref<1x80x18xbf16, #tpu.memory_space<vmem>>, vector<1x24x16xbf16>
    %134 = vector.shape_cast %133 : vector<1x24x16xbf16> to vector<24x16xbf16>
    %c0_108 = arith.constant 0 : index
    %c0_109 = arith.constant 0 : index
    %c0_110 = arith.constant 0 : index
    %135 = vector.load %arg4[%c0_108, %c0_109, %c0_110] : memref<3x8x24xbf16, #tpu.memory_space<vmem>>, vector<1x8x24xbf16>
    %136 = vector.shape_cast %135 : vector<1x8x24xbf16> to vector<8x24xbf16>
    %cst_111 = arith.constant dense<0.000000e+00> : vector<8x16xf32>
    %137 = tpu.matmul %136, %134, %cst_111 {dimension_numbers = #tpu.dot_dimension_numbers<[1], [0], [0], [1], [0, 0, 1, 1], [], []>} : vector<8x24xbf16>, vector<24x16xbf16>, vector<8x16xf32> -> vector<8x16xf32>
    %c0_112 = arith.constant 0 : index
    %c32_113 = arith.constant 32 : index
    %c1_114 = arith.constant 1 : index
    %138 = vector.load %arg3[%c0_112, %c32_113, %c1_114] : memref<1x80x18xbf16, #tpu.memory_space<vmem>>, vector<1x24x16xbf16>
    %139 = vector.shape_cast %138 : vector<1x24x16xbf16> to vector<24x16xbf16>
    %c1_115 = arith.constant 1 : index
    %c0_116 = arith.constant 0 : index
    %c0_117 = arith.constant 0 : index
    %140 = vector.load %arg4[%c1_115, %c0_116, %c0_117] : memref<3x8x24xbf16, #tpu.memory_space<vmem>>, vector<1x8x24xbf16>
    %141 = vector.shape_cast %140 : vector<1x8x24xbf16> to vector<8x24xbf16>
    %cst_118 = arith.constant dense<0.000000e+00> : vector<8x16xf32>
    %142 = tpu.matmul %141, %139, %cst_118 {dimension_numbers = #tpu.dot_dimension_numbers<[1], [0], [0], [1], [0, 0, 1, 1], [], []>} : vector<8x24xbf16>, vector<24x16xbf16>, vector<8x16xf32> -> vector<8x16xf32>
    %143 = arith.addf %137, %142 : vector<8x16xf32>
    %c0_119 = arith.constant 0 : index
    %c32_120 = arith.constant 32 : index
    %c2_121 = arith.constant 2 : index
    %144 = vector.load %arg3[%c0_119, %c32_120, %c2_121] : memref<1x80x18xbf16, #tpu.memory_space<vmem>>, vector<1x24x16xbf16>
    %145 = vector.shape_cast %144 : vector<1x24x16xbf16> to vector<24x16xbf16>
    %c2_122 = arith.constant 2 : index
    %c0_123 = arith.constant 0 : index
    %c0_124 = arith.constant 0 : index
    %146 = vector.load %arg4[%c2_122, %c0_123, %c0_124] : memref<3x8x24xbf16, #tpu.memory_space<vmem>>, vector<1x8x24xbf16>
    %147 = vector.shape_cast %146 : vector<1x8x24xbf16> to vector<8x24xbf16>
    %cst_125 = arith.constant dense<0.000000e+00> : vector<8x16xf32>
    %148 = tpu.matmul %147, %145, %cst_125 {dimension_numbers = #tpu.dot_dimension_numbers<[1], [0], [0], [1], [0, 0, 1, 1], [], []>} : vector<8x24xbf16>, vector<24x16xbf16>, vector<8x16xf32> -> vector<8x16xf32>
    %149 = arith.addf %143, %148 : vector<8x16xf32>
    %150 = vector.broadcast %8 : vector<8x1xf32> to vector<8x16xf32>
    %151 = arith.addf %149, %150 : vector<8x16xf32>
    %cst_126 = arith.constant 0.000000e+00 : f32
    %cst_127 = arith.constant 2.000000e+01 : f32
    %152 = vector.broadcast %cst_126 : f32 to vector<8x16xf32>
    %153 = arith.maximumf %152, %151 : vector<8x16xf32>
    %154 = vector.broadcast %cst_127 : f32 to vector<8x16xf32>
    %155 = arith.minimumf %154, %153 : vector<8x16xf32>
    %cst_128 = arith.constant 0.000000e+00 : f32
    %156 = vector.shape_cast %7 : vector<1x16xi1> to vector<1x16xi1>
    %157 = vector.broadcast %156 : vector<1x16xi1> to vector<8x16xi1>
    %158 = vector.broadcast %cst_128 : f32 to vector<8x16xf32>
    %159 = arith.select %157, %155, %158 : vector<8x16xi1>, vector<8x16xf32>
    %160 = arith.truncf %159 : vector<8x16xf32> to vector<8x16xbf16>
    %c0_129 = arith.constant 0 : index
    %c0_130 = arith.constant 0 : index
    %c4 = arith.constant 4 : index
    %c0_131 = arith.constant 0 : index
    %161 = vector.load %arg6[%c0_129, %c0_130, %c4, %c0_131] : memref<1x8x8x16xbf16, #tpu.memory_space<vmem>>, vector<1x8x1x16xbf16>
    %162 = vector.shape_cast %161 : vector<1x8x1x16xbf16> to vector<8x16xbf16>
    %163 = vector.shape_cast %160 : vector<8x16xbf16> to vector<1x8x1x16xbf16>
    tpu.vector_store %arg6[%c0_129, %c0_130, %c4, %c0_131], %163 {strides = array<i32>} : memref<1x8x8x16xbf16, #tpu.memory_space<vmem>>, vector<1x8x1x16xbf16>,
    %c0_132 = arith.constant 0 : index
    %c40 = arith.constant 40 : index
    %c0_133 = arith.constant 0 : index
    %164 = vector.load %arg3[%c0_132, %c40, %c0_133] : memref<1x80x18xbf16, #tpu.memory_space<vmem>>, vector<1x24x16xbf16>
    %165 = vector.shape_cast %164 : vector<1x24x16xbf16> to vector<24x16xbf16>
    %c0_134 = arith.constant 0 : index
    %c0_135 = arith.constant 0 : index
    %c0_136 = arith.constant 0 : index
    %166 = vector.load %arg4[%c0_134, %c0_135, %c0_136] : memref<3x8x24xbf16, #tpu.memory_space<vmem>>, vector<1x8x24xbf16>
    %167 = vector.shape_cast %166 : vector<1x8x24xbf16> to vector<8x24xbf16>
    %cst_137 = arith.constant dense<0.000000e+00> : vector<8x16xf32>
    %168 = tpu.matmul %167, %165, %cst_137 {dimension_numbers = #tpu.dot_dimension_numbers<[1], [0], [0], [1], [0, 0, 1, 1], [], []>} : vector<8x24xbf16>, vector<24x16xbf16>, vector<8x16xf32> -> vector<8x16xf32>
    %c0_138 = arith.constant 0 : index
    %c40_139 = arith.constant 40 : index
    %c1_140 = arith.constant 1 : index
    %169 = vector.load %arg3[%c0_138, %c40_139, %c1_140] : memref<1x80x18xbf16, #tpu.memory_space<vmem>>, vector<1x24x16xbf16>
    %170 = vector.shape_cast %169 : vector<1x24x16xbf16> to vector<24x16xbf16>
    %c1_141 = arith.constant 1 : index
    %c0_142 = arith.constant 0 : index
    %c0_143 = arith.constant 0 : index
    %171 = vector.load %arg4[%c1_141, %c0_142, %c0_143] : memref<3x8x24xbf16, #tpu.memory_space<vmem>>, vector<1x8x24xbf16>
    %172 = vector.shape_cast %171 : vector<1x8x24xbf16> to vector<8x24xbf16>
    %cst_144 = arith.constant dense<0.000000e+00> : vector<8x16xf32>
    %173 = tpu.matmul %172, %170, %cst_144 {dimension_numbers = #tpu.dot_dimension_numbers<[1], [0], [0], [1], [0, 0, 1, 1], [], []>} : vector<8x24xbf16>, vector<24x16xbf16>, vector<8x16xf32> -> vector<8x16xf32>
    %174 = arith.addf %168, %173 : vector<8x16xf32>
    %c0_145 = arith.constant 0 : index
    %c40_146 = arith.constant 40 : index
    %c2_147 = arith.constant 2 : index
    %175 = vector.load %arg3[%c0_145, %c40_146, %c2_147] : memref<1x80x18xbf16, #tpu.memory_space<vmem>>, vector<1x24x16xbf16>
    %176 = vector.shape_cast %175 : vector<1x24x16xbf16> to vector<24x16xbf16>
    %c2_148 = arith.constant 2 : index
    %c0_149 = arith.constant 0 : index
    %c0_150 = arith.constant 0 : index
    %177 = vector.load %arg4[%c2_148, %c0_149, %c0_150] : memref<3x8x24xbf16, #tpu.memory_space<vmem>>, vector<1x8x24xbf16>
    %178 = vector.shape_cast %177 : vector<1x8x24xbf16> to vector<8x24xbf16>
    %cst_151 = arith.constant dense<0.000000e+00> : vector<8x16xf32>
    %179 = tpu.matmul %178, %176, %cst_151 {dimension_numbers = #tpu.dot_dimension_numbers<[1], [0], [0], [1], [0, 0, 1, 1], [], []>} : vector<8x24xbf16>, vector<24x16xbf16>, vector<8x16xf32> -> vector<8x16xf32>
    %180 = arith.addf %174, %179 : vector<8x16xf32>
    %181 = vector.broadcast %8 : vector<8x1xf32> to vector<8x16xf32>
    %182 = arith.addf %180, %181 : vector<8x16xf32>
    %cst_152 = arith.constant 0.000000e+00 : f32
    %cst_153 = arith.constant 2.000000e+01 : f32
    %183 = vector.broadcast %cst_152 : f32 to vector<8x16xf32>
    %184 = arith.maximumf %183, %182 : vector<8x16xf32>
    %185 = vector.broadcast %cst_153 : f32 to vector<8x16xf32>
    %186 = arith.minimumf %185, %184 : vector<8x16xf32>
    %cst_154 = arith.constant 0.000000e+00 : f32
    %187 = vector.shape_cast %7 : vector<1x16xi1> to vector<1x16xi1>
    %188 = vector.broadcast %187 : vector<1x16xi1> to vector<8x16xi1>
    %189 = vector.broadcast %cst_154 : f32 to vector<8x16xf32>
    %190 = arith.select %188, %186, %189 : vector<8x16xi1>, vector<8x16xf32>
    %191 = arith.truncf %190 : vector<8x16xf32> to vector<8x16xbf16>
    %c0_155 = arith.constant 0 : index
    %c0_156 = arith.constant 0 : index
    %c5 = arith.constant 5 : index
    %c0_157 = arith.constant 0 : index
    %192 = vector.load %arg6[%c0_155, %c0_156, %c5, %c0_157] : memref<1x8x8x16xbf16, #tpu.memory_space<vmem>>, vector<1x8x1x16xbf16>
    %193 = vector.shape_cast %192 : vector<1x8x1x16xbf16> to vector<8x16xbf16>
    %194 = vector.shape_cast %191 : vector<8x16xbf16> to vector<1x8x1x16xbf16>
    tpu.vector_store %arg6[%c0_155, %c0_156, %c5, %c0_157], %194 {strides = array<i32>} : memref<1x8x8x16xbf16, #tpu.memory_space<vmem>>, vector<1x8x1x16xbf16>,
    %c0_158 = arith.constant 0 : index
    %c48 = arith.constant 48 : index
    %c0_159 = arith.constant 0 : index
    %195 = vector.load %arg3[%c0_158, %c48, %c0_159] : memref<1x80x18xbf16, #tpu.memory_space<vmem>>, vector<1x24x16xbf16>
    %196 = vector.shape_cast %195 : vector<1x24x16xbf16> to vector<24x16xbf16>
    %c0_160 = arith.constant 0 : index
    %c0_161 = arith.constant 0 : index
    %c0_162 = arith.constant 0 : index
    %197 = vector.load %arg4[%c0_160, %c0_161, %c0_162] : memref<3x8x24xbf16, #tpu.memory_space<vmem>>, vector<1x8x24xbf16>
    %198 = vector.shape_cast %197 : vector<1x8x24xbf16> to vector<8x24xbf16>
    %cst_163 = arith.constant dense<0.000000e+00> : vector<8x16xf32>
    %199 = tpu.matmul %198, %196, %cst_163 {dimension_numbers = #tpu.dot_dimension_numbers<[1], [0], [0], [1], [0, 0, 1, 1], [], []>} : vector<8x24xbf16>, vector<24x16xbf16>, vector<8x16xf32> -> vector<8x16xf32>
    %c0_164 = arith.constant 0 : index
    %c48_165 = arith.constant 48 : index
    %c1_166 = arith.constant 1 : index
    %200 = vector.load %arg3[%c0_164, %c48_165, %c1_166] : memref<1x80x18xbf16, #tpu.memory_space<vmem>>, vector<1x24x16xbf16>
    %201 = vector.shape_cast %200 : vector<1x24x16xbf16> to vector<24x16xbf16>
    %c1_167 = arith.constant 1 : index
    %c0_168 = arith.constant 0 : index
    %c0_169 = arith.constant 0 : index
    %202 = vector.load %arg4[%c1_167, %c0_168, %c0_169] : memref<3x8x24xbf16, #tpu.memory_space<vmem>>, vector<1x8x24xbf16>
    %203 = vector.shape_cast %202 : vector<1x8x24xbf16> to vector<8x24xbf16>
    %cst_170 = arith.constant dense<0.000000e+00> : vector<8x16xf32>
    %204 = tpu.matmul %203, %201, %cst_170 {dimension_numbers = #tpu.dot_dimension_numbers<[1], [0], [0], [1], [0, 0, 1, 1], [], []>} : vector<8x24xbf16>, vector<24x16xbf16>, vector<8x16xf32> -> vector<8x16xf32>
    %205 = arith.addf %199, %204 : vector<8x16xf32>
    %c0_171 = arith.constant 0 : index
    %c48_172 = arith.constant 48 : index
    %c2_173 = arith.constant 2 : index
    %206 = vector.load %arg3[%c0_171, %c48_172, %c2_173] : memref<1x80x18xbf16, #tpu.memory_space<vmem>>, vector<1x24x16xbf16>
    %207 = vector.shape_cast %206 : vector<1x24x16xbf16> to vector<24x16xbf16>
    %c2_174 = arith.constant 2 : index
    %c0_175 = arith.constant 0 : index
    %c0_176 = arith.constant 0 : index
    %208 = vector.load %arg4[%c2_174, %c0_175, %c0_176] : memref<3x8x24xbf16, #tpu.memory_space<vmem>>, vector<1x8x24xbf16>
    %209 = vector.shape_cast %208 : vector<1x8x24xbf16> to vector<8x24xbf16>
    %cst_177 = arith.constant dense<0.000000e+00> : vector<8x16xf32>
    %210 = tpu.matmul %209, %207, %cst_177 {dimension_numbers = #tpu.dot_dimension_numbers<[1], [0], [0], [1], [0, 0, 1, 1], [], []>} : vector<8x24xbf16>, vector<24x16xbf16>, vector<8x16xf32> -> vector<8x16xf32>
    %211 = arith.addf %205, %210 : vector<8x16xf32>
    %212 = vector.broadcast %8 : vector<8x1xf32> to vector<8x16xf32>
    %213 = arith.addf %211, %212 : vector<8x16xf32>
    %cst_178 = arith.constant 0.000000e+00 : f32
    %cst_179 = arith.constant 2.000000e+01 : f32
    %214 = vector.broadcast %cst_178 : f32 to vector<8x16xf32>
    %215 = arith.maximumf %214, %213 : vector<8x16xf32>
    %216 = vector.broadcast %cst_179 : f32 to vector<8x16xf32>
    %217 = arith.minimumf %216, %215 : vector<8x16xf32>
    %cst_180 = arith.constant 0.000000e+00 : f32
    %218 = vector.shape_cast %7 : vector<1x16xi1> to vector<1x16xi1>
    %219 = vector.broadcast %218 : vector<1x16xi1> to vector<8x16xi1>
    %220 = vector.broadcast %cst_180 : f32 to vector<8x16xf32>
    %221 = arith.select %219, %217, %220 : vector<8x16xi1>, vector<8x16xf32>
    %222 = arith.truncf %221 : vector<8x16xf32> to vector<8x16xbf16>
    %c0_181 = arith.constant 0 : index
    %c0_182 = arith.constant 0 : index
    %c6 = arith.constant 6 : index
    %c0_183 = arith.constant 0 : index
    %223 = vector.load %arg6[%c0_181, %c0_182, %c6, %c0_183] : memref<1x8x8x16xbf16, #tpu.memory_space<vmem>>, vector<1x8x1x16xbf16>
    %224 = vector.shape_cast %223 : vector<1x8x1x16xbf16> to vector<8x16xbf16>
    %225 = vector.shape_cast %222 : vector<8x16xbf16> to vector<1x8x1x16xbf16>
    tpu.vector_store %arg6[%c0_181, %c0_182, %c6, %c0_183], %225 {strides = array<i32>} : memref<1x8x8x16xbf16, #tpu.memory_space<vmem>>, vector<1x8x1x16xbf16>,
    %c0_184 = arith.constant 0 : index
    %c56 = arith.constant 56 : index
    %c0_185 = arith.constant 0 : index
    %226 = vector.load %arg3[%c0_184, %c56, %c0_185] : memref<1x80x18xbf16, #tpu.memory_space<vmem>>, vector<1x24x16xbf16>
    %227 = vector.shape_cast %226 : vector<1x24x16xbf16> to vector<24x16xbf16>
    %c0_186 = arith.constant 0 : index
    %c0_187 = arith.constant 0 : index
    %c0_188 = arith.constant 0 : index
    %228 = vector.load %arg4[%c0_186, %c0_187, %c0_188] : memref<3x8x24xbf16, #tpu.memory_space<vmem>>, vector<1x8x24xbf16>
    %229 = vector.shape_cast %228 : vector<1x8x24xbf16> to vector<8x24xbf16>
    %cst_189 = arith.constant dense<0.000000e+00> : vector<8x16xf32>
    %230 = tpu.matmul %229, %227, %cst_189 {dimension_numbers = #tpu.dot_dimension_numbers<[1], [0], [0], [1], [0, 0, 1, 1], [], []>} : vector<8x24xbf16>, vector<24x16xbf16>, vector<8x16xf32> -> vector<8x16xf32>
    %c0_190 = arith.constant 0 : index
    %c56_191 = arith.constant 56 : index
    %c1_192 = arith.constant 1 : index
    %231 = vector.load %arg3[%c0_190, %c56_191, %c1_192] : memref<1x80x18xbf16, #tpu.memory_space<vmem>>, vector<1x24x16xbf16>
    %232 = vector.shape_cast %231 : vector<1x24x16xbf16> to vector<24x16xbf16>
    %c1_193 = arith.constant 1 : index
    %c0_194 = arith.constant 0 : index
    %c0_195 = arith.constant 0 : index
    %233 = vector.load %arg4[%c1_193, %c0_194, %c0_195] : memref<3x8x24xbf16, #tpu.memory_space<vmem>>, vector<1x8x24xbf16>
    %234 = vector.shape_cast %233 : vector<1x8x24xbf16> to vector<8x24xbf16>
    %cst_196 = arith.constant dense<0.000000e+00> : vector<8x16xf32>
    %235 = tpu.matmul %234, %232, %cst_196 {dimension_numbers = #tpu.dot_dimension_numbers<[1], [0], [0], [1], [0, 0, 1, 1], [], []>} : vector<8x24xbf16>, vector<24x16xbf16>, vector<8x16xf32> -> vector<8x16xf32>
    %236 = arith.addf %230, %235 : vector<8x16xf32>
    %c0_197 = arith.constant 0 : index
    %c56_198 = arith.constant 56 : index
    %c2_199 = arith.constant 2 : index
    %237 = vector.load %arg3[%c0_197, %c56_198, %c2_199] : memref<1x80x18xbf16, #tpu.memory_space<vmem>>, vector<1x24x16xbf16>
    %238 = vector.shape_cast %237 : vector<1x24x16xbf16> to vector<24x16xbf16>
    %c2_200 = arith.constant 2 : index
    %c0_201 = arith.constant 0 : index
    %c0_202 = arith.constant 0 : index
    %239 = vector.load %arg4[%c2_200, %c0_201, %c0_202] : memref<3x8x24xbf16, #tpu.memory_space<vmem>>, vector<1x8x24xbf16>
    %240 = vector.shape_cast %239 : vector<1x8x24xbf16> to vector<8x24xbf16>
    %cst_203 = arith.constant dense<0.000000e+00> : vector<8x16xf32>
    %241 = tpu.matmul %240, %238, %cst_203 {dimension_numbers = #tpu.dot_dimension_numbers<[1], [0], [0], [1], [0, 0, 1, 1], [], []>} : vector<8x24xbf16>, vector<24x16xbf16>, vector<8x16xf32> -> vector<8x16xf32>
    %242 = arith.addf %236, %241 : vector<8x16xf32>
    %243 = vector.broadcast %8 : vector<8x1xf32> to vector<8x16xf32>
    %244 = arith.addf %242, %243 : vector<8x16xf32>
    %cst_204 = arith.constant 0.000000e+00 : f32
    %cst_205 = arith.constant 2.000000e+01 : f32
    %245 = vector.broadcast %cst_204 : f32 to vector<8x16xf32>
    %246 = arith.maximumf %245, %244 : vector<8x16xf32>
    %247 = vector.broadcast %cst_205 : f32 to vector<8x16xf32>
    %248 = arith.minimumf %247, %246 : vector<8x16xf32>
    %cst_206 = arith.constant 0.000000e+00 : f32
    %249 = vector.shape_cast %7 : vector<1x16xi1> to vector<1x16xi1>
    %250 = vector.broadcast %249 : vector<1x16xi1> to vector<8x16xi1>
    %251 = vector.broadcast %cst_206 : f32 to vector<8x16xf32>
    %252 = arith.select %250, %248, %251 : vector<8x16xi1>, vector<8x16xf32>
    %253 = arith.truncf %252 : vector<8x16xf32> to vector<8x16xbf16>
    %c0_207 = arith.constant 0 : index
    %c0_208 = arith.constant 0 : index
    %c7 = arith.constant 7 : index
    %c0_209 = arith.constant 0 : index
    %254 = vector.load %arg6[%c0_207, %c0_208, %c7, %c0_209] : memref<1x8x8x16xbf16, #tpu.memory_space<vmem>>, vector<1x8x1x16xbf16>
    %255 = vector.shape_cast %254 : vector<1x8x1x16xbf16> to vector<8x16xbf16>
    %256 = vector.shape_cast %253 : vector<8x16xbf16> to vector<1x8x1x16xbf16>
    tpu.vector_store %arg6[%c0_207, %c0_208, %c7, %c0_209], %256 {strides = array<i32>} : memref<1x8x8x16xbf16, #tpu.memory_space<vmem>>, vector<1x8x1x16xbf16>,
    return
  }
  func.func @transform_0(%arg0: i32, %arg1: i32, %arg2: memref<2xi32, #tpu.memory_space<smem>>) -> (i32, i32, i32) {
    %c1_i32 = arith.constant 1 : i32
    %0 = arith.muli %arg0, %c1_i32 : i32
    %1 = arith.addi %0, %arg1 : i32
    %c0_i32 = arith.constant 0 : i32
    %c0_i32_0 = arith.constant 0 : i32
    %c0_i32_1 = arith.constant 0 : i32
    return %1, %c0_i32, %c0_i32_0 : i32, i32, i32
  }
  func.func @transform_1(%arg0: i32, %arg1: i32, %arg2: memref<2xi32, #tpu.memory_space<smem>>) -> (i32, i32, i32) {
    %c0_i32 = arith.constant 0 : i32
    %c0_i32_0 = arith.constant 0 : i32
    %c0_i32_1 = arith.constant 0 : i32
    %c0_i32_2 = arith.constant 0 : i32
    return %c0_i32, %c0_i32_0, %c0_i32_1 : i32, i32, i32
  }
  func.func @transform_2(%arg0: i32, %arg1: i32, %arg2: memref<2xi32, #tpu.memory_space<smem>>) -> (i32, i32) {
    %c0_i32 = arith.constant 0 : i32
    %c0_i32_0 = arith.constant 0 : i32
    %c0_i32_1 = arith.constant 0 : i32
    return %c0_i32, %c0_i32_0 : i32, i32
  }
  func.func @transform_3(%arg0: i32, %arg1: i32, %arg2: memref<2xi32, #tpu.memory_space<smem>>) -> (i32, i32, i32, i32) {
    %c0_i32 = arith.constant 0 : i32
    %c0_i32_0 = arith.constant 0 : i32
    %c0_i32_1 = arith.constant 0 : i32
    return %arg0, %c0_i32, %c0_i32_0, %arg1 : i32, i32, i32, i32
  }
}

</mosaic_0001>

<bundles_post_ra>
// kernel: mask_conv_forward.2
= control target key start
LH: loop header
LB: loop body
LE: loop exit
PB: predicated region body
PF: predicated region fallthrough
CT: control target
= control target key end

     0   :  { %s3742_s0 = inlined_call_operand.vmem [shape: s32[2], index: 0, kind: input, shape index: {}]   ;;  %s3743_s1 = inlined_call_operand.vmem [shape: bf16[2,18,18], index: 1, kind: input, shape index: {}]   ;;  %s3744_s2 = inlined_call_operand.vmem [shape: bf16[3,8,3], index: 2, kind: input, shape index: {}]   ;;  %s3745_s3 = inlined_call_operand.vmem [shape: f32[8,1], index: 3, kind: input, shape index: {}]   ;;  %s3746_s4 = inlined_call_operand.vmem [shape: bf16[2,8,8,16], index: 4, kind: output, shape index: {}]  }
   0x1   :  { %s9_s17 = sshll.u32 %s3742_s0, 4  ;;  %s10_s17 = int_to_ptr.vmem [resolvable:$true] %s9_s17 }
   0x2   :  { %s2936_s18 = scalar_lea.vmem %s10_s17, 16  ;;  %p2941_p1 = scmp.lt.s32.totalorder %s10_s17, %s10_s17 }
   0x3   :  { %p2937_p0 = scmp.ne.s32.totalorder %s10_s17, %s2936_s18  ;;  %p2942_p2 = scmp.lt.s32.totalorder %s2936_s18, %s2936_s18 }
   0x5   :  { %p2943_p3 = por %p2942_p2, %p2941_p1 }
   0x7   :  { %p2944_p4 = pnand %p2943_p3, %p2937_p0 }
   0x9   :  { %2947 = shalt.err (!%p2944_p4)  }
   0xa   :  { %s2974_s19 = smov [#allocation3]  }
   0xb   :  { %12 = dma.vmem_to_smem %s10_s17, 16, %s2974_s19, [#allocation2] }
   0xc   :  { %2960 = dma.done.wait [#allocation2], 16 }
   0xd   :  { %2961 = vsyncadd [#allocation2], 4294967280 }
   0xe   :  { %14 = sfence }
   0xf   :  { %s3011_s20 = smov 0   ;;  %s3013_s21 = smov 0  }
  0x10   :  { %s3015_s22 = smov 0  }
  0x11 LB: > { %s32_s0 = sadd.s32 1, %s2968_s21  ;;  %p2614_p5 = scmp.ge.s32.totalorder %s2972_s22, 1  ;;  %s2972_s22 = sphi %s3015_s22, %s20_s22   ;;  %s2968_s21 = sphi %s3013_s21, %s3766_s21   ;;  %s2964_s20 = sphi %s3011_s20, %s3765_s20  }
  0x12   : > { %p34_p6 = scmp.ge.s32.totalorder %s32_s0, 2  ;;  %p162_p7 = scmp.lt.s32.totalorder %s2972_s22, 3 }
  0x14   : > { %s3768_s0 = smov (%p34_p6, %s32_s0), 0  ;;  %p163_p8 = pnand %p2614_p5, %p162_p7 }
  0x15   : > { %p191_p9 = scmp.lt.s32.totalorder (!%p163_p8), %s2964_s20, 1  ;;  %vm228_vm0 = vcmask (!%p163_p8), 1040384   ;;  %v2975_v0 = vmov (!%p163_p8), 0.0   ;;  %vm229_vm1 = vcmask (!%p163_p8), 1041408   ;;  %v2976_v1 = vmov (!%p163_p8), 65535   ;;  %s2978_s30 = smov (!%p163_p8), 127  }
  0x16   : > { %166 = sbr.rel (%p163_p8) target bundleno = 495 (0x1ef), region = 32  ;;  %2749 = vmatprep.subr.bf16.mxu0 (!%p163_p8), %v2975_v0  ;;  %2755 = vmatprep.subr.bf16.mxu1 (!%p163_p8), %v2975_v0  ;;  %v230_v2 = vsel (!%p163_p8), %vm228_vm0, 4294967295, %v2976_v1  ;;  %vm2977_vm2 = vmmov (!%p163_p8), 0   ;;  %vm224_vm3 = vcmask (!%p163_p8), 23552   ;;  %v216_v8 = vld [vmem:[%s3744_s2] sm:$0xf] (!%p163_p8) }
  0x17   : > { %2751 = vmatprep.mubr.msk.bf16.mxu0 (!%p163_p8), %vm2977_vm2, %v2975_v0  ;;  %2757 = vmatprep.mubr.msk.bf16.mxu1 (!%p163_p8), %vm2977_vm2, %v2975_v0  ;;  %v3042_v3 = vsel (!%p163_p8), %vm229_vm1, %v230_v2, 0  ;;  %s2979_s5 = smov (!%p163_p8), 126   ;;  %v214_v22 = vld [vmem:[%s3745_s3] sm:$0xff] (!%p163_p8)  ;;  %v2980_v23 = vmov (!%p163_p8), 0   ;;  %v2622_v34 = vld [vmem:[%s3744_s2 + $0x8] sm:$0xf] (!%p163_p8) }
  0x18   : > { %2927 = vset.pattern.permute.xlu0 (!%p163_p8), %v2980_v23  ;;  %v2618_v28 = vld [vmem:[%s3744_s2 + $0x4] sm:$0xf] (!%p163_p8)  ;;  %v2632_v36 = vld [vmem:[%s3744_s2 + $0x8] sm:$0xf] (!%p163_p8)  ;;  %v517_v41 = vld [vmem:[%s3744_s2] sm:$0xf] (!%p163_p8) }
  0x19   : > { %v2628_v31 = vld [vmem:[%s3744_s2 + $0x4] sm:$0xf] (!%p163_p8)  ;;  %v804_v42 = vld [vmem:[%s3744_s2] sm:$0xf] (!%p163_p8)  ;;  %v2642_v50 = vld [vmem:[%s3744_s2 + $0x8] sm:$0xf] (!%p163_p8) }
  0x1a   : > { %v2638_v47 = vld [vmem:[%s3744_s2 + $0x4] sm:$0xf] (!%p163_p8)  ;;  %v2652_v53 = vld [vmem:[%s3744_s2 + $0x8] sm:$0xf] (!%p163_p8)  ;;  %v1093_v57 = vld [vmem:[%s3744_s2] sm:$0xf] (!%p163_p8) }
  0x1b   : > { %v2648_v49 = vld [vmem:[%s3744_s2 + $0x4] sm:$0xf] (!%p163_p8)  ;;  %v1382_v58 = vld [vmem:[%s3744_s2] sm:$0xf] (!%p163_p8)  ;;  %v2692_v23 = vld [vmem:[%s3744_s2 + $0x8] sm:$0xf] (!%p163_p8) }
  0x1c   : > { %v2658_v63 = vld [vmem:[%s3744_s2 + $0x4] sm:$0xf] (!%p163_p8)  ;;  %s206_s10 = sld [smem:[#allocation3 + %s2964_s20]] (!%p163_p8)  ;;  %vm489_vm5 = vcmask (!%p163_p8), 122880   ;;  %vm490_vm6 = vsmask.f32 (!%p163_p8), 256 }
  0x1d   : > { %s3035_s23 = scalar_select %p191_p9, %s2964_s20, 1  ;;  %v2668_v2 = vld [vmem:[%s3744_s2 + $0x4] sm:$0xf]  ;;  %vm3309_vm7 = vmand %vm489_vm5, %vm490_vm6  ;;  %vm777_vm8 = vsmask.f32 7938  ;;  %vm1064_vm10 = vcmask 123905  }
  0x1e   : > { %vm3364_vm9 = vmand %vm489_vm5, %vm777_vm8  ;;  %vm1065_vm11 = vsmask.f32 1280  ;;  %vm1355_vm13 = vsmask.f32 7942  ;;  %vm1641_vm15 = vcmask 124930   ;;  %vm2216_vm5 = vcmask 125955  }
  0x1f   : > { %s2893_s24 = smul.u32 12, %s3035_s23  ;;  %s2700_s20 = sshll.u32 %s3035_s23, 5  ;;  %vm3421_vm12 = vmand %vm1064_vm10, %vm1065_vm11  ;;  %vm1642_vm0 = vsmask.f32 2304  ;;  %vm1929_vm1 = vsmask.f32 7946 }
  0x20   : > { %s3303_s13 = scalar_lea.vmem %s3746_s4, %s2700_s20  ;;  %vm3475_vm14 = vmand %vm1064_vm10, %vm1355_vm13  ;;  %vm2217_vm6 = vsmask.f32 3328 }
  0x21   : > { %s3047_s27 = scalar_lea.vmem %s3743_s1, %s2893_s24 }
  0x22   : > { %v215_v4 = vld [vmem:[%s3047_s27] sm:$0x3]  ;;  %v2931_v12 = vld [vmem:[%s3047_s27] sm:$0x18]   ;;  %v2935_v20 = vld [vmem:[%s3047_s27 + $0x4] sm:$0x18]  }
  0x23   : > { %v2619_v5 = vcombine.low %v215_v4, %v215_v4  ;;  %v2929_v6 = vld [vmem:[%s3047_s27] ss:$0 sps:$4 sm:$0x66]   ;;  %v279_v7 = vand.u32 %v3042_v3, %v215_v4  ;;  %v3068_v13 = vrot.slane %v2931_v12, 3  ;;  %v3071_v14 = vld [vmem:[%s3047_s27 + $0x4] sm:$0x3] }
  0x24   : > { %v3056_v9 = vrot.slane %v2929_v6, 1  ;;  %v2930_v10 = vld [vmem:[%s3047_s27] ss:$0 sps:$4 sm:$0xcc]   ;;  %v2659_v15 = vcombine.low %v3071_v14, %v3071_v14  ;;  %v3091_v21 = vrot.slane %v2935_v20, 3  ;;  %v1439_v52 = vand.u32 %v3071_v14, %v3042_v3 }
  0x25   : > { %222 = vrot.lane.b32.xlu0 %v2619_v5, %s2978_s30  ;;  %2756 = vmatpush3.bf16.msra.mxu1 %v279_v7  ;;  %v809_v11 = vrot.slane %v2930_v10, 2  ;;  %v2933_v16 = vld [vmem:[%s3047_s27 + $0x4] ss:$0 sps:$4 sm:$0x66]   ;;  %v1153_v51 = vand.u32 %v3068_v13, %v3042_v3  ;;  %v2662_v4 = vld [vmem:[%s3744_s2 + $0x8] sm:$0xf] }
  0x26   : > { %2767 = vmatprep.subr.bf16.mxu1 %v2975_v0  ;;  %523 = vrot.lane.b32.xlu1 %v3056_v9, %s2978_s30  ;;  %v3080_v17 = vrot.slane %v2933_v16, 1  ;;  %v2934_v18 = vld [vmem:[%s3047_s27 + $0x4] ss:$0 sps:$4 sm:$0xcc]   ;;  %v575_v35 = vand.u32 %v3056_v9, %v3042_v3  ;;  %v2672_v6 = vld [vmem:[%s3744_s2 + $0x8] sm:$0xf] }
  0x27   : > { %v3085_v19 = vrot.slane %v2934_v18, 2  ;;  %v862_v37 = vand.u32 %v809_v11, %v3042_v3  ;;  %v1956_v12 = vld [vmem:[%s3744_s2] sm:$0xf]  ;;  %v2682_v20 = vld [vmem:[%s3744_s2 + $0x8] sm:$0xf] }
  0x28   : > { %2758 = vmatmul.mubr.msk.bf16.vlgmr.msra.gmra.mrb[0].mxu1 %vm224_vm3, %v216_v8 }
  0x29   : > { %323 = vrot.lane.b32.xlu0 %v2619_v5, %s2979_s5  ;;  %2769 = vmatprep.mubr.msk.bf16.mxu1 %vm2977_vm2, %v2975_v0  ;;  %v1727_v5 = vand.u32 %v3080_v17, %v3042_v3  ;;  %v2014_v7 = vand.u32 %v3085_v19, %v3042_v3 }
  0x2a   : > { %618 = vrot.lane.b32.xlu1 %v3056_v9, %s2979_s5 }
  0x2d   : > { %810 = vrot.lane.b32.xlu0 %v809_v11, %s2978_s30 }
  0x2e   : > { %905 = vrot.lane.b32.xlu1 %v809_v11, %s2979_s5  ;;  %v1669_v11 = vld [vmem:[%s3744_s2] sm:$0xf] }
  0x31   : > { %1101 = vrot.lane.b32.xlu0 %v3068_v13, %s2978_s30 }
  0x32   : > { %1196 = vrot.lane.b32.xlu1 %v3068_v13, %s2979_s5 }
  0x35   : > { %1387 = vrot.lane.b32.xlu0 %v2659_v15, %s2978_s30 }
  0x36   : > { %1482 = vrot.lane.b32.xlu1 %v2659_v15, %s2979_s5 }
  0x39   : > { %1675 = vrot.lane.b32.xlu0 %v3080_v17, %s2978_s30 }
  0x3a   : > { %1770 = vrot.lane.b32.xlu1 %v3080_v17, %s2979_s5  ;;  %v2678_v17 = vld [vmem:[%s3744_s2 + $0x4] sm:$0xf] }
  0x3d   : > { %1962 = vrot.lane.b32.xlu0 %v3085_v19, %s2978_s30 }
  0x3e   : > { %2057 = vrot.lane.b32.xlu1 %v3085_v19, %s2979_s5  ;;  %v2688_v19 = vld [vmem:[%s3744_s2 + $0x4] sm:$0xf] }
  0x41   : > { %2253 = vrot.lane.b32.xlu0 %v3091_v21, %s2978_s30 }
  0x42   : > { %2348 = vrot.lane.b32.xlu1 %v3091_v21, %s2979_s5 }
  0x45   : > { %374 = vperm.xlu0 %2927, %v214_v22   ;;  %v2305_v22 = vand.u32 %v3091_v21, %v3042_v3 }
  0x97   : > { %v223_v24 = vpop.permute.xlu0 %222 }
  0x98   : > { %v233_v25 = vand.u32 %v3042_v3, %v223_v24  ;;  %v524_v26 = vpop.permute.xlu1 %523  ;;  %v2245_v24 = vld [vmem:[%s3744_s2] sm:$0xf] }
  0x99   : > { %v529_v27 = vand.u32 %v524_v26, %v3042_v3 }
  0x9a   : > { %2750 = vmatpush3.bf16.msra.mxu0 %v233_v25 }
  0x9b   : > { %v324_v29 = vpop.permute.xlu0 %323  ;;  %2761 = vmatprep.subr.bf16.mxu0 %v2975_v0  ;;  %2768 = vmatpush3.bf16.msra.mxu1 %v529_v27 }
  0x9c   : > { %v329_v30 = vand.u32 %v324_v29, %v3042_v3  ;;  %v619_v32 = vpop.permute.xlu1 %618  ;;  %2779 = vmatprep.subr.bf16.mxu1 %v2975_v0 }
  0x9d   : > { %2752 = vmatmul.mubr.msk.bf16.vlgmr.msra.gmra.mrb[0].mxu0 %vm224_vm3, %v2618_v28  ;;  %v624_v33 = vand.u32 %v619_v32, %v3042_v3 }
  0x9e   : > { %2762 = vmatpush3.bf16.msra.mxu0 %v329_v30  ;;  %2763 = vmatprep.mubr.msk.bf16.mxu0 %vm2977_vm2, %v2975_v0 }
  0x9f   : > { %2770 = vmatmul.mubr.msk.bf16.vlgmr.msra.gmra.mrb[4].mxu1 %vm224_vm3, %v2628_v31  ;;  %2773 = vmatprep.subr.bf16.mxu0 %v2975_v0  ;;  %v811_v38 = vpop.permute.xlu0 %810 }
  0xa0   : > { %2780 = vmatpush3.bf16.msra.mxu1 %v624_v33  ;;  %2781 = vmatprep.mubr.msk.bf16.mxu1 %vm2977_vm2, %v2975_v0  ;;  %v816_v40 = vand.u32 %v811_v38, %v3042_v3  ;;  %v906_v44 = vpop.permute.xlu1 %905 }
  0xa1   : > { %2791 = vmatprep.subr.bf16.mxu1 %v2975_v0  ;;  %v911_v46 = vand.u32 %v906_v44, %v3042_v3 }
  0xa3   : > { %v1102_v39 = vpop.permute.xlu0 %1101 }
  0xa4   : > { %v1107_v43 = vand.u32 %v1102_v39, %v3042_v3  ;;  %v1197_v45 = vpop.permute.xlu1 %1196 }
  0xa5   : > { %2764 = vmatmul.mubr.msk.bf16.vlgmr.msra.gmra.mrb[4].mxu0 %vm224_vm3, %v2622_v34  ;;  %v1202_v48 = vand.u32 %v1197_v45, %v3042_v3  ;;  %v212_v45 = vstv %s206_s10 }
  0xa6   : > { %2774 = vmatpush3.bf16.msra.mxu0 %v575_v35  ;;  %2775 = vmatprep.mubr.msk.bf16.mxu0 %vm2977_vm2, %v2975_v0  ;;  %v207_v35 = vlaneseq }
  0xa7   : > { %2782 = vmatmul.mubr.msk.bf16.vlgmr.msra.gmra.mrb[8].mxu1 %vm224_vm3, %v2632_v36  ;;  %2785 = vmatprep.subr.bf16.mxu0 %v2975_v0  ;;  %v1388_v54 = vpop.permute.xlu0 %1387 }
  0xa8   : > { %2792 = vmatpush3.bf16.msra.mxu1 %v862_v37  ;;  %2793 = vmatprep.mubr.msk.bf16.mxu1 %vm2977_vm2, %v2975_v0  ;;  %v1393_v56 = vand.u32 %v1388_v54, %v3042_v3  ;;  %v1483_v60 = vpop.permute.xlu1 %1482  ;;  %v2981_v37 = vmov 1966171168   ;;  %v2219_v54 = vld [vmem:[%s3303_s13] sm:$0x8] }
  0xa9   : > { %2803 = vmatprep.subr.bf16.mxu1 %v2975_v0  ;;  %v1488_v62 = vand.u32 %v1483_v60, %v3042_v3  ;;  %v386_v38 = vunpack.c.l.s4 %v2981_v37 }
  0xab   : > { %v1676_v55 = vpop.permute.xlu0 %1675 }
  0xac   : > { %v1681_v59 = vand.u32 %v1676_v55, %v3042_v3  ;;  %v1771_v61 = vpop.permute.xlu1 %1770  ;;  %v2982_v55 = vmov 286326784  }
  0xad   : > { %2776 = vmatmul.mubr.msk.bf16.vlgmr.msra.gmra.mrb[8].mxu0 %vm224_vm3, %v517_v41  ;;  %v1776_v1 = vand.u32 %v1771_v61, %v3042_v3 }
  0xae   : > { %2786 = vmatpush3.bf16.msra.mxu0 %v816_v40  ;;  %2787 = vmatprep.mubr.msk.bf16.mxu0 %vm2977_vm2, %v2975_v0 }
  0xaf   : > { %2794 = vmatmul.mubr.msk.bf16.vlgmr.msra.gmra.mrb[12].mxu1 %vm224_vm3, %v804_v42  ;;  %2797 = vmatprep.subr.bf16.mxu0 %v2975_v0  ;;  %v1963_v8 = vpop.permute.xlu0 %1962 }
  0xb0   : > { %2804 = vmatpush3.bf16.msra.mxu1 %v1107_v43  ;;  %2805 = vmatprep.mubr.msk.bf16.mxu1 %vm2977_vm2, %v2975_v0  ;;  %v1968_v10 = vand.u32 %v1963_v8, %v3042_v3  ;;  %v2058_v14 = vpop.permute.xlu1 %2057  ;;  %v208_v43 = vand.u32 127, %v207_v35 }
  0xb1   : > { %2815 = vmatprep.subr.bf16.mxu1 %v2975_v0  ;;  %v2063_v16 = vand.u32 %v2058_v14, %v3042_v3 }
  0xb2   : > { %vm3288_vm4 = vcmp.lt.s32.totalorder %v208_v43, %v212_v45  ;;  %v501_v43 = vld [vmem:[%s3303_s13 + $0xc] sm:$0x1] }
  0xb3   : > { %v2254_v9 = vpop.permute.xlu0 %2253 }
  0xb4   : > { %v2259_v13 = vand.u32 %v2254_v9, %v3042_v3  ;;  %v2349_v15 = vpop.permute.xlu1 %2348 }
  0xb5   : > { %2788 = vmatmul.mubr.msk.bf16.vlgmr.msra.gmra.mrb[12].mxu0 %vm224_vm3, %v2638_v47  ;;  %v2354_v18 = vand.u32 %v2349_v15, %v3042_v3 }
  0xb6   : > { %2798 = vmatpush3.bf16.msra.mxu0 %v911_v46  ;;  %2799 = vmatprep.mubr.msk.bf16.mxu0 %vm2977_vm2, %v2975_v0 }
  0xb7   : > { %2806 = vmatmul.mubr.msk.bf16.vlgmr.msra.gmra.mrb[16].mxu1 %vm224_vm3, %v2648_v49  ;;  %2809 = vmatprep.subr.bf16.mxu0 %v2975_v0  ;;  %v387_v49 = vunpack.c.0.s8 %v386_v38 }
  0xb8   : > { %2816 = vmatpush3.bf16.msra.mxu1 %v1202_v48  ;;  %2817 = vmatprep.mubr.msk.bf16.mxu1 %vm2977_vm2, %v2975_v0 }
  0xb9   : > { %2827 = vmatprep.subr.bf16.mxu1 %v2975_v0 }
  0xbd   : > { %2800 = vmatmul.mubr.msk.bf16.vlgmr.msra.gmra.mrb[16].mxu0 %vm224_vm3, %v2642_v50  ;;  %v389_v50 = vshrl.u32 %v207_v35, 7 }
  0xbe   : > { %2810 = vmatpush3.bf16.msra.mxu0 %v1153_v51  ;;  %2811 = vmatprep.mubr.msk.bf16.mxu0 %vm2977_vm2, %v2975_v0 }
  0xbf   : > { %2818 = vmatmul.mubr.msk.bf16.vlgmr.msra.gmra.mrb[20].mxu1 %vm224_vm3, %v2652_v53  ;;  %2821 = vmatprep.subr.bf16.mxu0 %v2975_v0 }
  0xc0   : > { %2828 = vmatpush3.bf16.msra.mxu1 %v1439_v52  ;;  %2829 = vmatprep.mubr.msk.bf16.mxu1 %vm2977_vm2, %v2975_v0 }
  0xc1   : > { %2839 = vmatprep.subr.bf16.mxu1 %v2975_v0 }
  0xc4   : > { %v3285_v39 = vpop.permute.xlu0 %374 }
  0xc5   : > { %2812 = vmatmul.mubr.msk.bf16.vlgmr.msra.gmra.mrb[20].mxu0 %vm224_vm3, %v1093_v57 }
  0xc6   : > { %2822 = vmatpush3.bf16.msra.mxu0 %v1393_v56  ;;  %2823 = vmatprep.mubr.msk.bf16.mxu0 %vm2977_vm2, %v2975_v0  ;;  %v426_v56 = vunpack.c.l.s4 %v2982_v55 }
  0xc7   : > { %2830 = vmatmul.mubr.msk.bf16.vlgmr.msra.gmra.mrb[24].mxu1 %vm224_vm3, %v1382_v58  ;;  %2833 = vmatprep.subr.bf16.mxu0 %v2975_v0  ;;  %v3292_v58 = vsub.s32 %v387_v49, %v389_v50 }
  0xc8   : > { %2840 = vmatpush3.bf16.msra.mxu1 %v1681_v59  ;;  %2841 = vmatprep.mubr.msk.bf16.mxu1 %vm2977_vm2, %v2975_v0 }
  0xc9   : > { %2851 = vmatprep.subr.bf16.mxu1 %v2975_v0 }
  0xcd   : > { %2824 = vmatmul.mubr.msk.bf16.vlgmr.msra.gmra.mrb[24].mxu0 %vm224_vm3, %v2658_v63 }
  0xce   : > { %2834 = vmatpush3.bf16.msra.mxu0 %v1488_v62  ;;  %2835 = vmatprep.mubr.msk.bf16.mxu0 %vm2977_vm2, %v2975_v0 }
  0xcf   : > { %2842 = vmatmul.mubr.msk.bf16.vlgmr.msra.gmra.mrb[28].mxu1 %vm224_vm3, %v2668_v2  ;;  %2845 = vmatprep.subr.bf16.mxu0 %v2975_v0 }
  0xd0   : > { %2852 = vmatpush3.bf16.msra.mxu1 %v1776_v1  ;;  %2853 = vmatprep.mubr.msk.bf16.mxu1 %vm2977_vm2, %v2975_v0 }
  0xd1   : > { %2863 = vmatprep.subr.bf16.mxu1 %v2975_v0 }
  0xd5   : > { %2836 = vmatmul.mubr.msk.bf16.vlgmr.msra.gmra.mrb[28].mxu0 %vm224_vm3, %v2662_v4  ;;  %v427_v4 = vunpack.c.0.s8 %v426_v56 }
  0xd6   : > { %2846 = vmatpush3.bf16.msra.mxu0 %v1727_v5  ;;  %2847 = vmatprep.mubr.msk.bf16.mxu0 %vm2977_vm2, %v2975_v0 }
  0xd7   : > { %2854 = vmatmul.mubr.msk.bf16.vlgmr.msra.gmra.mrb[32].mxu1 %vm224_vm3, %v2672_v6  ;;  %2857 = vmatprep.subr.bf16.mxu0 %v2975_v0  ;;  %v3305_v14 = vsub.s32 %v427_v4, %v389_v50  ;;  %v507_v50 = vld [vmem:[%s3303_s13 + $0x14] sm:$0x1] }
  0xd8   : > { %2864 = vmatpush3.bf16.msra.mxu1 %v2014_v7  ;;  %2865 = vmatprep.mubr.msk.bf16.mxu1 %vm2977_vm2, %v2975_v0 }
  0xd9   : > { %2875 = vmatprep.subr.bf16.mxu1 %v2975_v0 }
  0xdd   : > { %2848 = vmatmul.mubr.msk.bf16.vlgmr.msra.gmra.mrb[32].mxu0 %vm224_vm3, %v1669_v11 }
  0xde   : > { %2858 = vmatpush3.bf16.msra.mxu0 %v1968_v10  ;;  %2859 = vmatprep.mubr.msk.bf16.mxu0 %vm2977_vm2, %v2975_v0 }
  0xdf   : > { %2866 = vmatmul.mubr.msk.bf16.vlgmr.msra.gmra.mrb[36].mxu1 %vm224_vm3, %v1956_v12  ;;  %2869 = vmatprep.subr.bf16.mxu0 %v2975_v0 }
  0xe0   : > { %2876 = vmatpush3.bf16.msra.mxu1 %v2259_v13  ;;  %2877 = vmatprep.mubr.msk.bf16.mxu1 %vm2977_vm2, %v2975_v0 }
  0xe1   : > { %2887 = vmatprep.subr.bf16.mxu1 %v2975_v0 }
  0xe5   : > { %2860 = vmatmul.mubr.msk.bf16.vlgmr.msra.gmra.mrb[36].mxu0 %vm224_vm3, %v2678_v17 }
  0xe6   : > { %2870 = vmatpush3.bf16.msra.mxu0 %v2063_v16  ;;  %2871 = vmatprep.mubr.msk.bf16.mxu0 %vm2977_vm2, %v2975_v0 }
  0xe7   : > { %2878 = vmatmul.mubr.msk.bf16.vlgmr.msra.gmra.mrb[40].mxu1 %vm224_vm3, %v2688_v19  ;;  %2881 = vmatprep.subr.bf16.mxu0 %v2975_v0 }
  0xe8   : > { %2888 = vmatpush3.bf16.msra.mxu1 %v2354_v18  ;;  %2889 = vmatprep.mubr.msk.bf16.mxu1 %vm2977_vm2, %v2975_v0 }
  0xed   : > { %2872 = vmatmul.mubr.msk.bf16.vlgmr.msra.gmra.mrb[40].mxu0 %vm224_vm3, %v2682_v20 }
  0xee   : > { %2882 = vmatpush3.bf16.msra.mxu0 %v2305_v22  ;;  %2883 = vmatprep.mubr.msk.bf16.mxu0 %vm2977_vm2, %v2975_v0  ;;  %vm3537_vm2 = vmand %vm1641_vm15, %vm1642_vm0 }
  0xef   : > { %2890 = vmatmul.mubr.msk.bf16.vlgmr.msra.gmra.mrb[44].mxu1 %vm224_vm3, %v2692_v23 }
  0xf5   : > { %2884 = vmatmul.mubr.msk.bf16.vlgmr.msra.gmra.mrb[44].mxu0 %vm224_vm3, %v2245_v24  ;;  %vm3587_vm3 = vmand %vm1641_vm15, %vm1929_vm1 }
  0xfb   : > { %v315_v3 = vpop.f32.mrb[0].mxu1 }
  0xfc   : > { %v2759_v21 = vpop.f32.mrb[1].mxu1 }
  0xfd   : > { %v318_v25 = vpop.f32.mrb[2].mxu1 }
  0xfe   : > { %v2760_v26 = vpop.f32.mrb[3].mxu1 }
 0x170   : > { %v269_v27 = vpop.f32.mrb[0].mxu0 }
 0x171   : > { %v316_v28 = vadd.f32 %v315_v3, %v269_v27  ;;  %v2753_v29 = vpop.f32.mrb[1].mxu0 }
 0x172   : > { %v272_v30 = vpop.f32.mrb[2].mxu0  ;;  %v565_v31 = vpop.f32.mrb[4].mxu1  ;;  %v495_v29 = vld [vmem:[%s3303_s13 + $0x4] sm:$0x1] }
 0x173   : > { %v2754_v32 = vpop.f32.mrb[3].mxu0  ;;  %v2771_v33 = vpop.f32.mrb[5].mxu1 }
 0x174   : > { %v568_v0 = vpop.f32.mrb[6].mxu1 }
 0x175   : > { %v2772_v34 = vpop.f32.mrb[7].mxu1 }
 0x176   : > { %v498_v34 = vld [vmem:[%s3303_s13 + $0x8] sm:$0x1] }
 0x178   : > { %v365_v36 = vpop.f32.mrb[4].mxu0 }
 0x179   : > { %v371_v40 = vadd.f32 %v365_v36, %v316_v28  ;;  %v2765_v41 = vpop.f32.mrb[5].mxu0  ;;  %v492_v28 = vld [vmem:[%s3303_s13] sm:$0x1] }
 0x17a   : > { %v368_v42 = vpop.f32.mrb[6].mxu0  ;;  %v660_v44 = vpop.f32.mrb[8].mxu1 }
 0x17b   : > { %v377_v46 = vadd.f32 %v3285_v39, %v371_v40  ;;  %v2766_v47 = vpop.f32.mrb[7].mxu0  ;;  %v2783_v48 = vpop.f32.mrb[9].mxu1 }
 0x17c   : > { %v663_v51 = vpop.f32.mrb[10].mxu1 }
 0x17d   : > { %v378_v52 = vmax.f32 %v377_v46, 0.0  ;;  %v2784_v53 = vpop.f32.mrb[11].mxu1  ;;  %v510_v51 = vld [vmem:[%s3303_s13 + $0x18] sm:$0x1] }
 0x17f   : > { %v379_v57 = vmin.f32 %v378_v52, 20.0 }
 0x180   : > { %v611_v59 = vpop.f32.mrb[8].mxu0 }
 0x181   : > { %v382_v60 = vsel %vm3288_vm4, %v379_v57, 0.0  ;;  %v612_v61 = vadd.f32 %v611_v59, %v565_v31  ;;  %v2777_v62 = vpop.f32.mrb[9].mxu0 }
 0x182   : > { %v383_v63 = vpack.c.bf16 %v382_v60, %v382_v60  ;;  %v614_v1 = vpop.f32.mrb[10].mxu0  ;;  %v898_v2 = vpop.f32.mrb[12].mxu1  ;;  %v513_v62 = vld [vmem:[%s3303_s13 + $0x1c] sm:$0x1] }
 0x183   : > { %v666_v5 = vadd.f32 %v660_v44, %v612_v61  ;;  %v2778_v6 = vpop.f32.mrb[11].mxu0  ;;  %v2795_v7 = vpop.f32.mrb[13].mxu1  ;;  %v504_v44 = vld [vmem:[%s3303_s13 + $0x10] sm:$0x1] }
 0x184   : > { %v391_v8 = vrot.slane %v383_v63, %v3292_v58  ;;  %v901_v9 = vpop.f32.mrb[14].mxu1 }
 0x185   : > { %v667_v10 = vadd.f32 %v666_v5, %v3285_v39  ;;  %v2796_v11 = vpop.f32.mrb[15].mxu1 }
 0x186   : > { %v392_v12 = vcombine.high %v391_v8, %v391_v8  ;;  %v399_v13 = vrot.slane %v391_v8, %v3292_v58 }
 0x187   : > { %v668_v15 = vmax.f32 %v667_v10, 0.0 }
 0x188   : > { %v406_v16 = vrot.slane %v392_v12, %v3292_v58  ;;  %v407_v17 = vcombine.high %v399_v13, %v399_v13  ;;  %v410_v18 = vunpack.i.h.s16 %v399_v13  ;;  %v2624_v19 = vpack.i.b16 %v399_v13, %v399_v13  ;;  %v852_v20 = vpop.f32.mrb[12].mxu0 }
 0x189   : > { %v669_v22 = vmin.f32 %v668_v15, 20.0  ;;  %v899_v23 = vadd.f32 %v898_v2, %v852_v20  ;;  %v2789_v24 = vpop.f32.mrb[13].mxu0 }
 0x18a   : > { %v408_v3 = vcombine.high %v406_v16, %v406_v16  ;;  %v412_v21 = vunpack.i.h.s16 %v406_v16  ;;  %v414_v25 = vunpack.i.h.s16 %v407_v17  ;;  %v418_v26 = vpack.i.b16 %v410_v18, %v410_v18  ;;  %v855_v30 = vpop.f32.mrb[14].mxu0  ;;  %v3315_v31 = vpop.f32.mrb[16].mxu1 }
 0x18b   : > { %v2625_v32 = vpack.i.b16 %v406_v16, %v406_v16  ;;  %v2626_v33 = vpack.i.b16 %v407_v17, %v407_v17  ;;  %v431_v0 = vrot.slane %v2624_v19, %v3305_v14  ;;  %v670_v35 = vsel %vm3288_vm4, %v669_v22, 0.0  ;;  %v2790_v36 = vpop.f32.mrb[15].mxu0  ;;  %v2807_v37 = vpop.f32.mrb[17].mxu1 }
 0x18c   : > { %v416_v38 = vunpack.i.h.s16 %v408_v3  ;;  %v420_v40 = vpack.i.b16 %v412_v21, %v412_v21  ;;  %v422_v41 = vpack.i.b16 %v414_v25, %v414_v25  ;;  %v2627_v42 = vpack.i.b16 %v408_v3, %v408_v3  ;;  %v1146_v45 = vpop.f32.mrb[18].mxu1 }
 0x18d   : > { %v438_v46 = vrot.slane %v418_v26, %v3305_v14  ;;  %v445_v47 = vrot.slane %v2625_v32, %v3305_v14  ;;  %v459_v48 = vrot.slane %v2626_v33, %v3305_v14  ;;  %v493_v49 = vsel %vm3309_vm7, %v431_v0, %v492_v28  ;;  %v2808_v52 = vpop.f32.mrb[19].mxu1 }
 0x18e   : > { %v424_v53 = vpack.i.b16 %v416_v38, %v416_v38  ;;  %v452_v55 = vrot.slane %v420_v40, %v3305_v14  ;;  %v466_v56 = vrot.slane %v422_v41, %v3305_v14  ;;  %v473_v57 = vrot.slane %v2627_v42, %v3305_v14  ;;  %494 = vst [vmem:[%s3303_s13] sm:$0x1] %v493_v49 }
 0x18f   : > { %v496_v59 = vsel %vm3309_vm7, %v438_v46, %v495_v29  ;;  %v499_v60 = vsel %vm3309_vm7, %v445_v47, %v498_v34  ;;  %v505_v61 = vsel %vm3309_vm7, %v459_v48, %v504_v44  ;;  %v671_v63 = vpack.c.bf16 %v670_v35, %v670_v35 }
 0x190   : > { %v480_v1 = vrot.slane %v424_v53, %v3305_v14  ;;  %497 = vst [vmem:[%s3303_s13 + $0x4] sm:$0x1] %v496_v59  ;;  %500 = vst [vmem:[%s3303_s13 + $0x8] sm:$0x1] %v499_v60  ;;  %v502_v2 = vsel %vm3309_vm7, %v452_v55, %v501_v43  ;;  %v508_v4 = vsel %vm3309_vm7, %v466_v56, %v507_v50  ;;  %v947_v6 = vpop.f32.mrb[16].mxu0 }
 0x191   : > { %506 = vst [vmem:[%s3303_s13 + $0x10] sm:$0x1] %v505_v61  ;;  %v511_v5 = vsel %vm3309_vm7, %v473_v57, %v510_v51  ;;  %503 = vst [vmem:[%s3303_s13 + $0xc] sm:$0x1] %v502_v2  ;;  %v679_v7 = vrot.slane %v671_v63, %v3292_v58  ;;  %v953_v8 = vadd.f32 %v947_v6, %v899_v23  ;;  %v2801_v9 = vpop.f32.mrb[17].mxu0 }
 0x192   : > { %509 = vst [vmem:[%s3303_s13 + $0x14] sm:$0x1] %v508_v4  ;;  %512 = vst [vmem:[%s3303_s13 + $0x18] sm:$0x1] %v511_v5  ;;  %v514_v10 = vsel %vm3309_vm7, %v480_v1, %v513_v62  ;;  %v950_v11 = vpop.f32.mrb[18].mxu0  ;;  %v3357_v12 = vpop.f32.mrb[20].mxu1 }
 0x193   : > { %515 = vst [vmem:[%s3303_s13 + $0x1c] sm:$0x1] %v514_v10  ;;  %v680_v13 = vcombine.high %v679_v7, %v679_v7  ;;  %v687_v15 = vrot.slane %v679_v7, %v3292_v58  ;;  %v2802_v16 = vpop.f32.mrb[19].mxu0  ;;  %v2819_v17 = vpop.f32.mrb[21].mxu1  ;;  %v954_v18 = vadd.f32 %v953_v8, %v3285_v39  ;;  %vm3641_vm7 = vmand %vm2216_vm5, %vm2217_vm6 }
 0x194   : > { %v1241_v19 = vpop.f32.mrb[22].mxu1 }
 0x195   : > { %v694_v20 = vrot.slane %v680_v13, %v3292_v58  ;;  %v695_v22 = vcombine.high %v687_v15, %v687_v15  ;;  %v698_v23 = vunpack.i.h.s16 %v687_v15  ;;  %v2634_v24 = vpack.i.b16 %v687_v15, %v687_v15  ;;  %v2820_v3 = vpop.f32.mrb[23].mxu1  ;;  %v779_v29 = vld [vmem:[%s3303_s13] sm:$0x1] }
 0x196   : > { %v955_v35 = vmax.f32 %v954_v18, 0.0 }
 0x197   : > { %v696_v21 = vcombine.high %v694_v20, %v694_v20  ;;  %v700_v25 = vunpack.i.h.s16 %v694_v20  ;;  %v702_v26 = vunpack.i.h.s16 %v695_v22  ;;  %v706_v27 = vpack.i.b16 %v698_v23, %v698_v23  ;;  %v782_v0 = vld [vmem:[%s3303_s13 + $0x4] sm:$0x1]  ;;  %v785_v34 = vld [vmem:[%s3303_s13 + $0x8] sm:$0x1] }
 0x198   : > { %v2635_v30 = vpack.i.b16 %v694_v20, %v694_v20  ;;  %v2636_v32 = vpack.i.b16 %v695_v22, %v695_v22  ;;  %v719_v33 = vrot.slane %v2634_v24, %v3305_v14  ;;  %v788_v41 = vld [vmem:[%s3303_s13 + $0xc] sm:$0x1]  ;;  %v791_v42 = vld [vmem:[%s3303_s13 + $0x10] sm:$0x1]  ;;  %v1189_v43 = vpop.f32.mrb[20].mxu0  ;;  %v956_v1 = vmin.f32 %v955_v35, 20.0 }
 0x199   : > { %v704_v36 = vunpack.i.h.s16 %v696_v21  ;;  %v708_v37 = vpack.i.b16 %v700_v25, %v700_v25  ;;  %v710_v38 = vpack.i.b16 %v702_v26, %v702_v26  ;;  %v2637_v40 = vpack.i.b16 %v696_v21, %v696_v21  ;;  %v794_v48 = vld [vmem:[%s3303_s13 + $0x14] sm:$0x1]  ;;  %v797_v49 = vld [vmem:[%s3303_s13 + $0x18] sm:$0x1]  ;;  %v2813_v50 = vpop.f32.mrb[21].mxu0 }
 0x19a   : > { %v726_v44 = vrot.slane %v706_v27, %v3305_v14  ;;  %v733_v45 = vrot.slane %v2635_v30, %v3305_v14  ;;  %v747_v46 = vrot.slane %v2636_v32, %v3305_v14  ;;  %v780_v47 = vsel %vm3364_vm9, %v719_v33, %v779_v29  ;;  %v1475_v51 = vpop.f32.mrb[24].mxu1  ;;  %v1192_v57 = vpop.f32.mrb[22].mxu0  ;;  %v800_v63 = vld [vmem:[%s3303_s13 + $0x1c] sm:$0x1] }
 0x19b   : > { %v712_v52 = vpack.i.b16 %v704_v36, %v704_v36  ;;  %v740_v53 = vrot.slane %v708_v37, %v3305_v14  ;;  %v754_v55 = vrot.slane %v710_v38, %v3305_v14  ;;  %v761_v56 = vrot.slane %v2637_v40, %v3305_v14  ;;  %781 = vst [vmem:[%s3303_s13] sm:$0x1] %v780_v47  ;;  %v2831_v59 = vpop.f32.mrb[25].mxu1  ;;  %v2814_v2 = vpop.f32.mrb[23].mxu0  ;;  %v1067_v38 = vld [vmem:[%s3303_s13] sm:$0x2] }
 0x19c   : > { %v783_v60 = vsel %vm3364_vm9, %v726_v44, %v782_v0  ;;  %v786_v61 = vsel %vm3364_vm9, %v733_v45, %v785_v34  ;;  %v792_v62 = vsel %vm3364_vm9, %v747_v46, %v791_v42  ;;  %v1478_v4 = vpop.f32.mrb[26].mxu1  ;;  %v957_v10 = vsel %vm3288_vm4, %v956_v1, 0.0  ;;  %v1073_v44 = vld [vmem:[%s3303_s13 + $0x8] sm:$0x2] }
 0x19d   : > { %v768_v5 = vrot.slane %v712_v52, %v3305_v14  ;;  %784 = vst [vmem:[%s3303_s13 + $0x4] sm:$0x1] %v783_v60  ;;  %787 = vst [vmem:[%s3303_s13 + $0x8] sm:$0x1] %v786_v61  ;;  %v789_v6 = vsel %vm3364_vm9, %v740_v53, %v788_v41  ;;  %v795_v7 = vsel %vm3364_vm9, %v754_v55, %v794_v48  ;;  %v2832_v9 = vpop.f32.mrb[27].mxu1 }
 0x19e   : > { %793 = vst [vmem:[%s3303_s13 + $0x10] sm:$0x1] %v792_v62  ;;  %v798_v8 = vsel %vm3364_vm9, %v761_v56, %v797_v49  ;;  %790 = vst [vmem:[%s3303_s13 + $0xc] sm:$0x1] %v789_v6  ;;  %v1190_v11 = vadd.f32 %v1189_v43, %v3315_v31  ;;  %v958_v15 = vpack.c.bf16 %v957_v10, %v957_v10  ;;  %v1070_v43 = vld [vmem:[%s3303_s13 + $0x4] sm:$0x2] }
 0x19f   : > { %796 = vst [vmem:[%s3303_s13 + $0x14] sm:$0x1] %v795_v7  ;;  %799 = vst [vmem:[%s3303_s13 + $0x18] sm:$0x1] %v798_v8  ;;  %v801_v13 = vsel %vm3364_vm9, %v768_v5, %v800_v63  ;;  %v1079_v52 = vld [vmem:[%s3303_s13 + $0x10] sm:$0x2] }
 0x1a0   : > { %802 = vst [vmem:[%s3303_s13 + $0x1c] sm:$0x1] %v801_v13  ;;  %v1244_v16 = vadd.f32 %v3357_v12, %v1190_v11  ;;  %v1429_v17 = vpop.f32.mrb[24].mxu0  ;;  %v966_v18 = vrot.slane %v958_v15, %v3292_v58  ;;  %v1082_v60 = vld [vmem:[%s3303_s13 + $0x14] sm:$0x2] }
 0x1a1   : > { %v3413_v19 = vadd.f32 %v1475_v51, %v1429_v17  ;;  %v2825_v20 = vpop.f32.mrb[25].mxu0  ;;  %v1076_v51 = vld [vmem:[%s3303_s13 + $0xc] sm:$0x2]  ;;  %v1085_v61 = vld [vmem:[%s3303_s13 + $0x18] sm:$0x2] }
 0x1a2   : > { %v1245_v22 = vadd.f32 %v1244_v16, %v3285_v39  ;;  %v1432_v23 = vpop.f32.mrb[26].mxu0  ;;  %v3416_v24 = vpop.f32.mrb[28].mxu1  ;;  %v967_v3 = vcombine.high %v966_v18, %v966_v18  ;;  %v974_v31 = vrot.slane %v966_v18, %v3292_v58  ;;  %v1088_v11 = vld [vmem:[%s3303_s13 + $0x1c] sm:$0x2] }
 0x1a3   : > { %v2826_v21 = vpop.f32.mrb[27].mxu0  ;;  %v2843_v25 = vpop.f32.mrb[29].mxu1 }
 0x1a4   : > { %v1246_v12 = vmax.f32 %v1245_v22, 0.0  ;;  %v1720_v26 = vpop.f32.mrb[30].mxu1  ;;  %v981_v27 = vrot.slane %v967_v3, %v3292_v58  ;;  %v982_v28 = vcombine.high %v974_v31, %v974_v31  ;;  %v985_v29 = vunpack.i.h.s16 %v974_v31 }
 0x1a5   : > { %v2644_v30 = vpack.i.b16 %v974_v31, %v974_v31  ;;  %v2844_v32 = vpop.f32.mrb[31].mxu1 }
 0x1a6   : > { %v1247_v33 = vmin.f32 %v1246_v12, 20.0  ;;  %v983_v0 = vcombine.high %v981_v27, %v981_v27  ;;  %v987_v34 = vunpack.i.h.s16 %v981_v27  ;;  %v989_v35 = vunpack.i.h.s16 %v982_v28 }
 0x1a7   : > { %v993_v36 = vpack.i.b16 %v985_v29, %v985_v29  ;;  %v2645_v40 = vpack.i.b16 %v981_v27, %v981_v27  ;;  %v2646_v41 = vpack.i.b16 %v982_v28, %v982_v28  ;;  %v1006_v42 = vrot.slane %v2644_v30, %v3305_v14 }
 0x1a8   : > { %v1248_v45 = vsel %vm3288_vm4, %v1247_v33, 0.0  ;;  %v1524_v46 = vpop.f32.mrb[28].mxu0  ;;  %v991_v47 = vunpack.i.h.s16 %v983_v0  ;;  %v995_v48 = vpack.i.b16 %v987_v34, %v987_v34  ;;  %v997_v49 = vpack.i.b16 %v989_v35, %v989_v35 }
 0x1a9   : > { %v2647_v50 = vpack.i.b16 %v983_v0, %v983_v0  ;;  %v2837_v53 = vpop.f32.mrb[29].mxu0  ;;  %v1013_v55 = vrot.slane %v993_v36, %v3305_v14  ;;  %v1020_v56 = vrot.slane %v2645_v40, %v3305_v14  ;;  %v1034_v57 = vrot.slane %v2646_v41, %v3305_v14 }
 0x1aa   : > { %v1068_v59 = vsel %vm3421_vm12, %v1006_v42, %v1067_v38  ;;  %v1527_v62 = vpop.f32.mrb[30].mxu0  ;;  %v1812_v63 = vpop.f32.mrb[32].mxu1  ;;  %v999_v1 = vpack.i.b16 %v991_v47, %v991_v47  ;;  %v1027_v2 = vrot.slane %v995_v48, %v3305_v14  ;;  %v1041_v4 = vrot.slane %v997_v49, %v3305_v14 }
 0x1ab   : > { %v1048_v5 = vrot.slane %v2647_v50, %v3305_v14  ;;  %1069 = vst [vmem:[%s3303_s13] sm:$0x2] %v1068_v59  ;;  %v2838_v6 = vpop.f32.mrb[31].mxu0  ;;  %v2855_v7 = vpop.f32.mrb[33].mxu1  ;;  %v1071_v8 = vsel %vm3421_vm12, %v1013_v55, %v1070_v43  ;;  %v1074_v9 = vsel %vm3421_vm12, %v1020_v56, %v1073_v44  ;;  %v1080_v10 = vsel %vm3421_vm12, %v1034_v57, %v1079_v52 }
 0x1ac   : > { %v1249_v13 = vpack.c.bf16 %v1248_v45, %v1248_v45  ;;  %v1815_v15 = vpop.f32.mrb[34].mxu1  ;;  %v1055_v16 = vrot.slane %v999_v1, %v3305_v14  ;;  %1072 = vst [vmem:[%s3303_s13 + $0x4] sm:$0x2] %v1071_v8  ;;  %1075 = vst [vmem:[%s3303_s13 + $0x8] sm:$0x2] %v1074_v9  ;;  %v1077_v17 = vsel %vm3421_vm12, %v1027_v2, %v1076_v51 }
 0x1ad   : > { %1081 = vst [vmem:[%s3303_s13 + $0x10] sm:$0x2] %v1080_v10  ;;  %v1083_v18 = vsel %vm3421_vm12, %v1041_v4, %v1082_v60  ;;  %v1086_v20 = vsel %vm3421_vm12, %v1048_v5, %v1085_v61  ;;  %v2856_v22 = vpop.f32.mrb[35].mxu1  ;;  %1078 = vst [vmem:[%s3303_s13 + $0xc] sm:$0x2] %v1077_v17  ;;  %v1530_v3 = vadd.f32 %v1524_v46, %v3413_v19 }
 0x1ae   : > { %1084 = vst [vmem:[%s3303_s13 + $0x14] sm:$0x2] %v1083_v18  ;;  %1087 = vst [vmem:[%s3303_s13 + $0x18] sm:$0x2] %v1086_v20  ;;  %v1257_v23 = vrot.slane %v1249_v13, %v3292_v58  ;;  %v1089_v31 = vsel %vm3421_vm12, %v1055_v16, %v1088_v11 }
 0x1af   : > { %1090 = vst [vmem:[%s3303_s13 + $0x1c] sm:$0x2] %v1089_v31  ;;  %v1531_v12 = vadd.f32 %v1530_v3, %v3285_v39 }
 0x1b0   : > { %v1258_v21 = vcombine.high %v1257_v23, %v1257_v23  ;;  %v1265_v25 = vrot.slane %v1257_v23, %v3292_v58  ;;  %v1763_v26 = vpop.f32.mrb[32].mxu0 }
 0x1b1   : > { %v1764_v27 = vadd.f32 %v1763_v26, %v3416_v24  ;;  %v2849_v28 = vpop.f32.mrb[33].mxu0  ;;  %v1532_v34 = vmax.f32 %v1531_v12, 0.0 }
 0x1b2   : > { %v1272_v29 = vrot.slane %v1258_v21, %v3292_v58  ;;  %v1273_v30 = vcombine.high %v1265_v25, %v1265_v25  ;;  %v1276_v32 = vunpack.i.h.s16 %v1265_v25  ;;  %v2654_v19 = vpack.i.b16 %v1265_v25, %v1265_v25  ;;  %v1766_v33 = vpop.f32.mrb[34].mxu0  ;;  %v2050_v0 = vpop.f32.mrb[36].mxu1  ;;  %v1357_v43 = vld [vmem:[%s3303_s13] sm:$0x2] }
 0x1b3   : > { %v1818_v35 = vadd.f32 %v1812_v63, %v1764_v27  ;;  %v2850_v36 = vpop.f32.mrb[35].mxu0  ;;  %v2867_v37 = vpop.f32.mrb[37].mxu1  ;;  %v1360_v47 = vld [vmem:[%s3303_s13 + $0x4] sm:$0x2]  ;;  %v1363_v48 = vld [vmem:[%s3303_s13 + $0x8] sm:$0x2] }
 0x1b4   : > { %v1274_v38 = vcombine.high %v1272_v29, %v1272_v29  ;;  %v1278_v40 = vunpack.i.h.s16 %v1272_v29  ;;  %v1280_v24 = vunpack.i.h.s16 %v1273_v30  ;;  %v1284_v41 = vpack.i.b16 %v1276_v32, %v1276_v32  ;;  %v1366_v55 = vld [vmem:[%s3303_s13 + $0xc] sm:$0x2]  ;;  %v1369_v56 = vld [vmem:[%s3303_s13 + $0x10] sm:$0x2]  ;;  %v2053_v57 = vpop.f32.mrb[38].mxu1 }
 0x1b5   : > { %v2655_v44 = vpack.i.b16 %v1272_v29, %v1272_v29  ;;  %v2656_v45 = vpack.i.b16 %v1273_v30, %v1273_v30  ;;  %v1297_v46 = vrot.slane %v2654_v19, %v3305_v14  ;;  %v1819_v49 = vadd.f32 %v1818_v35, %v3285_v39  ;;  %v1372_v63 = vld [vmem:[%s3303_s13 + $0x14] sm:$0x2]  ;;  %v1375_v1 = vld [vmem:[%s3303_s13 + $0x18] sm:$0x2]  ;;  %v2868_v2 = vpop.f32.mrb[39].mxu1 }
 0x1b6   : > { %v1282_v50 = vunpack.i.h.s16 %v1274_v38  ;;  %v1286_v51 = vpack.i.b16 %v1278_v40, %v1278_v40  ;;  %v1288_v52 = vpack.i.b16 %v1280_v24, %v1280_v24  ;;  %v2657_v53 = vpack.i.b16 %v1274_v38, %v1274_v38  ;;  %v1378_v13 = vld [vmem:[%s3303_s13 + $0x1c] sm:$0x2] }
 0x1b7   : > { %v1304_v59 = vrot.slane %v1284_v41, %v3305_v14  ;;  %v1311_v60 = vrot.slane %v2655_v44, %v3305_v14  ;;  %v1325_v61 = vrot.slane %v2656_v45, %v3305_v14  ;;  %v1358_v62 = vsel %vm3475_vm14, %v1297_v46, %v1357_v43 }
 0x1b8   : > { %v1290_v4 = vpack.i.b16 %v1282_v50, %v1282_v50  ;;  %v1318_v5 = vrot.slane %v1286_v51, %v3305_v14  ;;  %v1332_v6 = vrot.slane %v1288_v52, %v3305_v14  ;;  %v1339_v7 = vrot.slane %v2657_v53, %v3305_v14  ;;  %1359 = vst [vmem:[%s3303_s13] sm:$0x2] %v1358_v62  ;;  %v2004_v8 = vpop.f32.mrb[36].mxu0 }
 0x1b9   : > { %v1361_v9 = vsel %vm3475_vm14, %v1304_v59, %v1360_v47  ;;  %v1364_v10 = vsel %vm3475_vm14, %v1311_v60, %v1363_v48  ;;  %v1370_v11 = vsel %vm3475_vm14, %v1325_v61, %v1369_v56  ;;  %v1533_v15 = vmin.f32 %v1532_v34, 20.0  ;;  %v2861_v16 = vpop.f32.mrb[37].mxu0 }
 0x1ba   : > { %v1346_v17 = vrot.slane %v1290_v4, %v3305_v14  ;;  %1362 = vst [vmem:[%s3303_s13 + $0x4] sm:$0x2] %v1361_v9  ;;  %1365 = vst [vmem:[%s3303_s13 + $0x8] sm:$0x2] %v1364_v10  ;;  %v1367_v18 = vsel %vm3475_vm14, %v1318_v5, %v1366_v55  ;;  %v1373_v20 = vsel %vm3475_vm14, %v1332_v6, %v1372_v63  ;;  %v2007_v23 = vpop.f32.mrb[38].mxu0  ;;  %v3514_v3 = vpop.f32.mrb[40].mxu1 }
 0x1bb   : > { %1371 = vst [vmem:[%s3303_s13 + $0x10] sm:$0x2] %v1370_v11  ;;  %v1376_v22 = vsel %vm3475_vm14, %v1339_v7, %v1375_v1  ;;  %1368 = vst [vmem:[%s3303_s13 + $0xc] sm:$0x2] %v1367_v18  ;;  %v1534_v31 = vsel %vm3288_vm4, %v1533_v15, 0.0  ;;  %v1820_v21 = vmax.f32 %v1819_v49, 0.0  ;;  %v2051_v25 = vadd.f32 %v2050_v0, %v2004_v8 }
 0x1bc   : > { %1374 = vst [vmem:[%s3303_s13 + $0x14] sm:$0x2] %v1373_v20  ;;  %1377 = vst [vmem:[%s3303_s13 + $0x18] sm:$0x2] %v1376_v22  ;;  %v2862_v12 = vpop.f32.mrb[39].mxu0  ;;  %v2879_v26 = vpop.f32.mrb[41].mxu1  ;;  %v1379_v27 = vsel %vm3475_vm14, %v1346_v17, %v1378_v13  ;;  %v1535_v28 = vpack.c.bf16 %v1534_v31, %v1534_v31 }
 0x1bd   : > { %v2298_v29 = vpop.f32.mrb[42].mxu1  ;;  %1380 = vst [vmem:[%s3303_s13 + $0x1c] sm:$0x2] %v1379_v27  ;;  %v1821_v30 = vmin.f32 %v1820_v21, 20.0  ;;  %v1644_v55 = vld [vmem:[%s3303_s13] sm:$0x4] }
 0x1be   : > { %v2880_v32 = vpop.f32.mrb[43].mxu1  ;;  %v1543_v19 = vrot.slane %v1535_v28, %v3292_v58  ;;  %v1647_v5 = vld [vmem:[%s3303_s13 + $0x4] sm:$0x4]  ;;  %v1650_v6 = vld [vmem:[%s3303_s13 + $0x8] sm:$0x4] }
 0x1bf   : > { %v1822_v33 = vsel %vm3288_vm4, %v1821_v30, 0.0  ;;  %v1656_v7 = vld [vmem:[%s3303_s13 + $0x10] sm:$0x4]  ;;  %v1653_v13 = vld [vmem:[%s3303_s13 + $0xc] sm:$0x4] }
 0x1c0   : > { %v1544_v34 = vcombine.high %v1543_v19, %v1543_v19  ;;  %v1551_v35 = vrot.slane %v1543_v19, %v3292_v58  ;;  %v1823_v36 = vpack.c.bf16 %v1822_v33, %v1822_v33  ;;  %v2099_v0 = vpop.f32.mrb[40].mxu0  ;;  %v1659_v15 = vld [vmem:[%s3303_s13 + $0x14] sm:$0x4]  ;;  %v1662_v16 = vld [vmem:[%s3303_s13 + $0x18] sm:$0x4] }
 0x1c1   : > { %v2105_v37 = vadd.f32 %v2099_v0, %v2051_v25  ;;  %v2873_v38 = vpop.f32.mrb[41].mxu0  ;;  %v1665_v12 = vld [vmem:[%s3303_s13 + $0x1c] sm:$0x4] }
 0x1c2   : > { %v1558_v40 = vrot.slane %v1544_v34, %v3292_v58  ;;  %v1559_v24 = vcombine.high %v1551_v35, %v1551_v35  ;;  %v1562_v41 = vunpack.i.h.s16 %v1551_v35  ;;  %v2664_v42 = vpack.i.b16 %v1551_v35, %v1551_v35  ;;  %v2102_v43 = vpop.f32.mrb[42].mxu0  ;;  %v3529_v44 = vpop.f32.mrb[44].mxu1 }
 0x1c3   : > { %v1831_v45 = vrot.slane %v1823_v36, %v3292_v58  ;;  %v3533_v46 = vadd.f32 %v2105_v37, %v3285_v39  ;;  %v2874_v47 = vpop.f32.mrb[43].mxu0  ;;  %v2891_v48 = vpop.f32.mrb[45].mxu1 }
 0x1c4   : > { %v1560_v49 = vcombine.high %v1558_v40, %v1558_v40  ;;  %v1564_v50 = vunpack.i.h.s16 %v1558_v40  ;;  %v1566_v51 = vunpack.i.h.s16 %v1559_v24  ;;  %v1570_v52 = vpack.i.b16 %v1562_v41, %v1562_v41  ;;  %v2393_v56 = vpop.f32.mrb[46].mxu1 }
 0x1c5   : > { %v2665_v57 = vpack.i.b16 %v1558_v40, %v1558_v40  ;;  %v2666_v59 = vpack.i.b16 %v1559_v24, %v1559_v24  ;;  %v1583_v60 = vrot.slane %v2664_v42, %v3305_v14  ;;  %v1832_v61 = vcombine.high %v1831_v45, %v1831_v45  ;;  %v2892_v62 = vpop.f32.mrb[47].mxu1 }
 0x1c6   : > { %v1568_v63 = vunpack.i.h.s16 %v1560_v49  ;;  %v1572_v1 = vpack.i.b16 %v1564_v50, %v1564_v50  ;;  %v1574_v2 = vpack.i.b16 %v1566_v51, %v1566_v51  ;;  %v2667_v4 = vpack.i.b16 %v1560_v49, %v1560_v49 }
 0x1c7   : > { %v1590_v8 = vrot.slane %v1570_v52, %v3305_v14  ;;  %v1597_v9 = vrot.slane %v2665_v57, %v3305_v14  ;;  %v1611_v10 = vrot.slane %v2666_v59, %v3305_v14  ;;  %v1645_v11 = vsel %vm3537_vm2, %v1583_v60, %v1644_v55 }
 0x1c8   : > { %v1576_v17 = vpack.i.b16 %v1568_v63, %v1568_v63  ;;  %v1604_v18 = vrot.slane %v1572_v1, %v3305_v14  ;;  %v1618_v20 = vrot.slane %v1574_v2, %v3305_v14  ;;  %v1625_v22 = vrot.slane %v2667_v4, %v3305_v14  ;;  %1646 = vst [vmem:[%s3303_s13] sm:$0x4] %v1645_v11  ;;  %v2341_v23 = vpop.f32.mrb[44].mxu0 }
 0x1c9   : > { %v1648_v31 = vsel %vm3537_vm2, %v1590_v8, %v1647_v5  ;;  %v1651_v21 = vsel %vm3537_vm2, %v1597_v9, %v1650_v6  ;;  %v1657_v25 = vsel %vm3537_vm2, %v1611_v10, %v1656_v7  ;;  %v1839_v26 = vrot.slane %v1831_v45, %v3292_v58  ;;  %v2885_v27 = vpop.f32.mrb[45].mxu0  ;;  %v2222_v45 = vld [vmem:[%s3303_s13 + $0x4] sm:$0x8] }
 0x1ca   : > { %v1632_v28 = vrot.slane %v1576_v17, %v3305_v14  ;;  %1649 = vst [vmem:[%s3303_s13 + $0x4] sm:$0x4] %v1648_v31  ;;  %1652 = vst [vmem:[%s3303_s13 + $0x8] sm:$0x4] %v1651_v21  ;;  %v1654_v29 = vsel %vm3537_vm2, %v1604_v18, %v1653_v13  ;;  %v1660_v30 = vsel %vm3537_vm2, %v1618_v20, %v1659_v15  ;;  %v2344_v19 = vpop.f32.mrb[46].mxu0  ;;  %v2107_v38 = vmax.f32 %v3533_v46, 0.0 }
 0x1cb   : > { %1658 = vst [vmem:[%s3303_s13 + $0x10] sm:$0x4] %v1657_v25  ;;  %v1663_v32 = vsel %vm3537_vm2, %v1625_v22, %v1662_v16  ;;  %1655 = vst [vmem:[%s3303_s13 + $0xc] sm:$0x4] %v1654_v29  ;;  %v1846_v33 = vrot.slane %v1832_v61, %v3292_v58  ;;  %v1847_v34 = vcombine.high %v1839_v26, %v1839_v26  ;;  %v1850_v35 = vunpack.i.h.s16 %v1839_v26  ;;  %v2886_v0 = vpop.f32.mrb[47].mxu0 }
 0x1cc   : > { %1661 = vst [vmem:[%s3303_s13 + $0x14] sm:$0x4] %v1660_v30  ;;  %1664 = vst [vmem:[%s3303_s13 + $0x18] sm:$0x4] %v1663_v32  ;;  %v2674_v36 = vpack.i.b16 %v1839_v26, %v1839_v26  ;;  %v1666_v37 = vsel %vm3537_vm2, %v1632_v28, %v1665_v12  ;;  %v2342_v40 = vadd.f32 %v2341_v23, %v3514_v3  ;;  %v2108_v46 = vmin.f32 %v2107_v38, 20.0 }
 0x1cd   : > { %1667 = vst [vmem:[%s3303_s13 + $0x1c] sm:$0x4] %v1666_v37  ;;  %v1848_v24 = vcombine.high %v1846_v33, %v1846_v33  ;;  %v1852_v41 = vunpack.i.h.s16 %v1846_v33  ;;  %v1854_v42 = vunpack.i.h.s16 %v1847_v34  ;;  %v1858_v43 = vpack.i.b16 %v1850_v35, %v1850_v35 }
 0x1ce   : > { %v2675_v47 = vpack.i.b16 %v1846_v33, %v1846_v33  ;;  %v2676_v48 = vpack.i.b16 %v1847_v34, %v1847_v34  ;;  %v1871_v49 = vrot.slane %v2674_v36, %v3305_v14  ;;  %v2396_v11 = vadd.f32 %v3529_v44, %v2342_v40 }
 0x1cf   : > { %v1856_v3 = vunpack.i.h.s16 %v1848_v24  ;;  %v1860_v50 = vpack.i.b16 %v1852_v41, %v1852_v41  ;;  %v1862_v51 = vpack.i.b16 %v1854_v42, %v1854_v42  ;;  %v2677_v52 = vpack.i.b16 %v1848_v24, %v1848_v24  ;;  %v1931_v53 = vld [vmem:[%s3303_s13] sm:$0x4] }
 0x1d0   : > { %v1878_v55 = vrot.slane %v1858_v43, %v3305_v14  ;;  %v1885_v56 = vrot.slane %v2675_v47, %v3305_v14  ;;  %v1899_v57 = vrot.slane %v2676_v48, %v3305_v14  ;;  %v1932_v59 = vsel %vm3587_vm3, %v1871_v49, %v1931_v53  ;;  %v2225_v47 = vld [vmem:[%s3303_s13 + $0x8] sm:$0x8]  ;;  %v2231_v48 = vld [vmem:[%s3303_s13 + $0x10] sm:$0x8]  ;;  %v2237_v53 = vld [vmem:[%s3303_s13 + $0x18] sm:$0x8] }
 0x1d1   : > { %v1864_v60 = vpack.i.b16 %v1856_v3, %v1856_v3  ;;  %v1892_v61 = vrot.slane %v1860_v50, %v3305_v14  ;;  %v1906_v62 = vrot.slane %v1862_v51, %v3305_v14  ;;  %v1913_v63 = vrot.slane %v2677_v52, %v3305_v14  ;;  %1933 = vst [vmem:[%s3303_s13] sm:$0x4] %v1932_v59  ;;  %v1934_v1 = vld [vmem:[%s3303_s13 + $0x4] sm:$0x4]  ;;  %v1937_v2 = vld [vmem:[%s3303_s13 + $0x8] sm:$0x4] }
 0x1d2   : > { %v1943_v4 = vld [vmem:[%s3303_s13 + $0x10] sm:$0x4]  ;;  %v1935_v5 = vsel %vm3587_vm3, %v1878_v55, %v1934_v1  ;;  %v1938_v6 = vsel %vm3587_vm3, %v1885_v56, %v1937_v2  ;;  %v1940_v7 = vld [vmem:[%s3303_s13 + $0xc] sm:$0x4]  ;;  %v2109_v44 = vsel %vm3288_vm4, %v2108_v46, 0.0  ;;  %v2397_v20 = vadd.f32 %v2396_v11, %v3285_v39 }
 0x1d3   : > { %v1944_v8 = vsel %vm3587_vm3, %v1899_v57, %v1943_v4  ;;  %v1946_v9 = vld [vmem:[%s3303_s13 + $0x14] sm:$0x4]  ;;  %v1949_v10 = vld [vmem:[%s3303_s13 + $0x18] sm:$0x4]  ;;  %v1920_v13 = vrot.slane %v1864_v60, %v3305_v14  ;;  %1936 = vst [vmem:[%s3303_s13 + $0x4] sm:$0x4] %v1935_v5  ;;  %v1941_v15 = vsel %vm3587_vm3, %v1892_v61, %v1940_v7  ;;  %v2110_v23 = vpack.c.bf16 %v2109_v44, %v2109_v44 }
 0x1d4   : > { %1939 = vst [vmem:[%s3303_s13 + $0x8] sm:$0x4] %v1938_v6  ;;  %1945 = vst [vmem:[%s3303_s13 + $0x10] sm:$0x4] %v1944_v8  ;;  %v1947_v16 = vsel %vm3587_vm3, %v1906_v62, %v1946_v9  ;;  %v1950_v17 = vsel %vm3587_vm3, %v1913_v63, %v1949_v10  ;;  %v1952_v18 = vld [vmem:[%s3303_s13 + $0x1c] sm:$0x4] }
 0x1d5   : > { %1942 = vst [vmem:[%s3303_s13 + $0xc] sm:$0x4] %v1941_v15  ;;  %1948 = vst [vmem:[%s3303_s13 + $0x14] sm:$0x4] %v1947_v16  ;;  %v1953_v22 = vsel %vm3587_vm3, %v1920_v13, %v1952_v18  ;;  %v2398_v31 = vmax.f32 %v2397_v20, 0.0  ;;  %v2118_v21 = vrot.slane %v2110_v23, %v3292_v58 }
 0x1d6   : > { %1951 = vst [vmem:[%s3303_s13 + $0x18] sm:$0x4] %v1950_v17  ;;  %1954 = vst [vmem:[%s3303_s13 + $0x1c] sm:$0x4] %v1953_v22  ;;  %v2228_v51 = vld [vmem:[%s3303_s13 + $0xc] sm:$0x8] }
 0x1d7   : > { %v2399_v25 = vmin.f32 %v2398_v31, 20.0  ;;  %v2119_v12 = vcombine.high %v2118_v21, %v2118_v21  ;;  %v2126_v26 = vrot.slane %v2118_v21, %v3292_v58  ;;  %v2234_v52 = vld [vmem:[%s3303_s13 + $0x14] sm:$0x8]  ;;  %v2240_v63 = vld [vmem:[%s3303_s13 + $0x1c] sm:$0x8] }
 0x1d9   : > { %v2400_v27 = vsel %vm3288_vm4, %v2399_v25, 0.0  ;;  %v2133_v39 = vrot.slane %v2119_v12, %v3292_v58  ;;  %v2134_v28 = vcombine.high %v2126_v26, %v2126_v26  ;;  %v2137_v29 = vunpack.i.h.s16 %v2126_v26 }
 0x1da   : > { %v2684_v30 = vpack.i.b16 %v2126_v26, %v2126_v26  ;;  %v2401_v32 = vpack.c.bf16 %v2400_v27, %v2400_v27  ;;  %vm2507_vm4 = vsmask.f32 7950 }
 0x1db   : > { %v2135_v19 = vcombine.high %v2133_v39, %v2133_v39  ;;  %v2139_v33 = vunpack.i.h.s16 %v2133_v39  ;;  %v2141_v34 = vunpack.i.h.s16 %v2134_v28  ;;  %v2145_v35 = vpack.i.b16 %v2137_v29, %v2137_v29  ;;  %vm3689_vm8 = vmand %vm2216_vm5, %vm2507_vm4 }
 0x1dc   : > { %v2685_v0 = vpack.i.b16 %v2133_v39, %v2133_v39  ;;  %v2686_v37 = vpack.i.b16 %v2134_v28, %v2134_v28  ;;  %v2158_v38 = vrot.slane %v2684_v30, %v3305_v14  ;;  %v2409_v40 = vrot.slane %v2401_v32, %v3292_v58 }
 0x1dd   : > { %v2143_v24 = vunpack.i.h.s16 %v2135_v19  ;;  %v2147_v41 = vpack.i.b16 %v2139_v33, %v2139_v33  ;;  %v2149_v42 = vpack.i.b16 %v2141_v34, %v2141_v34  ;;  %v2687_v43 = vpack.i.b16 %v2135_v19, %v2135_v19 }
 0x1de   : > { %v2165_v49 = vrot.slane %v2145_v35, %v3305_v14  ;;  %v2172_v46 = vrot.slane %v2685_v0, %v3305_v14  ;;  %v2186_v3 = vrot.slane %v2686_v37, %v3305_v14  ;;  %v2220_v50 = vsel %vm3641_vm7, %v2158_v38, %v2219_v54 }
 0x1df   : > { %v2151_v55 = vpack.i.b16 %v2143_v24, %v2143_v24  ;;  %v2179_v56 = vrot.slane %v2147_v41, %v3305_v14  ;;  %v2193_v57 = vrot.slane %v2149_v42, %v3305_v14  ;;  %v2200_v59 = vrot.slane %v2687_v43, %v3305_v14  ;;  %2221 = vst [vmem:[%s3303_s13] sm:$0x8] %v2220_v50 }
 0x1e0   : > { %v2223_v60 = vsel %vm3641_vm7, %v2165_v49, %v2222_v45  ;;  %v2226_v61 = vsel %vm3641_vm7, %v2172_v46, %v2225_v47  ;;  %v2232_v62 = vsel %vm3641_vm7, %v2186_v3, %v2231_v48  ;;  %v2410_v1 = vcombine.high %v2409_v40, %v2409_v40 }
 0x1e1   : > { %v2207_v2 = vrot.slane %v2151_v55, %v3305_v14  ;;  %2224 = vst [vmem:[%s3303_s13 + $0x4] sm:$0x8] %v2223_v60  ;;  %2227 = vst [vmem:[%s3303_s13 + $0x8] sm:$0x8] %v2226_v61  ;;  %v2229_v4 = vsel %vm3641_vm7, %v2179_v56, %v2228_v51  ;;  %v2235_v5 = vsel %vm3641_vm7, %v2193_v57, %v2234_v52 }
 0x1e2   : > { %2233 = vst [vmem:[%s3303_s13 + $0x10] sm:$0x8] %v2232_v62  ;;  %v2238_v6 = vsel %vm3641_vm7, %v2200_v59, %v2237_v53  ;;  %2230 = vst [vmem:[%s3303_s13 + $0xc] sm:$0x8] %v2229_v4  ;;  %v2417_v7 = vrot.slane %v2409_v40, %v3292_v58  ;;  %v2424_v8 = vrot.slane %v2410_v1, %v3292_v58 }
 0x1e3   : > { %2236 = vst [vmem:[%s3303_s13 + $0x14] sm:$0x8] %v2235_v5  ;;  %2239 = vst [vmem:[%s3303_s13 + $0x18] sm:$0x8] %v2238_v6  ;;  %v2241_v9 = vsel %vm3641_vm7, %v2207_v2, %v2240_v63 }
 0x1e4   : > { %2242 = vst [vmem:[%s3303_s13 + $0x1c] sm:$0x8] %v2241_v9  ;;  %v2425_v10 = vcombine.high %v2417_v7, %v2417_v7  ;;  %v2426_v11 = vcombine.high %v2424_v8, %v2424_v8  ;;  %v2428_v13 = vunpack.i.h.s16 %v2417_v7  ;;  %v2430_v15 = vunpack.i.h.s16 %v2424_v8 }
 0x1e5   : > { %v2694_v16 = vpack.i.b16 %v2417_v7, %v2417_v7  ;;  %v2695_v17 = vpack.i.b16 %v2424_v8, %v2424_v8 }
 0x1e6   : > { %v2432_v18 = vunpack.i.h.s16 %v2425_v10  ;;  %v2434_v44 = vunpack.i.h.s16 %v2426_v11  ;;  %v2436_v20 = vpack.i.b16 %v2428_v13, %v2428_v13  ;;  %v2438_v22 = vpack.i.b16 %v2430_v15, %v2430_v15  ;;  %v2509_v23 = vld [vmem:[%s3303_s13] sm:$0x8] }
 0x1e7   : > { %v2696_v31 = vpack.i.b16 %v2425_v10, %v2425_v10  ;;  %v2697_v21 = vpack.i.b16 %v2426_v11, %v2426_v11  ;;  %v2449_v25 = vrot.slane %v2694_v16, %v3305_v14  ;;  %v2463_v12 = vrot.slane %v2695_v17, %v3305_v14 }
 0x1e8   : > { %v2440_v26 = vpack.i.b16 %v2432_v18, %v2432_v18  ;;  %v2442_v27 = vpack.i.b16 %v2434_v44, %v2434_v44  ;;  %v2456_v39 = vrot.slane %v2436_v20, %v3305_v14  ;;  %v2470_v28 = vrot.slane %v2438_v22, %v3305_v14  ;;  %v2512_v29 = vld [vmem:[%s3303_s13 + $0x4] sm:$0x8]  ;;  %v2515_v30 = vld [vmem:[%s3303_s13 + $0x8] sm:$0x8] }
 0x1e9   : > { %v2521_v32 = vld [vmem:[%s3303_s13 + $0x10] sm:$0x8]  ;;  %v2477_v19 = vrot.slane %v2696_v31, %v3305_v14  ;;  %v2491_v33 = vrot.slane %v2697_v21, %v3305_v14  ;;  %v2510_v34 = vsel %vm3689_vm8, %v2449_v25, %v2509_v23  ;;  %v2516_v35 = vsel %vm3689_vm8, %v2463_v12, %v2515_v30  ;;  %v2518_v36 = vld [vmem:[%s3303_s13 + $0xc] sm:$0x8] }
 0x1ea   : > { %v2524_v54 = vld [vmem:[%s3303_s13 + $0x14] sm:$0x8]  ;;  %v2527_v0 = vld [vmem:[%s3303_s13 + $0x18] sm:$0x8]  ;;  %v2484_v37 = vrot.slane %v2440_v26, %v3305_v14  ;;  %v2498_v38 = vrot.slane %v2442_v27, %v3305_v14  ;;  %2511 = vst [vmem:[%s3303_s13] sm:$0x8] %v2510_v34  ;;  %v2513_v40 = vsel %vm3689_vm8, %v2456_v39, %v2512_v29  ;;  %v2519_v24 = vsel %vm3689_vm8, %v2470_v28, %v2518_v36 }
 0x1eb   : > { %2517 = vst [vmem:[%s3303_s13 + $0x8] sm:$0x8] %v2516_v35  ;;  %2514 = vst [vmem:[%s3303_s13 + $0x4] sm:$0x8] %v2513_v40  ;;  %v2522_v41 = vsel %vm3689_vm8, %v2477_v19, %v2521_v32  ;;  %v2528_v42 = vsel %vm3689_vm8, %v2491_v33, %v2527_v0  ;;  %v2530_v43 = vld [vmem:[%s3303_s13 + $0x1c] sm:$0x8] }
 0x1ec   : > { %2520 = vst [vmem:[%s3303_s13 + $0xc] sm:$0x8] %v2519_v24  ;;  %2523 = vst [vmem:[%s3303_s13 + $0x10] sm:$0x8] %v2522_v41  ;;  %v2525_v14 = vsel %vm3689_vm8, %v2484_v37, %v2524_v54  ;;  %v2531_v45 = vsel %vm3689_vm8, %v2498_v38, %v2530_v43 }
 0x1ed   : > { %2529 = vst [vmem:[%s3303_s13 + $0x18] sm:$0x8] %v2528_v42  ;;  %2526 = vst [vmem:[%s3303_s13 + $0x14] sm:$0x8] %v2525_v14 }
 0x1ee   : > { %2532 = vst [vmem:[%s3303_s13 + $0x1c] sm:$0x8] %v2531_v45 }
 0x1ef PF: > { %s20_s22 = sadd.s32 1, %s2972_s22   ;;  %s3765_s20 = smov %s2968_s21 }
 0x1f0   : > { %p17_p10 = scmp.ge.s32.totalorder %s20_s22, 4   ;;  %s3766_s21 = smov %s3768_s0 }
 0x1f2   :  { %19 = sbr.rel (!%p17_p10) target bundleno = 17 (0x11), region = 64 }

// kernel: mask_conv_forward.3
= control target key start
LH: loop header
LB: loop body
LE: loop exit
PB: predicated region body
PF: predicated region fallthrough
CT: control target
= control target key end

     0   :  { %s4195_s0 = inlined_call_operand.vmem [shape: s32[2], index: 0, kind: input, shape index: {}]   ;;  %s4196_s1 = inlined_call_operand.vmem [shape: bf16[2,80,18], index: 1, kind: input, shape index: {}]   ;;  %s4197_s2 = inlined_call_operand.vmem [shape: bf16[3,8,24], index: 2, kind: input, shape index: {}]   ;;  %s4198_s3 = inlined_call_operand.vmem [shape: f32[8,1], index: 3, kind: input, shape index: {}]   ;;  %s4199_s4 = inlined_call_operand.hbm [shape: bf16[2,8,8,16], index: 4, kind: output, shape index: {}]  }
   0x1   :  { %s9_s17 = sshll.u32 %s4195_s0, 4  ;;  %s10_s17 = int_to_ptr.vmem [resolvable:$true] %s9_s17 }
   0x2   :  { %s3157_s18 = scalar_lea.vmem %s10_s17, 16  ;;  %p3162_p1 = scmp.lt.s32.totalorder %s10_s17, %s10_s17 }
   0x3   :  { %p3158_p0 = scmp.ne.s32.totalorder %s10_s17, %s3157_s18  ;;  %p3163_p2 = scmp.lt.s32.totalorder %s3157_s18, %s3157_s18 }
   0x5   :  { %p3164_p3 = por %p3163_p2, %p3162_p1 }
   0x7   :  { %p3165_p4 = pnand %p3164_p3, %p3158_p0 }
   0x9   :  { %3168 = shalt.err (!%p3165_p4)  }
   0xa   :  { %s3251_s19 = smov [#allocation3]  }
   0xb   :  { %12 = dma.vmem_to_smem %s10_s17, 16, %s3251_s19, [#allocation2] }
   0xc   :  { %3221 = dma.done.wait [#allocation2], 16 }
   0xd   :  { %3222 = vsyncadd [#allocation2], 4294967280 }
   0xe   :  { %14 = sfence }
   0xf   :  { %15 = vsyncpa [#allocation5], 0 }
  0x10   :  { %17 = vsyncpa [#allocation5 + $0x1], 0  ;;  %s3290_s20 = smov 0   ;;  %s3292_s21 = smov 0  }
  0x11   :  { %s3294_s0 = smov 0   ;;  %s3296_s22 = smov 0  }
  0x12   :  { %s3298_s23 = smov 0   ;;  %s3300_s24 = smov 0  }
  0x13 LB: > { %s2709_s25 = sadd.s32 4294967295, %s3249_s24   ;;  %s2710_s26 = sadd.s32 4294967294, %s3249_s24   ;;  %s3249_s24 = sphi %s3300_s24, %s23_s24   ;;  %s3245_s23 = sphi %s3298_s23, %s4224_s23   ;;  %s3241_s22 = sphi %s3296_s22, %s4223_s22   ;;  %s3237_s0 = sphi %s3294_s0, %s4222_s0   ;;  %s3233_s21 = sphi %s3292_s21, %s4221_s21   ;;  %s3229_s20 = sphi %s3290_s20, %s4220_s20  }
  0x14   : > { %s35_s27 = sadd.s32 1, %s3245_s23  ;;  %s114_s28 = sadd.s32 1, %s3237_s0 }
  0x15   : > { %p37_p5 = scmp.ge.s32.totalorder %s35_s27, 2  ;;  %p124_p6 = scmp.ne.s32.totalorder %s3237_s0, %s3233_s21 }
  0x16   : > { %p125_p7 = scmp.eq.s32.totalorder %s2709_s25, 1  ;;  %p130_p8 = scmp.ne.s32.totalorder %s3233_s21, %s3229_s20 }
  0x17   : > { %s4226_s27 = smov (%p37_p5, %s35_s27), 0  ;;  %p131_p10 = scmp.eq.s32.totalorder %s2710_s26, 1 }
  0x18   : > { %p3330_p9 = por %p125_p7, %p124_p6  ;;  %s109_s30 = ssub.s32 %s3245_s23, %s4226_s27 }
  0x19   : > { %p2713_p11 = scmp.ge.s32.totalorder %s3249_s24, 1  ;;  %p112_p12 = scmp.eq.s32.totalorder %s109_s30, 0 }
  0x1a   : > { %p3337_p13 = por %p131_p10, %p130_p8  ;;  %p165_p0 = scmp.lt.s32.totalorder %s3249_s24, 3 }
  0x1b   : > { %s3343_s6 = scalar_select %p112_p12, %s3237_s0, %s114_s28  }
  0x1c   : > { %p166_p1 = pnand %p2713_p11, %p165_p0 }
  0x1d   : > { %p191_p2 = scmp.lt.s32.totalorder (!%p166_p1), %s3241_s22, 1  ;;  %v3252_v0 = vmov (!%p166_p1), 0.0   ;;  %vm3253_vm0 = vmmov (!%p166_p1), 0   ;;  %vm230_vm1 = vcmask (!%p166_p1), 1043456   ;;  %s3254_s12 = smov (!%p166_p1), 127   ;;  %vm226_vm2 = vcmask (!%p166_p1), 195584  }
  0x1e   : > { %169 = sbr.rel (%p166_p1) target bundleno = 519 (0x207), region = 32  ;;  %2882 = vmatprep.subr.bf16.mxu0 (!%p166_p1), %v3252_v0  ;;  %2890 = vmatprep.subr.bf16.mxu1 (!%p166_p1), %v3252_v0  ;;  %s3255_s13 = smov (!%p166_p1), 126   ;;  %v210_v6 = vld [vmem:[%s4197_s2] sm:$0xf] (!%p166_p1)  ;;  %v3256_v20 = vmov (!%p166_p1), 0   ;;  %vm492_vm4 = vcmask (!%p166_p1), 122880  }
  0x1f   : > { %2886 = vmatprep.mubr.msk.bf16.mxu0 (!%p166_p1), %vm3253_vm0, %v3252_v0  ;;  %2894 = vmatprep.mubr.msk.bf16.mxu1 (!%p166_p1), %vm3253_vm0, %v3252_v0  ;;  %v206_v19 = vld [vmem:[%s4198_s3] sm:$0xff] (!%p166_p1)  ;;  %v2721_v34 = vld [vmem:[%s4197_s2 + $0x8] sm:$0xf] (!%p166_p1)  ;;  %s187_s14 = sand.u32 (!%p166_p1), 1, %s3233_s21   ;;  %vm493_vm5 = vsmask.f32 (!%p166_p1), 256 }
  0x20   : > { %3140 = vset.pattern.permute.xlu0 (!%p166_p1), %v3256_v20  ;;  %v2716_v26 = vld [vmem:[%s4197_s2 + $0x4] sm:$0xf] (!%p166_p1)  ;;  %v2732_v37 = vld [vmem:[%s4197_s2 + $0x8] sm:$0xf] (!%p166_p1)  ;;  %v522_v40 = vld [vmem:[%s4197_s2] sm:$0xf] (!%p166_p1) }
  0x21   : > { %v2727_v30 = vld [vmem:[%s4197_s2 + $0x4] sm:$0xf] (!%p166_p1)  ;;  %v822_v44 = vld [vmem:[%s4197_s2] sm:$0xf] (!%p166_p1)  ;;  %v2743_v54 = vld [vmem:[%s4197_s2 + $0x8] sm:$0xf] (!%p166_p1) }
  0x22   : > { %v2738_v48 = vld [vmem:[%s4197_s2 + $0x4] sm:$0xf] (!%p166_p1)  ;;  %v2754_v57 = vld [vmem:[%s4197_s2 + $0x8] sm:$0xf] (!%p166_p1)  ;;  %v1123_v60 = vld [vmem:[%s4197_s2] sm:$0xf] (!%p166_p1) }
  0x23   : > { %v2749_v50 = vld [vmem:[%s4197_s2 + $0x4] sm:$0xf] (!%p166_p1)  ;;  %v2776_v20 = vld [vmem:[%s4197_s2 + $0x8] sm:$0xf] (!%p166_p1)  ;;  %s2714_s15 = sshll.u32 (!%p166_p1), %s187_s14, 5  ;;  %vm3712_vm6 = vmand (!%p166_p1), %vm492_vm4, %vm493_vm5  ;;  %vm1093_vm9 = vcmask (!%p166_p1), 123905  }
  0x24   : > { %s3716_s16 = scalar_lea.vmem (!%p166_p1), [#allocation4], %s2714_s15  ;;  %vm793_vm7 = vsmask.f32 (!%p166_p1), 7938  ;;  %vm1094_vm10 = vsmask.f32 (!%p166_p1), 1280  ;;  %vm1694_vm14 = vcmask (!%p166_p1), 124930  }
  0x25   : > { %s192_s7 = scalar_select %p191_p2, %s3241_s22, 1  ;;  %vm3769_vm8 = vmand %vm492_vm4, %vm793_vm7  ;;  %vm1394_vm12 = vsmask.f32 7942  ;;  %vm1695_vm15 = vsmask.f32 2304  ;;  %vm2295_vm4 = vcmask 125955  }
  0x26   : > { %vm3826_vm11 = vmand %vm1093_vm9, %vm1094_vm10  ;;  %vm2296_vm5 = vsmask.f32 3328  ;;  %s2809_s17 = sshll.u32 %s3241_s22, 9  ;;  %s2637_s18 = sshll.u32 %s3716_s16, 4  ;;  %s4130_s18 = int_to_ptr.vmem [resolvable:$true] %s2637_s18 }
  0x27   : > { %s3074_s8 = smul.u32 40, %s192_s7  ;;  %vm3880_vm13 = vmand %vm1093_vm9, %vm1394_vm12  ;;  %s4128_s25 = scalar_lea.hbm %s4199_s4, %s2809_s17 }
  0x28   : > { %s4149_s26 = scalar_lea.sflag [#allocation5], %s187_s14  ;;  %s3169_s28 = scalar_lea.vmem %s4130_s18, 512 }
  0x29   : > { %s3356_s11 = scalar_lea.vmem %s4196_s1, %s3074_s8  ;;  %p3170_p3 = scmp.ne.s32.totalorder %s4130_s18, %s3169_s28 }
  0x2a   : > { %v3141_v1 = vld [vmem:[%s3356_s11] sm:$0xff]   ;;  %v3142_v2 = vld [vmem:[%s3356_s11 + $0x8] ss:$0 sps:$4 sm:$0xff]   ;;  %v3371_v5 = vld [vmem:[%s3356_s11 + $0xc] ss:$0 sps:$4 sm:$0xff]   ;;  %s3259_s30 = smov [#allocation4]  }
  0x2b   : > { %221 = vrot.lane.b32.xlu0 %v3141_v1, %s3254_s12  ;;  %323 = vrot.lane.b32.xlu1 %v3141_v1, %s3255_s13  ;;  %v3363_v3 = vld [vmem:[%s3356_s11 + $0x4] sm:$0xff]   ;;  %v279_v4 = vsel %vm230_vm1, %v3142_v2, 0  ;;  %v3391_v8 = vld [vmem:[%s3356_s11 + $0x10] ss:$0 sps:$4 sm:$0xff]   ;;  %v588_v38 = vsel %vm230_vm1, %v3371_v5, 0  ;;  %p3171_p4 = pnand %p3170_p3, %p3330_p9  ;;  %s3173_s7 = sshll.u32 %s3259_s30, 4  ;;  %s3174_s7 = int_to_ptr.vmem [resolvable:$false] %s3173_s7 }
  0x2c   : > { %2891 = vmatpush3.bf16.msra.mxu1 %v3141_v1  ;;  %v3388_v7 = vld [vmem:[%s3356_s11 + $0x8] sm:$0xff]   ;;  %v3405_v10 = vld [vmem:[%s3356_s11 + $0x14] ss:$0 sps:$4 sm:$0xff]   ;;  %v3419_v12 = vld [vmem:[%s3356_s11 + $0x18] ss:$0 sps:$4 sm:$0xff]   ;;  %v888_v42 = vsel %vm230_vm1, %v3391_v8, 0  ;;  %p3176_p6 = scmp.lt.s32.totalorder %s4130_s18, %s3174_s7 }
  0x2d   : > { %2892 = vmatprep.subr.bf16.mxu1 %v3252_v0  ;;  %v3398_v9 = vld [vmem:[%s3356_s11 + $0xc] sm:$0xff]   ;;  %v3426_v13 = vld [vmem:[%s3356_s11 + $0x14] sm:$0xff]   ;;  %v3433_v14 = vld [vmem:[%s3356_s11 + $0x1c] ss:$0 sps:$4 sm:$0xff]   ;;  %v1189_v58 = vsel %vm230_vm1, %v3405_v10, 0  ;;  %v1489_v62 = vsel %vm230_vm1, %v3419_v12, 0  ;;  %p3172_p5 = pneg %p3171_p4 }
  0x2e   : > { %v3416_v11 = vld [vmem:[%s3356_s11 + $0x10] sm:$0xff]   ;;  %v3444_v15 = vld [vmem:[%s3356_s11 + $0x18] sm:$0xff]   ;;  %v3447_v16 = vld [vmem:[%s3356_s11 + $0x20] ss:$0 sps:$4 sm:$0xff]   ;;  %s3175_s8 = scalar_lea.vmem %s3174_s7, 1024 }
  0x2f   : > { %223 = vrot.lane.b32.xlu0 %v3142_v2, %s3254_s12  ;;  %532 = vrot.lane.b32.xlu1 %v3363_v3, %s3254_s12  ;;  %v3454_v17 = vld [vmem:[%s3356_s11 + $0x1c] sm:$0xff]   ;;  %v3461_v18 = vld [vmem:[%s3356_s11 + $0x24] ss:$0 sps:$4 sm:$0xff]   ;;  %p3177_p7 = scmp.lt.s32.totalorder %s3175_s8, %s3169_s28 }
  0x30   : > { %2893 = vmatpush3.bf16.msra.mxu1 %v279_v4  ;;  %v1423_v1 = vld [vmem:[%s4197_s2] sm:$0xf] }
  0x31   : > { %2906 = vmatprep.subr.bf16.mxu1 %v3252_v0  ;;  %p3178_p8 = por %p3177_p7, %p3176_p6 }
  0x33   : > { %534 = vrot.lane.b32.xlu1 %v3371_v5, %s3254_s12  ;;  %325 = vrot.lane.b32.xlu0 %v3142_v2, %s3255_s13  ;;  %p3179_p10 = pnand %p3178_p8, %p3172_p5 }
  0x34   : > { %2895 = vmatmul.mubr.msk.bf16.vlgmr.msra.gmra.mrb[0].mxu1 %vm226_vm2, %v210_v6 }
  0x35   : > { %2910 = vmatprep.mubr.msk.bf16.mxu1 %vm3253_vm0, %v3252_v0 }
  0x37   : > { %631 = vrot.lane.b32.xlu0 %v3363_v3, %s3255_s13  ;;  %633 = vrot.lane.b32.xlu1 %v3371_v5, %s3255_s13  ;;  %v2760_v5 = vld [vmem:[%s4197_s2 + $0x4] sm:$0xf] }
  0x3b   : > { %832 = vrot.lane.b32.xlu0 %v3388_v7, %s3254_s12  ;;  %834 = vrot.lane.b32.xlu1 %v3391_v8, %s3254_s12 }
  0x3f   : > { %1133 = vrot.lane.b32.xlu1 %v3398_v9, %s3254_s12  ;;  %931 = vrot.lane.b32.xlu0 %v3388_v7, %s3255_s13 }
  0x43   : > { %1135 = vrot.lane.b32.xlu1 %v3405_v10, %s3254_s12  ;;  %933 = vrot.lane.b32.xlu0 %v3391_v8, %s3255_s13 }
  0x47   : > { %1232 = vrot.lane.b32.xlu0 %v3398_v9, %s3255_s13  ;;  %1234 = vrot.lane.b32.xlu1 %v3405_v10, %s3255_s13 }
  0x4b   : > { %1433 = vrot.lane.b32.xlu0 %v3416_v11, %s3254_s12  ;;  %1435 = vrot.lane.b32.xlu1 %v3419_v12, %s3254_s12 }
  0x4f   : > { %1734 = vrot.lane.b32.xlu1 %v3426_v13, %s3254_s12  ;;  %1532 = vrot.lane.b32.xlu0 %v3416_v11, %s3255_s13 }
  0x53   : > { %1736 = vrot.lane.b32.xlu1 %v3433_v14, %s3254_s12  ;;  %1534 = vrot.lane.b32.xlu0 %v3419_v12, %s3255_s13 }
  0x57   : > { %1833 = vrot.lane.b32.xlu0 %v3426_v13, %s3255_s13  ;;  %1835 = vrot.lane.b32.xlu1 %v3433_v14, %s3255_s13 }
  0x5b   : > { %2034 = vrot.lane.b32.xlu0 %v3444_v15, %s3254_s12  ;;  %2036 = vrot.lane.b32.xlu1 %v3447_v16, %s3254_s12 }
  0x5f   : > { %2335 = vrot.lane.b32.xlu1 %v3454_v17, %s3254_s12  ;;  %2133 = vrot.lane.b32.xlu0 %v3444_v15, %s3255_s13 }
  0x63   : > { %2337 = vrot.lane.b32.xlu1 %v3461_v18, %s3254_s12  ;;  %2135 = vrot.lane.b32.xlu0 %v3447_v16, %s3255_s13 }
  0x67   : > { %2434 = vrot.lane.b32.xlu0 %v3454_v17, %s3255_s13  ;;  %2436 = vrot.lane.b32.xlu1 %v3461_v18, %s3255_s13  ;;  %s198_s13 = sld [smem:[#allocation3 + %s3241_s22]] }
  0x6b   : > { %377 = vperm.xlu0 %3140, %v206_v19  }
  0x9d   : > { %v222_v21 = vpop.permute.xlu0 %221  ;;  %v324_v22 = vpop.permute.xlu1 %323 }
  0x9e   : > { %2883 = vmatpush3.bf16.msra.mxu0 %v222_v21  ;;  %v1790_v21 = vsel %vm230_vm1, %v3433_v14, 0  ;;  %v2090_v14 = vsel %vm230_vm1, %v3447_v16, 0 }
  0x9f   : > { %2884 = vmatprep.subr.bf16.mxu0 %v3252_v0 }
  0xa1   : > { %v224_v23 = vpop.permute.xlu0 %223  ;;  %v533_v24 = vpop.permute.xlu1 %532 }
  0xa2   : > { %v232_v25 = vsel %vm230_vm1, %v224_v23, 0  ;;  %2907 = vmatpush3.bf16.msra.mxu1 %v533_v24 }
  0xa3   : > { %2885 = vmatpush3.bf16.msra.mxu0 %v232_v25  ;;  %2908 = vmatprep.subr.bf16.mxu1 %v3252_v0 }
  0xa4   : > { %2898 = vmatprep.subr.bf16.mxu0 %v3252_v0 }
  0xa5   : > { %v535_v27 = vpop.permute.xlu1 %534  ;;  %v326_v28 = vpop.permute.xlu0 %325 }
  0xa6   : > { %2887 = vmatmul.mubr.msk.bf16.vlgmr.msra.gmra.mrb[0].mxu0 %vm226_vm2, %v2716_v26  ;;  %v541_v29 = vsel %vm230_vm1, %v535_v27, 0  ;;  %v332_v31 = vsel %vm230_vm1, %v326_v28, 0  ;;  %v2782_v27 = vld [vmem:[%s4197_s2 + $0x4] sm:$0xf] }
  0xa7   : > { %2899 = vmatpush3.bf16.msra.mxu0 %v324_v22  ;;  %2909 = vmatpush3.bf16.msra.mxu1 %v541_v29  ;;  %v2793_v29 = vld [vmem:[%s4197_s2 + $0x4] sm:$0xf] }
  0xa8   : > { %2900 = vmatprep.subr.bf16.mxu0 %v3252_v0  ;;  %2902 = vmatprep.mubr.msk.bf16.mxu0 %vm3253_vm0, %v3252_v0 }
  0xa9   : > { %v632_v32 = vpop.permute.xlu0 %631  ;;  %2922 = vmatprep.subr.bf16.mxu1 %v3252_v0  ;;  %v634_v33 = vpop.permute.xlu1 %633 }
  0xaa   : > { %2911 = vmatmul.mubr.msk.bf16.vlgmr.msra.gmra.mrb[4].mxu1 %vm226_vm2, %v2727_v30  ;;  %v640_v35 = vsel %vm230_vm1, %v634_v33, 0  ;;  %v2787_v33 = vld [vmem:[%s4197_s2 + $0x8] sm:$0xf] }
  0xab   : > { %2901 = vmatpush3.bf16.msra.mxu0 %v332_v31  ;;  %2923 = vmatpush3.bf16.msra.mxu1 %v632_v32 }
  0xac   : > { %2914 = vmatprep.subr.bf16.mxu0 %v3252_v0  ;;  %2924 = vmatprep.subr.bf16.mxu1 %v3252_v0 }
  0xad   : > { %2926 = vmatprep.mubr.msk.bf16.mxu1 %vm3253_vm0, %v3252_v0  ;;  %v835_v36 = vpop.permute.xlu1 %834  ;;  %v833_v39 = vpop.permute.xlu0 %832 }
  0xae   : > { %2903 = vmatmul.mubr.msk.bf16.vlgmr.msra.gmra.mrb[4].mxu0 %vm226_vm2, %v2721_v34  ;;  %v841_v45 = vsel %vm230_vm1, %v835_v36, 0  ;;  %v2391_v36 = vsel %vm230_vm1, %v3461_v18, 0 }
  0xaf   : > { %2915 = vmatpush3.bf16.msra.mxu0 %v3363_v3  ;;  %2925 = vmatpush3.bf16.msra.mxu1 %v640_v35  ;;  %v2798_v35 = vld [vmem:[%s4197_s2 + $0x8] sm:$0xf] }
  0xb0   : > { %2916 = vmatprep.subr.bf16.mxu0 %v3252_v0  ;;  %2918 = vmatprep.mubr.msk.bf16.mxu0 %vm3253_vm0, %v3252_v0 }
  0xb1   : > { %2938 = vmatprep.subr.bf16.mxu1 %v3252_v0  ;;  %v1134_v41 = vpop.permute.xlu1 %1133  ;;  %v932_v43 = vpop.permute.xlu0 %931 }
  0xb2   : > { %2927 = vmatmul.mubr.msk.bf16.vlgmr.msra.gmra.mrb[8].mxu1 %vm226_vm2, %v2732_v37 }
  0xb3   : > { %2917 = vmatpush3.bf16.msra.mxu0 %v588_v38  ;;  %2939 = vmatpush3.bf16.msra.mxu1 %v3388_v7  ;;  %v2771_v7 = vld [vmem:[%s4197_s2 + $0x4] sm:$0xf] }
  0xb4   : > { %2930 = vmatprep.subr.bf16.mxu0 %v3252_v0  ;;  %2940 = vmatprep.subr.bf16.mxu1 %v3252_v0 }
  0xb5   : > { %2942 = vmatprep.mubr.msk.bf16.mxu1 %vm3253_vm0, %v3252_v0  ;;  %v1136_v46 = vpop.permute.xlu1 %1135  ;;  %v934_v47 = vpop.permute.xlu0 %933 }
  0xb6   : > { %2919 = vmatmul.mubr.msk.bf16.vlgmr.msra.gmra.mrb[8].mxu0 %vm226_vm2, %v522_v40  ;;  %v1142_v49 = vsel %vm230_vm1, %v1136_v46, 0  ;;  %v940_v51 = vsel %vm230_vm1, %v934_v47, 0  ;;  %v199_v46 = vlaneseq }
  0xb7   : > { %2931 = vmatpush3.bf16.msra.mxu0 %v833_v39  ;;  %2941 = vmatpush3.bf16.msra.mxu1 %v888_v42 }
  0xb8   : > { %2932 = vmatprep.subr.bf16.mxu0 %v3252_v0  ;;  %2934 = vmatprep.mubr.msk.bf16.mxu0 %vm3253_vm0, %v3252_v0 }
  0xb9   : > { %2954 = vmatprep.subr.bf16.mxu1 %v3252_v0  ;;  %v1233_v52 = vpop.permute.xlu0 %1232  ;;  %v1235_v53 = vpop.permute.xlu1 %1234 }
  0xba   : > { %2943 = vmatmul.mubr.msk.bf16.vlgmr.msra.gmra.mrb[12].mxu1 %vm226_vm2, %v822_v44  ;;  %v1241_v55 = vsel %vm230_vm1, %v1235_v53, 0 }
  0xbb   : > { %2933 = vmatpush3.bf16.msra.mxu0 %v841_v45  ;;  %2955 = vmatpush3.bf16.msra.mxu1 %v1134_v41 }
  0xbc   : > { %2946 = vmatprep.subr.bf16.mxu0 %v3252_v0  ;;  %2956 = vmatprep.subr.bf16.mxu1 %v3252_v0 }
  0xbd   : > { %2958 = vmatprep.mubr.msk.bf16.mxu1 %vm3253_vm0, %v3252_v0  ;;  %v1436_v56 = vpop.permute.xlu1 %1435  ;;  %v1434_v59 = vpop.permute.xlu0 %1433 }
  0xbe   : > { %2935 = vmatmul.mubr.msk.bf16.vlgmr.msra.gmra.mrb[12].mxu0 %vm226_vm2, %v2738_v48  ;;  %v1442_v2 = vsel %vm230_vm1, %v1436_v56, 0  ;;  %v200_v56 = vand.u32 127, %v199_v46 }
  0xbf   : > { %2947 = vmatpush3.bf16.msra.mxu0 %v932_v43  ;;  %2957 = vmatpush3.bf16.msra.mxu1 %v1142_v49 }
  0xc0   : > { %2948 = vmatprep.subr.bf16.mxu0 %v3252_v0  ;;  %2950 = vmatprep.mubr.msk.bf16.mxu0 %vm3253_vm0, %v3252_v0 }
  0xc1   : > { %2970 = vmatprep.subr.bf16.mxu1 %v3252_v0  ;;  %v1735_v61 = vpop.permute.xlu1 %1734  ;;  %v1533_v63 = vpop.permute.xlu0 %1532 }
  0xc2   : > { %2959 = vmatmul.mubr.msk.bf16.vlgmr.msra.gmra.mrb[16].mxu1 %vm226_vm2, %v2749_v50  ;;  %v3257_v50 = vmov 1966171168  }
  0xc3   : > { %2949 = vmatpush3.bf16.msra.mxu0 %v940_v51  ;;  %2971 = vmatpush3.bf16.msra.mxu1 %v1233_v52  ;;  %v389_v51 = vunpack.c.l.s4 %v3257_v50 }
  0xc4   : > { %2962 = vmatprep.subr.bf16.mxu0 %v3252_v0  ;;  %2972 = vmatprep.subr.bf16.mxu1 %v3252_v0 }
  0xc5   : > { %2974 = vmatprep.mubr.msk.bf16.mxu1 %vm3253_vm0, %v3252_v0  ;;  %v1737_v3 = vpop.permute.xlu1 %1736  ;;  %v1535_v4 = vpop.permute.xlu0 %1534 }
  0xc6   : > { %2951 = vmatmul.mubr.msk.bf16.vlgmr.msra.gmra.mrb[16].mxu0 %vm226_vm2, %v2743_v54  ;;  %v1743_v6 = vsel %vm230_vm1, %v1737_v3, 0  ;;  %v1541_v8 = vsel %vm230_vm1, %v1535_v4, 0  ;;  %v3258_v4 = vmov 286326784  }
  0xc7   : > { %2963 = vmatpush3.bf16.msra.mxu0 %v3398_v9  ;;  %2973 = vmatpush3.bf16.msra.mxu1 %v1241_v55 }
  0xc8   : > { %2964 = vmatprep.subr.bf16.mxu0 %v3252_v0  ;;  %2966 = vmatprep.mubr.msk.bf16.mxu0 %vm3253_vm0, %v3252_v0 }
  0xc9   : > { %2986 = vmatprep.subr.bf16.mxu1 %v3252_v0  ;;  %v1834_v9 = vpop.permute.xlu0 %1833  ;;  %v1836_v10 = vpop.permute.xlu1 %1835 }
  0xca   : > { %2975 = vmatmul.mubr.msk.bf16.vlgmr.msra.gmra.mrb[20].mxu1 %vm226_vm2, %v2754_v57  ;;  %v1842_v12 = vsel %vm230_vm1, %v1836_v10, 0  ;;  %v204_v57 = vstv %s198_s13 }
  0xcb   : > { %2965 = vmatpush3.bf16.msra.mxu0 %v1189_v58  ;;  %2987 = vmatpush3.bf16.msra.mxu1 %v3416_v11  ;;  %v2765_v11 = vld [vmem:[%s4197_s2 + $0x8] sm:$0xf]  ;;  %vm3693_vm3 = vcmp.lt.s32.totalorder %v200_v56, %v204_v57 }
  0xcc   : > { %2978 = vmatprep.subr.bf16.mxu0 %v3252_v0  ;;  %2988 = vmatprep.subr.bf16.mxu1 %v3252_v0 }
  0xcd   : > { %2990 = vmatprep.mubr.msk.bf16.mxu1 %vm3253_vm0, %v3252_v0  ;;  %v2037_v19 = vpop.permute.xlu1 %2036  ;;  %v2035_v22 = vpop.permute.xlu0 %2034 }
  0xce   : > { %2967 = vmatmul.mubr.msk.bf16.vlgmr.msra.gmra.mrb[20].mxu0 %vm226_vm2, %v1123_v60  ;;  %v2043_v25 = vsel %vm230_vm1, %v2037_v19, 0  ;;  %v390_v60 = vunpack.c.0.s8 %v389_v51 }
  0xcf   : > { %2979 = vmatpush3.bf16.msra.mxu0 %v1434_v59  ;;  %2989 = vmatpush3.bf16.msra.mxu1 %v1489_v62 }
  0xd0   : > { %2980 = vmatprep.subr.bf16.mxu0 %v3252_v0  ;;  %2982 = vmatprep.mubr.msk.bf16.mxu0 %vm3253_vm0, %v3252_v0 }
  0xd1   : > { %3002 = vmatprep.subr.bf16.mxu1 %v3252_v0  ;;  %v2336_v23 = vpop.permute.xlu1 %2335  ;;  %v2134_v24 = vpop.permute.xlu0 %2133 }
  0xd2   : > { %2991 = vmatmul.mubr.msk.bf16.vlgmr.msra.gmra.mrb[24].mxu1 %vm226_vm2, %v1423_v1 }
  0xd3   : > { %2981 = vmatpush3.bf16.msra.mxu0 %v1442_v2  ;;  %3003 = vmatpush3.bf16.msra.mxu1 %v1735_v61  ;;  %v392_v61 = vshrl.u32 %v199_v46, 7  ;;  %v501_v46 = vld [vmem:[%s3716_s16 + $0x8] sm:$0x1]  ;;  %v2298_v2 = vld [vmem:[%s3716_s16] sm:$0x8] }
  0xd4   : > { %2994 = vmatprep.subr.bf16.mxu0 %v3252_v0  ;;  %3004 = vmatprep.subr.bf16.mxu1 %v3252_v0 }
  0xd5   : > { %3006 = vmatprep.mubr.msk.bf16.mxu1 %vm3253_vm0, %v3252_v0  ;;  %v2338_v16 = vpop.permute.xlu1 %2337  ;;  %v2136_v26 = vpop.permute.xlu0 %2135 }
  0xd6   : > { %2983 = vmatmul.mubr.msk.bf16.vlgmr.msra.gmra.mrb[24].mxu0 %vm226_vm2, %v2760_v5  ;;  %v2344_v28 = vsel %vm230_vm1, %v2338_v16, 0  ;;  %v2142_v30 = vsel %vm230_vm1, %v2136_v26, 0  ;;  %v429_v5 = vunpack.c.l.s4 %v3258_v4 }
  0xd7   : > { %2995 = vmatpush3.bf16.msra.mxu0 %v1533_v63  ;;  %3005 = vmatpush3.bf16.msra.mxu1 %v1743_v6 }
  0xd8   : > { %2996 = vmatprep.subr.bf16.mxu0 %v3252_v0  ;;  %2998 = vmatprep.mubr.msk.bf16.mxu0 %vm3253_vm0, %v3252_v0 }
  0xd9   : > { %3018 = vmatprep.subr.bf16.mxu1 %v3252_v0  ;;  %v2435_v31 = vpop.permute.xlu0 %2434  ;;  %v2437_v32 = vpop.permute.xlu1 %2436 }
  0xda   : > { %3007 = vmatmul.mubr.msk.bf16.vlgmr.msra.gmra.mrb[28].mxu1 %vm226_vm2, %v2771_v7  ;;  %v2443_v34 = vsel %vm230_vm1, %v2437_v32, 0  ;;  %vm3940_vm1 = vmand %vm1694_vm14, %vm1695_vm15 }
  0xdb   : > { %2997 = vmatpush3.bf16.msra.mxu0 %v1541_v8  ;;  %3019 = vmatpush3.bf16.msra.mxu1 %v1834_v9  ;;  %v3697_v8 = vsub.s32 %v390_v60, %v392_v61 }
  0xdc   : > { %3010 = vmatprep.subr.bf16.mxu0 %v3252_v0  ;;  %3020 = vmatprep.subr.bf16.mxu1 %v3252_v0 }
  0xdd   : > { %3022 = vmatprep.mubr.msk.bf16.mxu1 %vm3253_vm0, %v3252_v0 }
  0xde   : > { %2999 = vmatmul.mubr.msk.bf16.vlgmr.msra.gmra.mrb[28].mxu0 %vm226_vm2, %v2765_v11 }
  0xdf   : > { %3011 = vmatpush3.bf16.msra.mxu0 %v3426_v13  ;;  %3021 = vmatpush3.bf16.msra.mxu1 %v1842_v12  ;;  %v1724_v13 = vld [vmem:[%s4197_s2] sm:$0xf] }
  0xe0   : > { %3012 = vmatprep.subr.bf16.mxu0 %v3252_v0  ;;  %3014 = vmatprep.mubr.msk.bf16.mxu0 %vm3253_vm0, %v3252_v0 }
  0xe1   : > { %3034 = vmatprep.subr.bf16.mxu1 %v3252_v0 }
  0xe2   : > { %3023 = vmatmul.mubr.msk.bf16.vlgmr.msra.gmra.mrb[32].mxu1 %vm226_vm2, %v2776_v20 }
  0xe3   : > { %3013 = vmatpush3.bf16.msra.mxu0 %v1790_v21  ;;  %3035 = vmatpush3.bf16.msra.mxu1 %v3444_v15  ;;  %v2024_v15 = vld [vmem:[%s4197_s2] sm:$0xf]  ;;  %v430_v21 = vunpack.c.0.s8 %v429_v5 }
  0xe4   : > { %3026 = vmatprep.subr.bf16.mxu0 %v3252_v0  ;;  %3036 = vmatprep.subr.bf16.mxu1 %v3252_v0 }
  0xe5   : > { %3038 = vmatprep.mubr.msk.bf16.mxu1 %vm3253_vm0, %v3252_v0 }
  0xe6   : > { %3015 = vmatmul.mubr.msk.bf16.vlgmr.msra.gmra.mrb[32].mxu0 %vm226_vm2, %v1724_v13 }
  0xe7   : > { %3027 = vmatpush3.bf16.msra.mxu0 %v2035_v22  ;;  %3037 = vmatpush3.bf16.msra.mxu1 %v2090_v14 }
  0xe8   : > { %3028 = vmatprep.subr.bf16.mxu0 %v3252_v0  ;;  %3030 = vmatprep.mubr.msk.bf16.mxu0 %vm3253_vm0, %v3252_v0 }
  0xe9   : > { %3050 = vmatprep.subr.bf16.mxu1 %v3252_v0 }
  0xea   : > { %3039 = vmatmul.mubr.msk.bf16.vlgmr.msra.gmra.mrb[36].mxu1 %vm226_vm2, %v2024_v15  ;;  %v3690_v52 = vpop.permute.xlu0 %377 }
  0xeb   : > { %3029 = vmatpush3.bf16.msra.mxu0 %v2043_v25  ;;  %3051 = vmatpush3.bf16.msra.mxu1 %v2336_v23 }
  0xec   : > { %3042 = vmatprep.subr.bf16.mxu0 %v3252_v0  ;;  %3052 = vmatprep.subr.bf16.mxu1 %v3252_v0 }
  0xed   : > { %3054 = vmatprep.mubr.msk.bf16.mxu1 %vm3253_vm0, %v3252_v0 }
  0xee   : > { %3031 = vmatmul.mubr.msk.bf16.vlgmr.msra.gmra.mrb[36].mxu0 %vm226_vm2, %v2782_v27  ;;  %v3707_v27 = vsub.s32 %v430_v21, %v392_v61  ;;  %v510_v61 = vld [vmem:[%s3716_s16 + $0x14] sm:$0x1] }
  0xef   : > { %3043 = vmatpush3.bf16.msra.mxu0 %v2134_v24  ;;  %3053 = vmatpush3.bf16.msra.mxu1 %v2344_v28 }
  0xf0   : > { %3044 = vmatprep.subr.bf16.mxu0 %v3252_v0  ;;  %3046 = vmatprep.mubr.msk.bf16.mxu0 %vm3253_vm0, %v3252_v0 }
  0xf1   : > { %3066 = vmatprep.subr.bf16.mxu1 %v3252_v0 }
  0xf2   : > { %3055 = vmatmul.mubr.msk.bf16.vlgmr.msra.gmra.mrb[40].mxu1 %vm226_vm2, %v2793_v29 }
  0xf3   : > { %3045 = vmatpush3.bf16.msra.mxu0 %v2142_v30  ;;  %3067 = vmatpush3.bf16.msra.mxu1 %v2435_v31 }
  0xf4   : > { %3058 = vmatprep.subr.bf16.mxu0 %v3252_v0  ;;  %3068 = vmatprep.subr.bf16.mxu1 %v3252_v0 }
  0xf5   : > { %3070 = vmatprep.mubr.msk.bf16.mxu1 %vm3253_vm0, %v3252_v0 }
  0xf6   : > { %3047 = vmatmul.mubr.msk.bf16.vlgmr.msra.gmra.mrb[40].mxu0 %vm226_vm2, %v2787_v33 }
  0xf7   : > { %3059 = vmatpush3.bf16.msra.mxu0 %v3454_v17  ;;  %3069 = vmatpush3.bf16.msra.mxu1 %v2443_v34  ;;  %v2325_v17 = vld [vmem:[%s4197_s2] sm:$0xf] }
  0xf8   : > { %3060 = vmatprep.subr.bf16.mxu0 %v3252_v0  ;;  %3062 = vmatprep.mubr.msk.bf16.mxu0 %vm3253_vm0, %v3252_v0  ;;  %vm1995_vm0 = vsmask.f32 7946 }
  0xfa   : > { %3071 = vmatmul.mubr.msk.bf16.vlgmr.msra.gmra.mrb[44].mxu1 %vm226_vm2, %v2798_v35 }
  0xfb   : > { %3061 = vmatpush3.bf16.msra.mxu0 %v2391_v36 }
  0xfe   : > { %3063 = vmatmul.mubr.msk.bf16.vlgmr.msra.gmra.mrb[44].mxu0 %vm226_vm2, %v2325_v17  ;;  %vm3992_vm2 = vmand %vm1694_vm14, %vm1995_vm0 }
 0x107   : > { %v315_v37 = vpop.f32.mrb[0].mxu1 }
 0x108   : > { %v2896_v38 = vpop.f32.mrb[1].mxu1 }
 0x109   : > { %v318_v39 = vpop.f32.mrb[2].mxu1 }
 0x10a   : > { %v2897_v40 = vpop.f32.mrb[3].mxu1 }
 0x179   : > { %v268_v41 = vpop.f32.mrb[0].mxu0 }
 0x17a   : > { %v316_v42 = vadd.f32 %v315_v37, %v268_v41  ;;  %v2888_v43 = vpop.f32.mrb[1].mxu0 }
 0x17b   : > { %v271_v18 = vpop.f32.mrb[2].mxu0 }
 0x17c   : > { %v2889_v44 = vpop.f32.mrb[3].mxu0 }
 0x17d   : > { %v577_v0 = vpop.f32.mrb[4].mxu1 }
 0x17e   : > { %v2912_v45 = vpop.f32.mrb[5].mxu1 }
 0x17f   : > { %v580_v47 = vpop.f32.mrb[6].mxu1  ;;  %v498_v45 = vld [vmem:[%s3716_s16 + $0x4] sm:$0x1] }
 0x180   : > { %v2913_v48 = vpop.f32.mrb[7].mxu1 }
 0x181   : > { %v368_v49 = vpop.f32.mrb[4].mxu0 }
 0x182   : > { %v374_v53 = vadd.f32 %v368_v49, %v316_v42  ;;  %v2904_v54 = vpop.f32.mrb[5].mxu0  ;;  %v495_v42 = vld [vmem:[%s3716_s16] sm:$0x1] }
 0x183   : > { %v371_v55 = vpop.f32.mrb[6].mxu0  ;;  %v504_v54 = vld [vmem:[%s3716_s16 + $0xc] sm:$0x1] }
 0x184   : > { %v380_v58 = vadd.f32 %v3690_v52, %v374_v53  ;;  %v2905_v59 = vpop.f32.mrb[7].mxu0  ;;  %v507_v55 = vld [vmem:[%s3716_s16 + $0x10] sm:$0x1] }
 0x185   : > { %v676_v62 = vpop.f32.mrb[8].mxu1 }
 0x186   : > { %v381_v63 = vmax.f32 %v380_v58, 0.0  ;;  %v2928_v1 = vpop.f32.mrb[9].mxu1 }
 0x187   : > { %v679_v3 = vpop.f32.mrb[10].mxu1 }
 0x188   : > { %v382_v6 = vmin.f32 %v381_v63, 20.0  ;;  %v2929_v7 = vpop.f32.mrb[11].mxu1 }
 0x189   : > { %v624_v9 = vpop.f32.mrb[8].mxu0 }
 0x18a   : > { %v385_v10 = vsel %vm3693_vm3, %v382_v6, 0.0  ;;  %v625_v11 = vadd.f32 %v624_v9, %v577_v0  ;;  %v2920_v12 = vpop.f32.mrb[9].mxu0 }
 0x18b   : > { %v386_v19 = vpack.c.bf16 %v385_v10, %v385_v10  ;;  %v627_v20 = vpop.f32.mrb[10].mxu0 }
 0x18c   : > { %v682_v22 = vadd.f32 %v676_v62, %v625_v11  ;;  %v2921_v13 = vpop.f32.mrb[11].mxu0  ;;  %v513_v62 = vld [vmem:[%s3716_s16 + $0x18] sm:$0x1]  ;;  %v516_v11 = vld [vmem:[%s3716_s16 + $0x1c] sm:$0x1] }
 0x18d   : > { %v394_v23 = vrot.slane %v386_v19, %v3697_v8  ;;  %v924_v14 = vpop.f32.mrb[12].mxu1 }
 0x18e   : > { %v683_v24 = vadd.f32 %v682_v22, %v3690_v52  ;;  %v2944_v15 = vpop.f32.mrb[13].mxu1 }
 0x18f   : > { %v395_v25 = vcombine.high %v394_v23, %v394_v23  ;;  %v402_v16 = vrot.slane %v394_v23, %v3697_v8  ;;  %v927_v26 = vpop.f32.mrb[14].mxu1 }
 0x190   : > { %v684_v28 = vmax.f32 %v683_v24, 0.0  ;;  %v2945_v29 = vpop.f32.mrb[15].mxu1 }
 0x191   : > { %v409_v30 = vrot.slane %v395_v25, %v3697_v8  ;;  %v410_v31 = vcombine.high %v402_v16, %v402_v16  ;;  %v413_v32 = vunpack.i.h.s16 %v402_v16  ;;  %v2723_v33 = vpack.i.b16 %v402_v16, %v402_v16  ;;  %v877_v34 = vpop.f32.mrb[12].mxu0 }
 0x192   : > { %v685_v35 = vmin.f32 %v684_v28, 20.0  ;;  %v925_v36 = vadd.f32 %v924_v14, %v877_v34  ;;  %v2936_v17 = vpop.f32.mrb[13].mxu0 }
 0x193   : > { %v411_v37 = vcombine.high %v409_v30, %v409_v30  ;;  %v415_v38 = vunpack.i.h.s16 %v409_v30  ;;  %v417_v39 = vunpack.i.h.s16 %v410_v31  ;;  %v421_v40 = vpack.i.b16 %v413_v32, %v413_v32  ;;  %v880_v43 = vpop.f32.mrb[14].mxu0 }
 0x194   : > { %v2724_v18 = vpack.i.b16 %v409_v30, %v409_v30  ;;  %v2725_v44 = vpack.i.b16 %v410_v31, %v410_v31  ;;  %v434_v0 = vrot.slane %v2723_v33, %v3707_v27  ;;  %v686_v47 = vsel %vm3693_vm3, %v685_v35, 0.0  ;;  %v2937_v48 = vpop.f32.mrb[15].mxu0 }
 0x195   : > { %v419_v49 = vunpack.i.h.s16 %v411_v37  ;;  %v423_v50 = vpack.i.b16 %v415_v38, %v415_v38  ;;  %v425_v51 = vpack.i.b16 %v417_v39, %v417_v39  ;;  %v2726_v53 = vpack.i.b16 %v411_v37, %v411_v37  ;;  %v3726_v56 = vpop.f32.mrb[16].mxu1 }
 0x196   : > { %v441_v57 = vrot.slane %v421_v40, %v3707_v27  ;;  %v448_v58 = vrot.slane %v2724_v18, %v3707_v27  ;;  %v462_v59 = vrot.slane %v2725_v44, %v3707_v27  ;;  %v496_v60 = vsel %vm3712_vm6, %v434_v0, %v495_v42  ;;  %v2960_v63 = vpop.f32.mrb[17].mxu1 }
 0x197   : > { %v427_v1 = vpack.i.b16 %v419_v49, %v419_v49  ;;  %v455_v3 = vrot.slane %v423_v50, %v3707_v27  ;;  %v469_v4 = vrot.slane %v425_v51, %v3707_v27  ;;  %v476_v5 = vrot.slane %v2726_v53, %v3707_v27  ;;  %497 = vst [vmem:[%s3716_s16] sm:$0x1] %v496_v60  ;;  %v1181_v6 = vpop.f32.mrb[18].mxu1 }
 0x198   : > { %v499_v7 = vsel %vm3712_vm6, %v441_v57, %v498_v45  ;;  %v502_v9 = vsel %vm3712_vm6, %v448_v58, %v501_v46  ;;  %v508_v10 = vsel %vm3712_vm6, %v462_v59, %v507_v55  ;;  %v687_v12 = vpack.c.bf16 %v686_v47, %v686_v47  ;;  %v2961_v19 = vpop.f32.mrb[19].mxu1 }
 0x199   : > { %v483_v20 = vrot.slane %v427_v1, %v3707_v27  ;;  %500 = vst [vmem:[%s3716_s16 + $0x4] sm:$0x1] %v499_v7  ;;  %503 = vst [vmem:[%s3716_s16 + $0x8] sm:$0x1] %v502_v9  ;;  %v505_v21 = vsel %vm3712_vm6, %v455_v3, %v504_v54  ;;  %v511_v22 = vsel %vm3712_vm6, %v469_v4, %v510_v61  ;;  %v976_v23 = vpop.f32.mrb[16].mxu0 }
 0x19a   : > { %509 = vst [vmem:[%s3716_s16 + $0x10] sm:$0x1] %v508_v10  ;;  %v514_v13 = vsel %vm3712_vm6, %v476_v5, %v513_v62  ;;  %506 = vst [vmem:[%s3716_s16 + $0xc] sm:$0x1] %v505_v21  ;;  %v695_v14 = vrot.slane %v687_v12, %v3697_v8  ;;  %v982_v24 = vadd.f32 %v976_v23, %v925_v36  ;;  %v2952_v15 = vpop.f32.mrb[17].mxu0 }
 0x19b   : > { %512 = vst [vmem:[%s3716_s16 + $0x14] sm:$0x1] %v511_v22  ;;  %515 = vst [vmem:[%s3716_s16 + $0x18] sm:$0x1] %v514_v13  ;;  %v517_v25 = vsel %vm3712_vm6, %v483_v20, %v516_v11  ;;  %v979_v16 = vpop.f32.mrb[18].mxu0 }
 0x19c   : > { %518 = vst [vmem:[%s3716_s16 + $0x1c] sm:$0x1] %v517_v25  ;;  %v696_v26 = vcombine.high %v695_v14, %v695_v14  ;;  %v703_v28 = vrot.slane %v695_v14, %v3697_v8  ;;  %v2953_v29 = vpop.f32.mrb[19].mxu0  ;;  %v983_v30 = vadd.f32 %v982_v24, %v3690_v52  ;;  %vm4046_vm6 = vmand %vm2295_vm4, %vm2296_vm5 }
 0x19d   : > { %v3765_v31 = vpop.f32.mrb[20].mxu1 }
 0x19e   : > { %v710_v32 = vrot.slane %v696_v26, %v3697_v8  ;;  %v711_v33 = vcombine.high %v703_v28, %v703_v28  ;;  %v714_v34 = vunpack.i.h.s16 %v703_v28  ;;  %v2734_v35 = vpack.i.b16 %v703_v28, %v703_v28  ;;  %v2976_v36 = vpop.f32.mrb[21].mxu1  ;;  %v795_v42 = vld [vmem:[%s3716_s16] sm:$0x1] }
 0x19f   : > { %v1280_v17 = vpop.f32.mrb[22].mxu1  ;;  %v984_v46 = vmax.f32 %v983_v30, 0.0 }
 0x1a0   : > { %v712_v37 = vcombine.high %v710_v32, %v710_v32  ;;  %v716_v38 = vunpack.i.h.s16 %v710_v32  ;;  %v718_v39 = vunpack.i.h.s16 %v711_v33  ;;  %v722_v40 = vpack.i.b16 %v714_v34, %v714_v34  ;;  %v798_v0 = vld [vmem:[%s3716_s16 + $0x4] sm:$0x1]  ;;  %v801_v45 = vld [vmem:[%s3716_s16 + $0x8] sm:$0x1]  ;;  %v2977_v55 = vpop.f32.mrb[23].mxu1 }
 0x1a1   : > { %v2735_v43 = vpack.i.b16 %v710_v32, %v710_v32  ;;  %v2736_v18 = vpack.i.b16 %v711_v33, %v711_v33  ;;  %v735_v44 = vrot.slane %v2734_v35, %v3707_v27  ;;  %v804_v51 = vld [vmem:[%s3716_s16 + $0xc] sm:$0x1]  ;;  %v807_v53 = vld [vmem:[%s3716_s16 + $0x10] sm:$0x1]  ;;  %v1225_v54 = vpop.f32.mrb[20].mxu0  ;;  %v985_v12 = vmin.f32 %v984_v46, 20.0 }
 0x1a2   : > { %v720_v47 = vunpack.i.h.s16 %v712_v37  ;;  %v724_v48 = vpack.i.b16 %v716_v38, %v716_v38  ;;  %v726_v49 = vpack.i.b16 %v718_v39, %v718_v39  ;;  %v2737_v50 = vpack.i.b16 %v712_v37, %v712_v37  ;;  %v810_v61 = vld [vmem:[%s3716_s16 + $0x14] sm:$0x1]  ;;  %v813_v62 = vld [vmem:[%s3716_s16 + $0x18] sm:$0x1]  ;;  %v2968_v63 = vpop.f32.mrb[21].mxu0 }
 0x1a3   : > { %v742_v57 = vrot.slane %v722_v40, %v3707_v27  ;;  %v749_v58 = vrot.slane %v2735_v43, %v3707_v27  ;;  %v763_v59 = vrot.slane %v2736_v18, %v3707_v27  ;;  %v796_v60 = vsel %vm3769_vm8, %v735_v44, %v795_v42  ;;  %v1228_v6 = vpop.f32.mrb[22].mxu0  ;;  %v816_v11 = vld [vmem:[%s3716_s16 + $0x1c] sm:$0x1]  ;;  %v1099_v55 = vld [vmem:[%s3716_s16 + $0x4] sm:$0x2] }
 0x1a4   : > { %v728_v1 = vpack.i.b16 %v720_v47, %v720_v47  ;;  %v756_v3 = vrot.slane %v724_v48, %v3707_v27  ;;  %v770_v4 = vrot.slane %v726_v49, %v3707_v27  ;;  %v777_v5 = vrot.slane %v2737_v50, %v3707_v27  ;;  %797 = vst [vmem:[%s3716_s16] sm:$0x1] %v796_v60  ;;  %v2969_v19 = vpop.f32.mrb[23].mxu0  ;;  %v1096_v49 = vld [vmem:[%s3716_s16] sm:$0x2] }
 0x1a5   : > { %v799_v7 = vsel %vm3769_vm8, %v742_v57, %v798_v0  ;;  %v802_v9 = vsel %vm3769_vm8, %v749_v58, %v801_v45  ;;  %v808_v10 = vsel %vm3769_vm8, %v763_v59, %v807_v53  ;;  %v1525_v20 = vpop.f32.mrb[24].mxu1  ;;  %v986_v24 = vsel %vm3693_vm3, %v985_v12, 0.0  ;;  %v1102_v57 = vld [vmem:[%s3716_s16 + $0x8] sm:$0x2] }
 0x1a6   : > { %v784_v21 = vrot.slane %v728_v1, %v3707_v27  ;;  %800 = vst [vmem:[%s3716_s16 + $0x4] sm:$0x1] %v799_v7  ;;  %803 = vst [vmem:[%s3716_s16 + $0x8] sm:$0x1] %v802_v9  ;;  %v805_v22 = vsel %vm3769_vm8, %v756_v3, %v804_v51  ;;  %v811_v13 = vsel %vm3769_vm8, %v770_v4, %v810_v61  ;;  %v2992_v14 = vpop.f32.mrb[25].mxu1 }
 0x1a7   : > { %809 = vst [vmem:[%s3716_s16 + $0x10] sm:$0x1] %v808_v10  ;;  %v814_v23 = vsel %vm3769_vm8, %v777_v5, %v813_v62  ;;  %806 = vst [vmem:[%s3716_s16 + $0xc] sm:$0x1] %v805_v22  ;;  %v1226_v15 = vadd.f32 %v1225_v54, %v3726_v56  ;;  %v1528_v25 = vpop.f32.mrb[26].mxu1  ;;  %v987_v26 = vpack.c.bf16 %v986_v24, %v986_v24 }
 0x1a8   : > { %812 = vst [vmem:[%s3716_s16 + $0x14] sm:$0x1] %v811_v13  ;;  %815 = vst [vmem:[%s3716_s16 + $0x18] sm:$0x1] %v814_v23  ;;  %v817_v16 = vsel %vm3769_vm8, %v784_v21, %v816_v11  ;;  %v2993_v28 = vpop.f32.mrb[27].mxu1 }
 0x1a9   : > { %818 = vst [vmem:[%s3716_s16 + $0x1c] sm:$0x1] %v817_v16  ;;  %v1283_v29 = vadd.f32 %v3765_v31, %v1226_v15  ;;  %v1478_v30 = vpop.f32.mrb[24].mxu0  ;;  %v995_v32 = vrot.slane %v987_v26, %v3697_v8  ;;  %v1105_v1 = vld [vmem:[%s3716_s16 + $0xc] sm:$0x2] }
 0x1aa   : > { %v3818_v33 = vadd.f32 %v1525_v20, %v1478_v30  ;;  %v2984_v34 = vpop.f32.mrb[25].mxu0  ;;  %v1108_v3 = vld [vmem:[%s3716_s16 + $0x10] sm:$0x2]  ;;  %v1111_v10 = vld [vmem:[%s3716_s16 + $0x14] sm:$0x2] }
 0x1ab   : > { %v1284_v35 = vadd.f32 %v1283_v29, %v3690_v52  ;;  %v1481_v36 = vpop.f32.mrb[26].mxu0  ;;  %v996_v17 = vcombine.high %v995_v32, %v995_v32  ;;  %v1003_v56 = vrot.slane %v995_v32, %v3697_v8  ;;  %v1114_v11 = vld [vmem:[%s3716_s16 + $0x18] sm:$0x2]  ;;  %v1117_v15 = vld [vmem:[%s3716_s16 + $0x1c] sm:$0x2] }
 0x1ac   : > { %v2985_v37 = vpop.f32.mrb[27].mxu0 }
 0x1ad   : > { %v1285_v38 = vmax.f32 %v1284_v35, 0.0  ;;  %v3822_v39 = vpop.f32.mrb[28].mxu1  ;;  %v1010_v31 = vrot.slane %v996_v17, %v3697_v8  ;;  %v1011_v40 = vcombine.high %v1003_v56, %v1003_v56  ;;  %v1014_v41 = vunpack.i.h.s16 %v1003_v56 }
 0x1ae   : > { %v2745_v42 = vpack.i.b16 %v1003_v56, %v1003_v56  ;;  %v3008_v43 = vpop.f32.mrb[29].mxu1 }
 0x1af   : > { %v1286_v18 = vmin.f32 %v1285_v38, 20.0  ;;  %v1782_v44 = vpop.f32.mrb[30].mxu1  ;;  %v1012_v0 = vcombine.high %v1010_v31, %v1010_v31  ;;  %v1016_v45 = vunpack.i.h.s16 %v1010_v31  ;;  %v1018_v46 = vunpack.i.h.s16 %v1011_v40 }
 0x1b0   : > { %v1022_v47 = vpack.i.b16 %v1014_v41, %v1014_v41  ;;  %v3009_v50 = vpop.f32.mrb[31].mxu1  ;;  %v2746_v51 = vpack.i.b16 %v1010_v31, %v1010_v31  ;;  %v2747_v53 = vpack.i.b16 %v1011_v40, %v1011_v40  ;;  %v1035_v54 = vrot.slane %v2745_v42, %v3707_v27 }
 0x1b1   : > { %v1287_v58 = vsel %vm3693_vm3, %v1286_v18, 0.0  ;;  %v1577_v59 = vpop.f32.mrb[28].mxu0  ;;  %v1020_v60 = vunpack.i.h.s16 %v1012_v0  ;;  %v1024_v61 = vpack.i.b16 %v1016_v45, %v1016_v45  ;;  %v1026_v62 = vpack.i.b16 %v1018_v46, %v1018_v46 }
 0x1b2   : > { %v2748_v63 = vpack.i.b16 %v1012_v0, %v1012_v0  ;;  %v3000_v4 = vpop.f32.mrb[29].mxu0  ;;  %v1042_v5 = vrot.slane %v1022_v47, %v3707_v27  ;;  %v1049_v6 = vrot.slane %v2746_v51, %v3707_v27  ;;  %v1063_v7 = vrot.slane %v2747_v53, %v3707_v27 }
 0x1b3   : > { %v1097_v9 = vsel %vm3826_vm11, %v1035_v54, %v1096_v49  ;;  %v1580_v12 = vpop.f32.mrb[30].mxu0  ;;  %v1028_v19 = vpack.i.b16 %v1020_v60, %v1020_v60  ;;  %v1056_v20 = vrot.slane %v1024_v61, %v3707_v27  ;;  %v1070_v21 = vrot.slane %v1026_v62, %v3707_v27 }
 0x1b4   : > { %v1077_v22 = vrot.slane %v2748_v63, %v3707_v27  ;;  %1098 = vst [vmem:[%s3716_s16] sm:$0x2] %v1097_v9  ;;  %v3001_v13 = vpop.f32.mrb[31].mxu0  ;;  %v1100_v23 = vsel %vm3826_vm11, %v1042_v5, %v1099_v55  ;;  %v1103_v14 = vsel %vm3826_vm11, %v1049_v6, %v1102_v57  ;;  %v1109_v24 = vsel %vm3826_vm11, %v1063_v7, %v1108_v3 }
 0x1b5   : > { %v1288_v25 = vpack.c.bf16 %v1287_v58, %v1287_v58  ;;  %v1878_v16 = vpop.f32.mrb[32].mxu1  ;;  %v1084_v26 = vrot.slane %v1028_v19, %v3707_v27  ;;  %1101 = vst [vmem:[%s3716_s16 + $0x4] sm:$0x2] %v1100_v23  ;;  %1104 = vst [vmem:[%s3716_s16 + $0x8] sm:$0x2] %v1103_v14  ;;  %v1106_v28 = vsel %vm3826_vm11, %v1056_v20, %v1105_v1 }
 0x1b6   : > { %1110 = vst [vmem:[%s3716_s16 + $0x10] sm:$0x2] %v1109_v24  ;;  %v1112_v29 = vsel %vm3826_vm11, %v1070_v21, %v1111_v10  ;;  %v1115_v30 = vsel %vm3826_vm11, %v1077_v22, %v1114_v11  ;;  %v3024_v32 = vpop.f32.mrb[33].mxu1  ;;  %1107 = vst [vmem:[%s3716_s16 + $0xc] sm:$0x2] %v1106_v28  ;;  %v1583_v35 = vadd.f32 %v1577_v59, %v3818_v33 }
 0x1b7   : > { %1113 = vst [vmem:[%s3716_s16 + $0x14] sm:$0x2] %v1112_v29  ;;  %1116 = vst [vmem:[%s3716_s16 + $0x18] sm:$0x2] %v1115_v30  ;;  %v1296_v34 = vrot.slane %v1288_v25, %v3697_v8  ;;  %v1881_v36 = vpop.f32.mrb[34].mxu1  ;;  %v1118_v17 = vsel %vm3826_vm11, %v1084_v26, %v1117_v15 }
 0x1b8   : > { %v3025_v56 = vpop.f32.mrb[35].mxu1  ;;  %1119 = vst [vmem:[%s3716_s16 + $0x1c] sm:$0x2] %v1118_v17  ;;  %v1584_v31 = vadd.f32 %v1583_v35, %v3690_v52 }
 0x1b9   : > { %v1297_v37 = vcombine.high %v1296_v34, %v1296_v34  ;;  %v1304_v38 = vrot.slane %v1296_v34, %v3697_v8  ;;  %v1826_v40 = vpop.f32.mrb[32].mxu0 }
 0x1ba   : > { %v1827_v41 = vadd.f32 %v1826_v40, %v3822_v39  ;;  %v3016_v42 = vpop.f32.mrb[33].mxu0  ;;  %v1585_v45 = vmax.f32 %v1584_v31, 0.0 }
 0x1bb   : > { %v1311_v43 = vrot.slane %v1297_v37, %v3697_v8  ;;  %v1312_v33 = vcombine.high %v1304_v38, %v1304_v38  ;;  %v1315_v18 = vunpack.i.h.s16 %v1304_v38  ;;  %v2756_v44 = vpack.i.b16 %v1304_v38, %v1304_v38  ;;  %v1829_v0 = vpop.f32.mrb[34].mxu0  ;;  %v1396_v53 = vld [vmem:[%s3716_s16] sm:$0x2] }
 0x1bc   : > { %v1884_v46 = vadd.f32 %v1878_v16, %v1827_v41  ;;  %v3017_v47 = vpop.f32.mrb[35].mxu0  ;;  %v1399_v58 = vld [vmem:[%s3716_s16 + $0x4] sm:$0x2]  ;;  %v1402_v59 = vld [vmem:[%s3716_s16 + $0x8] sm:$0x2]  ;;  %v1586_v26 = vmin.f32 %v1585_v45, 20.0 }
 0x1bd   : > { %v1313_v48 = vcombine.high %v1311_v43, %v1311_v43  ;;  %v1317_v49 = vunpack.i.h.s16 %v1311_v43  ;;  %v1319_v50 = vunpack.i.h.s16 %v1312_v33  ;;  %v1323_v51 = vpack.i.b16 %v1315_v18, %v1315_v18  ;;  %v1405_v3 = vld [vmem:[%s3716_s16 + $0xc] sm:$0x2]  ;;  %v1408_v4 = vld [vmem:[%s3716_s16 + $0x10] sm:$0x2]  ;;  %v2126_v5 = vpop.f32.mrb[36].mxu1 }
 0x1be   : > { %v2757_v54 = vpack.i.b16 %v1311_v43, %v1311_v43  ;;  %v2758_v55 = vpack.i.b16 %v1312_v33, %v1312_v33  ;;  %v1336_v57 = vrot.slane %v2756_v44, %v3707_v27  ;;  %v1885_v60 = vadd.f32 %v1884_v46, %v3690_v52  ;;  %v1411_v11 = vld [vmem:[%s3716_s16 + $0x14] sm:$0x2]  ;;  %v1414_v12 = vld [vmem:[%s3716_s16 + $0x18] sm:$0x2]  ;;  %v3040_v19 = vpop.f32.mrb[37].mxu1 }
 0x1bf   : > { %v1321_v61 = vunpack.i.h.s16 %v1313_v48  ;;  %v1325_v62 = vpack.i.b16 %v1317_v49, %v1317_v49  ;;  %v1327_v63 = vpack.i.b16 %v1319_v50, %v1319_v50  ;;  %v2759_v1 = vpack.i.b16 %v1313_v48, %v1313_v48  ;;  %v2129_v14 = vpop.f32.mrb[38].mxu1  ;;  %v1417_v16 = vld [vmem:[%s3716_s16 + $0x1c] sm:$0x2] }
 0x1c0   : > { %v1343_v6 = vrot.slane %v1323_v51, %v3707_v27  ;;  %v1350_v7 = vrot.slane %v2757_v54, %v3707_v27  ;;  %v1364_v9 = vrot.slane %v2758_v55, %v3707_v27  ;;  %v1397_v10 = vsel %vm3880_vm13, %v1336_v57, %v1396_v53  ;;  %v3041_v29 = vpop.f32.mrb[39].mxu1 }
 0x1c1   : > { %v1329_v20 = vpack.i.b16 %v1321_v61, %v1321_v61  ;;  %v1357_v21 = vrot.slane %v1325_v62, %v3707_v27  ;;  %v1371_v22 = vrot.slane %v1327_v63, %v3707_v27  ;;  %v1378_v13 = vrot.slane %v2759_v1, %v3707_v27  ;;  %1398 = vst [vmem:[%s3716_s16] sm:$0x2] %v1397_v10  ;;  %v2079_v23 = vpop.f32.mrb[36].mxu0  ;;  %v1703_v10 = vld [vmem:[%s3716_s16 + $0x8] sm:$0x4] }
 0x1c2   : > { %v1400_v24 = vsel %vm3880_vm13, %v1343_v6, %v1399_v58  ;;  %v1403_v15 = vsel %vm3880_vm13, %v1350_v7, %v1402_v59  ;;  %v1409_v25 = vsel %vm3880_vm13, %v1364_v9, %v1408_v4  ;;  %v3032_v28 = vpop.f32.mrb[37].mxu0  ;;  %v1587_v17 = vsel %vm3693_vm3, %v1586_v26, 0.0  ;;  %v1700_v9 = vld [vmem:[%s3716_s16 + $0x4] sm:$0x4]  ;;  %v1712_v26 = vld [vmem:[%s3716_s16 + $0x14] sm:$0x4] }
 0x1c3   : > { %v1385_v30 = vrot.slane %v1329_v20, %v3707_v27  ;;  %1401 = vst [vmem:[%s3716_s16 + $0x4] sm:$0x2] %v1400_v24  ;;  %1404 = vst [vmem:[%s3716_s16 + $0x8] sm:$0x2] %v1403_v15  ;;  %v1406_v32 = vsel %vm3880_vm13, %v1357_v21, %v1405_v3  ;;  %v1412_v34 = vsel %vm3880_vm13, %v1371_v22, %v1411_v11  ;;  %v2082_v36 = vpop.f32.mrb[38].mxu0  ;;  %v1886_v56 = vmax.f32 %v1885_v60, 0.0 }
 0x1c4   : > { %1410 = vst [vmem:[%s3716_s16 + $0x10] sm:$0x2] %v1409_v25  ;;  %v1415_v35 = vsel %vm3880_vm13, %v1378_v13, %v1414_v12  ;;  %1407 = vst [vmem:[%s3716_s16 + $0xc] sm:$0x2] %v1406_v32  ;;  %v2127_v37 = vadd.f32 %v2126_v5, %v2079_v23  ;;  %v3033_v38 = vpop.f32.mrb[39].mxu0  ;;  %v1588_v40 = vpack.c.bf16 %v1587_v17, %v1587_v17 }
 0x1c5   : > { %1413 = vst [vmem:[%s3716_s16 + $0x14] sm:$0x2] %v1412_v34  ;;  %1416 = vst [vmem:[%s3716_s16 + $0x18] sm:$0x2] %v1415_v35  ;;  %v1418_v31 = vsel %vm3880_vm13, %v1385_v30, %v1417_v16  ;;  %v3926_v41 = vpop.f32.mrb[40].mxu1  ;;  %v1887_v42 = vmin.f32 %v1886_v56, 20.0 }
 0x1c6   : > { %1419 = vst [vmem:[%s3716_s16 + $0x1c] sm:$0x2] %v1418_v31  ;;  %v3056_v43 = vpop.f32.mrb[41].mxu1  ;;  %v1596_v33 = vrot.slane %v1588_v40, %v3697_v8  ;;  %v1697_v3 = vld [vmem:[%s3716_s16] sm:$0x4] }
 0x1c7   : > { %v2383_v18 = vpop.f32.mrb[42].mxu1  ;;  %v1888_v44 = vsel %vm3693_vm3, %v1887_v42, 0.0  ;;  %v1706_v13 = vld [vmem:[%s3716_s16 + $0xc] sm:$0x4]  ;;  %v1709_v23 = vld [vmem:[%s3716_s16 + $0x10] sm:$0x4] }
 0x1c8   : > { %v3057_v0 = vpop.f32.mrb[43].mxu1  ;;  %v1597_v45 = vcombine.high %v1596_v33, %v1596_v33  ;;  %v1604_v46 = vrot.slane %v1596_v33, %v3697_v8  ;;  %v1889_v47 = vpack.c.bf16 %v1888_v44, %v1888_v44  ;;  %v1715_v28 = vld [vmem:[%s3716_s16 + $0x18] sm:$0x4]  ;;  %v1718_v38 = vld [vmem:[%s3716_s16 + $0x1c] sm:$0x4] }
 0x1c9   : > { %v2178_v48 = vpop.f32.mrb[40].mxu0 }
 0x1ca   : > { %v2184_v49 = vadd.f32 %v2178_v48, %v2127_v37  ;;  %v3048_v50 = vpop.f32.mrb[41].mxu0  ;;  %v1611_v51 = vrot.slane %v1597_v45, %v3697_v8  ;;  %v1612_v39 = vcombine.high %v1604_v46, %v1604_v46  ;;  %v1615_v53 = vunpack.i.h.s16 %v1604_v46 }
 0x1cb   : > { %v2767_v54 = vpack.i.b16 %v1604_v46, %v1604_v46  ;;  %v2181_v55 = vpop.f32.mrb[42].mxu0  ;;  %v1897_v57 = vrot.slane %v1889_v47, %v3697_v8 }
 0x1cc   : > { %v3936_v58 = vadd.f32 %v2184_v49, %v3690_v52  ;;  %v3049_v59 = vpop.f32.mrb[43].mxu0  ;;  %v1613_v60 = vcombine.high %v1611_v51, %v1611_v51  ;;  %v1617_v61 = vunpack.i.h.s16 %v1611_v51  ;;  %v1619_v62 = vunpack.i.h.s16 %v1612_v39 }
 0x1cd   : > { %v1623_v63 = vpack.i.b16 %v1615_v53, %v1615_v53  ;;  %v3945_v4 = vpop.f32.mrb[44].mxu1  ;;  %v2768_v5 = vpack.i.b16 %v1611_v51, %v1611_v51  ;;  %v2769_v6 = vpack.i.b16 %v1612_v39, %v1612_v39  ;;  %v1636_v7 = vrot.slane %v2767_v54, %v3707_v27 }
 0x1ce   : > { %v1898_v11 = vcombine.high %v1897_v57, %v1897_v57  ;;  %v3072_v12 = vpop.f32.mrb[45].mxu1  ;;  %v1621_v19 = vunpack.i.h.s16 %v1613_v60  ;;  %v1625_v20 = vpack.i.b16 %v1617_v61, %v1617_v61  ;;  %v1627_v21 = vpack.i.b16 %v1619_v62, %v1619_v62 }
 0x1cf   : > { %v2770_v22 = vpack.i.b16 %v1613_v60, %v1613_v60  ;;  %v2482_v14 = vpop.f32.mrb[46].mxu1  ;;  %v1643_v24 = vrot.slane %v1623_v63, %v3707_v27  ;;  %v1650_v15 = vrot.slane %v2768_v5, %v3707_v27  ;;  %v1664_v25 = vrot.slane %v2769_v6, %v3707_v27 }
 0x1d0   : > { %v1698_v16 = vsel %vm3940_vm1, %v1636_v7, %v1697_v3  ;;  %v3073_v29 = vpop.f32.mrb[47].mxu1  ;;  %v1629_v30 = vpack.i.b16 %v1621_v19, %v1621_v19  ;;  %v1657_v32 = vrot.slane %v1625_v20, %v3707_v27  ;;  %v1671_v34 = vrot.slane %v1627_v21, %v3707_v27 }
 0x1d1   : > { %v1678_v35 = vrot.slane %v2770_v22, %v3707_v27  ;;  %1699 = vst [vmem:[%s3716_s16] sm:$0x4] %v1698_v16  ;;  %v2427_v36 = vpop.f32.mrb[44].mxu0  ;;  %v1701_v17 = vsel %vm3940_vm1, %v1643_v24, %v1700_v9  ;;  %v1704_v56 = vsel %vm3940_vm1, %v1650_v15, %v1703_v10  ;;  %v1710_v37 = vsel %vm3940_vm1, %v1664_v25, %v1709_v23 }
 0x1d2   : > { %v1905_v31 = vrot.slane %v1897_v57, %v3697_v8  ;;  %v3064_v40 = vpop.f32.mrb[45].mxu0  ;;  %v1685_v42 = vrot.slane %v1629_v30, %v3707_v27  ;;  %1702 = vst [vmem:[%s3716_s16 + $0x4] sm:$0x4] %v1701_v17  ;;  %1705 = vst [vmem:[%s3716_s16 + $0x8] sm:$0x4] %v1704_v56  ;;  %v1707_v43 = vsel %vm3940_vm1, %v1657_v32, %v1706_v13  ;;  %v2186_v50 = vmax.f32 %v3936_v58, 0.0 }
 0x1d3   : > { %1711 = vst [vmem:[%s3716_s16 + $0x10] sm:$0x4] %v1710_v37  ;;  %v1713_v33 = vsel %vm3940_vm1, %v1671_v34, %v1712_v26  ;;  %v1716_v18 = vsel %vm3940_vm1, %v1678_v35, %v1715_v28  ;;  %v2430_v44 = vpop.f32.mrb[46].mxu0  ;;  %1708 = vst [vmem:[%s3716_s16 + $0xc] sm:$0x4] %v1707_v43  ;;  %v1912_v0 = vrot.slane %v1898_v11, %v3697_v8 }
 0x1d4   : > { %1714 = vst [vmem:[%s3716_s16 + $0x14] sm:$0x4] %v1713_v33  ;;  %1717 = vst [vmem:[%s3716_s16 + $0x18] sm:$0x4] %v1716_v18  ;;  %v1913_v45 = vcombine.high %v1905_v31, %v1905_v31  ;;  %v1916_v46 = vunpack.i.h.s16 %v1905_v31  ;;  %v2778_v47 = vpack.i.b16 %v1905_v31, %v1905_v31  ;;  %v3065_v48 = vpop.f32.mrb[47].mxu0  ;;  %v1719_v49 = vsel %vm3940_vm1, %v1685_v42, %v1718_v38 }
 0x1d5   : > { %v2428_v51 = vadd.f32 %v2427_v36, %v3926_v41  ;;  %1720 = vst [vmem:[%s3716_s16 + $0x1c] sm:$0x4] %v1719_v49  ;;  %v1914_v39 = vcombine.high %v1912_v0, %v1912_v0  ;;  %v1918_v53 = vunpack.i.h.s16 %v1912_v0  ;;  %v2779_v59 = vpack.i.b16 %v1912_v0, %v1912_v0  ;;  %v2301_v57 = vld [vmem:[%s3716_s16 + $0x4] sm:$0x8] }
 0x1d6   : > { %v1920_v54 = vunpack.i.h.s16 %v1913_v45  ;;  %v1924_v55 = vpack.i.b16 %v1916_v46, %v1916_v46  ;;  %v2780_v60 = vpack.i.b16 %v1913_v45, %v1913_v45  ;;  %v1937_v61 = vrot.slane %v2778_v47, %v3707_v27 }
 0x1d7   : > { %v2187_v58 = vmin.f32 %v2186_v50, 20.0  ;;  %v1922_v41 = vunpack.i.h.s16 %v1914_v39  ;;  %v1926_v62 = vpack.i.b16 %v1918_v53, %v1918_v53  ;;  %v2781_v1 = vpack.i.b16 %v1914_v39, %v1914_v39 }
 0x1d8   : > { %v1928_v63 = vpack.i.b16 %v1920_v54, %v1920_v54  ;;  %v1997_v3 = vld [vmem:[%s3716_s16] sm:$0x4]  ;;  %v1944_v5 = vrot.slane %v1924_v55, %v3707_v27  ;;  %v1951_v6 = vrot.slane %v2779_v59, %v3707_v27  ;;  %v1965_v7 = vrot.slane %v2780_v60, %v3707_v27  ;;  %v2304_v59 = vld [vmem:[%s3716_s16 + $0x8] sm:$0x8]  ;;  %v2310_v60 = vld [vmem:[%s3716_s16 + $0x10] sm:$0x8] }
 0x1d9   : > { %v1998_v9 = vsel %vm3992_vm2, %v1937_v61, %v1997_v3  ;;  %v1930_v10 = vpack.i.b16 %v1922_v41, %v1922_v41  ;;  %v1958_v11 = vrot.slane %v1926_v62, %v3707_v27  ;;  %v1979_v19 = vrot.slane %v2781_v1, %v3707_v27  ;;  %v2000_v20 = vld [vmem:[%s3716_s16 + $0x4] sm:$0x4]  ;;  %v2003_v21 = vld [vmem:[%s3716_s16 + $0x8] sm:$0x4]  ;;  %v2313_v1 = vld [vmem:[%s3716_s16 + $0x14] sm:$0x8] }
 0x1da   : > { %v1972_v12 = vrot.slane %v1928_v63, %v3707_v27  ;;  %1999 = vst [vmem:[%s3716_s16] sm:$0x4] %v1998_v9  ;;  %v2009_v22 = vld [vmem:[%s3716_s16 + $0x10] sm:$0x4]  ;;  %v2001_v13 = vsel %vm3992_vm2, %v1944_v5, %v2000_v20  ;;  %v2004_v23 = vsel %vm3992_vm2, %v1951_v6, %v2003_v21  ;;  %v2006_v14 = vld [vmem:[%s3716_s16 + $0xc] sm:$0x4]  ;;  %v2485_v16 = vadd.f32 %v3945_v4, %v2428_v51 }
 0x1db   : > { %v2010_v24 = vsel %vm3992_vm2, %v1965_v7, %v2009_v22  ;;  %v2012_v15 = vld [vmem:[%s3716_s16 + $0x14] sm:$0x4]  ;;  %v2015_v25 = vld [vmem:[%s3716_s16 + $0x18] sm:$0x4]  ;;  %v1986_v26 = vrot.slane %v1930_v10, %v3707_v27  ;;  %2002 = vst [vmem:[%s3716_s16 + $0x4] sm:$0x4] %v2001_v13  ;;  %v2007_v28 = vsel %vm3992_vm2, %v1958_v11, %v2006_v14 }
 0x1dc   : > { %2005 = vst [vmem:[%s3716_s16 + $0x8] sm:$0x4] %v2004_v23  ;;  %2011 = vst [vmem:[%s3716_s16 + $0x10] sm:$0x4] %v2010_v24  ;;  %v2013_v29 = vsel %vm3992_vm2, %v1972_v12, %v2012_v15  ;;  %v2016_v30 = vsel %vm3992_vm2, %v1979_v19, %v2015_v25  ;;  %v2018_v32 = vld [vmem:[%s3716_s16 + $0x1c] sm:$0x4]  ;;  %v2486_v34 = vadd.f32 %v2485_v16, %v3690_v52 }
 0x1dd   : > { %2008 = vst [vmem:[%s3716_s16 + $0xc] sm:$0x4] %v2007_v28  ;;  %2014 = vst [vmem:[%s3716_s16 + $0x14] sm:$0x4] %v2013_v29  ;;  %v2188_v4 = vsel %vm3693_vm3, %v2187_v58, 0.0  ;;  %v2019_v35 = vsel %vm3992_vm2, %v1986_v26, %v2018_v32 }
 0x1de   : > { %2017 = vst [vmem:[%s3716_s16 + $0x18] sm:$0x4] %v2016_v30  ;;  %v2189_v36 = vpack.c.bf16 %v2188_v4, %v2188_v4  ;;  %2020 = vst [vmem:[%s3716_s16 + $0x1c] sm:$0x4] %v2019_v35  ;;  %v2487_v17 = vmax.f32 %v2486_v34, 0.0 }
 0x1df   : > { %v2307_v63 = vld [vmem:[%s3716_s16 + $0xc] sm:$0x8]  ;;  %v2316_v3 = vld [vmem:[%s3716_s16 + $0x18] sm:$0x8]  ;;  %v2319_v19 = vld [vmem:[%s3716_s16 + $0x1c] sm:$0x8] }
 0x1e0   : > { %v2197_v56 = vrot.slane %v2189_v36, %v3697_v8  ;;  %v2488_v37 = vmin.f32 %v2487_v17, 20.0 }
 0x1e2   : > { %v2198_v38 = vcombine.high %v2197_v56, %v2197_v56  ;;  %v2205_v31 = vrot.slane %v2197_v56, %v3697_v8  ;;  %v2489_v40 = vsel %vm3693_vm3, %v2488_v37, 0.0  ;;  %vm2596_vm3 = vsmask.f32 7950 }
 0x1e3   : > { %v2490_v18 = vpack.c.bf16 %v2489_v40, %v2489_v40  ;;  %vm4094_vm7 = vmand %vm2295_vm4, %vm2596_vm3 }
 0x1e4   : > { %v2212_v52 = vrot.slane %v2198_v38, %v3697_v8  ;;  %v2213_v42 = vcombine.high %v2205_v31, %v2205_v31  ;;  %v2216_v43 = vunpack.i.h.s16 %v2205_v31  ;;  %v2789_v33 = vpack.i.b16 %v2205_v31, %v2205_v31 }
 0x1e5   : > { %v2498_v51 = vrot.slane %v2490_v18, %v3697_v8 }
 0x1e6   : > { %v2214_v44 = vcombine.high %v2212_v52, %v2212_v52  ;;  %v2218_v0 = vunpack.i.h.s16 %v2212_v52  ;;  %v2220_v45 = vunpack.i.h.s16 %v2213_v42  ;;  %v2224_v46 = vpack.i.b16 %v2216_v43, %v2216_v43 }
 0x1e7   : > { %v2790_v48 = vpack.i.b16 %v2212_v52, %v2212_v52  ;;  %v2791_v49 = vpack.i.b16 %v2213_v42, %v2213_v42  ;;  %v2237_v50 = vrot.slane %v2789_v33, %v3707_v27  ;;  %v2499_v20 = vcombine.high %v2498_v51, %v2498_v51 }
 0x1e8   : > { %v2222_v39 = vunpack.i.h.s16 %v2214_v44  ;;  %v2226_v53 = vpack.i.b16 %v2218_v0, %v2218_v0  ;;  %v2228_v54 = vpack.i.b16 %v2220_v45, %v2220_v45  ;;  %v2792_v55 = vpack.i.b16 %v2214_v44, %v2214_v44 }
 0x1e9   : > { %v2244_v61 = vrot.slane %v2224_v46, %v3707_v27  ;;  %v2251_v58 = vrot.slane %v2790_v48, %v3707_v27  ;;  %v2265_v41 = vrot.slane %v2791_v49, %v3707_v27  ;;  %v2299_v62 = vsel %vm4046_vm6, %v2237_v50, %v2298_v2 }
 0x1ea   : > { %v2230_v5 = vpack.i.b16 %v2222_v39, %v2222_v39  ;;  %v2258_v6 = vrot.slane %v2226_v53, %v3707_v27  ;;  %v2272_v7 = vrot.slane %v2228_v54, %v3707_v27  ;;  %v2279_v9 = vrot.slane %v2792_v55, %v3707_v27  ;;  %2300 = vst [vmem:[%s3716_s16] sm:$0x8] %v2299_v62 }
 0x1eb   : > { %v2302_v10 = vsel %vm4046_vm6, %v2244_v61, %v2301_v57  ;;  %v2305_v11 = vsel %vm4046_vm6, %v2251_v58, %v2304_v59  ;;  %v2311_v12 = vsel %vm4046_vm6, %v2265_v41, %v2310_v60  ;;  %v2506_v14 = vrot.slane %v2498_v51, %v3697_v8 }
 0x1ec   : > { %v2286_v21 = vrot.slane %v2230_v5, %v3707_v27  ;;  %2303 = vst [vmem:[%s3716_s16 + $0x4] sm:$0x8] %v2302_v10  ;;  %2306 = vst [vmem:[%s3716_s16 + $0x8] sm:$0x8] %v2305_v11  ;;  %v2308_v22 = vsel %vm4046_vm6, %v2258_v6, %v2307_v63  ;;  %v2314_v13 = vsel %vm4046_vm6, %v2272_v7, %v2313_v1 }
 0x1ed   : > { %2312 = vst [vmem:[%s3716_s16 + $0x10] sm:$0x8] %v2311_v12  ;;  %v2317_v23 = vsel %vm4046_vm6, %v2279_v9, %v2316_v3  ;;  %2309 = vst [vmem:[%s3716_s16 + $0xc] sm:$0x8] %v2308_v22  ;;  %v2513_v24 = vrot.slane %v2499_v20, %v3697_v8  ;;  %v2514_v25 = vcombine.high %v2506_v14, %v2506_v14  ;;  %v2517_v26 = vunpack.i.h.s16 %v2506_v14 }
 0x1ee   : > { %2315 = vst [vmem:[%s3716_s16 + $0x14] sm:$0x8] %v2314_v13  ;;  %2318 = vst [vmem:[%s3716_s16 + $0x18] sm:$0x8] %v2317_v23  ;;  %v2320_v15 = vsel %vm4046_vm6, %v2286_v21, %v2319_v19  ;;  %v2800_v29 = vpack.i.b16 %v2506_v14, %v2506_v14 }
 0x1ef   : > { %2321 = vst [vmem:[%s3716_s16 + $0x1c] sm:$0x8] %v2320_v15  ;;  %v2515_v16 = vcombine.high %v2513_v24, %v2513_v24  ;;  %v2519_v28 = vunpack.i.h.s16 %v2513_v24  ;;  %v2801_v30 = vpack.i.b16 %v2513_v24, %v2513_v24  ;;  %v2521_v32 = vunpack.i.h.s16 %v2514_v25 }
 0x1f0   : > { %v2525_v34 = vpack.i.b16 %v2517_v26, %v2517_v26  ;;  %v2802_v17 = vpack.i.b16 %v2514_v25, %v2514_v25  ;;  %v2538_v37 = vrot.slane %v2800_v29, %v3707_v27 }
 0x1f1   : > { %v2523_v4 = vunpack.i.h.s16 %v2515_v16  ;;  %v2527_v8 = vpack.i.b16 %v2519_v28, %v2519_v28  ;;  %v2598_v36 = vld [vmem:[%s3716_s16] sm:$0x8]  ;;  %v2803_v56 = vpack.i.b16 %v2515_v16, %v2515_v16  ;;  %v2552_v38 = vrot.slane %v2801_v30, %v3707_v27 }
 0x1f2   : > { %v2529_v31 = vpack.i.b16 %v2521_v32, %v2521_v32  ;;  %v2545_v52 = vrot.slane %v2525_v34, %v3707_v27  ;;  %v2566_v44 = vrot.slane %v2802_v17, %v3707_v27  ;;  %v2599_v45 = vsel %vm4094_vm7, %v2538_v37, %v2598_v36 }
 0x1f3   : > { %v2531_v40 = vpack.i.b16 %v2523_v4, %v2523_v4  ;;  %v2559_v42 = vrot.slane %v2527_v8, %v3707_v27  ;;  %v2601_v43 = vld [vmem:[%s3716_s16 + $0x4] sm:$0x8]  ;;  %v2604_v33 = vld [vmem:[%s3716_s16 + $0x8] sm:$0x8]  ;;  %v2580_v0 = vrot.slane %v2803_v56, %v3707_v27  ;;  %2600 = vst [vmem:[%s3716_s16] sm:$0x8] %v2599_v45 }
 0x1f4   : > { %v2610_v18 = vld [vmem:[%s3716_s16 + $0x10] sm:$0x8]  ;;  %v2605_v46 = vsel %vm4094_vm7, %v2552_v38, %v2604_v33  ;;  %v2607_v47 = vld [vmem:[%s3716_s16 + $0xc] sm:$0x8]  ;;  %v2573_v49 = vrot.slane %v2529_v31, %v3707_v27  ;;  %v2602_v51 = vsel %vm4094_vm7, %v2545_v52, %v2601_v43 }
 0x1f5   : > { %v2613_v2 = vld [vmem:[%s3716_s16 + $0x14] sm:$0x8]  ;;  %v2616_v48 = vld [vmem:[%s3716_s16 + $0x18] sm:$0x8]  ;;  %v2587_v50 = vrot.slane %v2531_v40, %v3707_v27  ;;  %2606 = vst [vmem:[%s3716_s16 + $0x8] sm:$0x8] %v2605_v46  ;;  %v2608_v39 = vsel %vm4094_vm7, %v2559_v42, %v2607_v47  ;;  %v2611_v27 = vsel %vm4094_vm7, %v2566_v44, %v2610_v18 }
 0x1f6   : > { %2603 = vst [vmem:[%s3716_s16 + $0x4] sm:$0x8] %v2602_v51  ;;  %2609 = vst [vmem:[%s3716_s16 + $0xc] sm:$0x8] %v2608_v39  ;;  %v2617_v53 = vsel %vm4094_vm7, %v2580_v0, %v2616_v48  ;;  %v2619_v54 = vld [vmem:[%s3716_s16 + $0x1c] sm:$0x8]  ;;  %v2614_v55 = vsel %vm4094_vm7, %v2573_v49, %v2613_v2 }
 0x1f7   : > { %2612 = vst [vmem:[%s3716_s16 + $0x10] sm:$0x8] %v2611_v27  ;;  %2618 = vst [vmem:[%s3716_s16 + $0x18] sm:$0x8] %v2617_v53  ;;  %v2620_v57 = vsel %vm4094_vm7, %v2587_v50, %v2619_v54 }
 0x1f8   : > { %2615 = vst [vmem:[%s3716_s16 + $0x14] sm:$0x8] %v2614_v55  ;;  %2621 = vst [vmem:[%s3716_s16 + $0x1c] sm:$0x8] %v2620_v57 }
 0x1f9   : > { %3182 = shalt.err (!%p3179_p10)
}
 0x1fa   : > { %s3183_s9 = scalar_lea.hbm %s4128_s25, 512  ;;  %s3187_s12 = scalar_lea.hbm %s4199_s4, 1024 }
 0x1fb   : > { %p3184_p11 = scmp.ne.s32.totalorder %s4128_s25, %s3183_s9  ;;  %p3188_p1 = scmp.lt.u32.totalorder %s4128_s25, %s4199_s4 }
 0x1fc   : > { %p3189_p2 = scmp.lt.u32.totalorder %s3187_s12, %s3183_s9  ;;  %p3191_p4 = scmp.lt.u32.totalorder %s3183_s9, %s4128_s25 }
 0x1fd   : > { %p3185_p12 = pnand %p3184_p11, %p3330_p9 }
 0x1fe   : > { %p3190_p3 = por %p3189_p2, %p3188_p1 }
 0x1ff   : > { %p3186_p0 = pneg %p3185_p12 }
 0x200   : > { %p3192_p5 = por %p3191_p4, %p3190_p3 }
 0x202   : > { %p3193_p6 = pnand %p3192_p5, %p3186_p0 }
 0x204   : > { %3196 = shalt.err (!%p3193_p6)
}
 0x205   : > { %s3260_s15 = smov 64   ;;  %s3261_s16 = smov 4  }
 0x206   : > { %3075 = dma.vmem_to_hbm [thread:$0]  (%p3330_p9), %s4130_s18, 512, %s4128_s25, %s4149_s26, %s3260_s15, %s3260_s15, %s3261_s16  }
 0x207 PF: > { %p3081_p7 = scmp.ge.s32.totalorder %s3249_s24, 2  ;;  %s2652_s17 = sand.u32 1, %s3229_s20  }
 0x208   : > { %s2653_s22 = scalar_lea.sflag [#allocation5], %s2652_s17 }
 0x209   : > { %p3078_p8 = pnand %p3081_p7, %p3337_p13 }
 0x20b   : > { %3224 = dma.done.wait (!%p3078_p8), %s2653_s22, 512  }
 0x20c   : > { %3226 = vsyncadd (!%p3078_p8), %s2653_s22, 4294966784  ;;  %s23_s24 = sadd.s32 1, %s3249_s24   ;;  %s4220_s20 = smov %s3233_s21 }
 0x20d   : > { %p20_p10 = scmp.ge.s32.totalorder %s23_s24, 4   ;;  %s4221_s21 = smov %s3237_s0 }
 0x20e   : > { %s4222_s0 = smov %s3343_s6  ;;  %s4223_s22 = smov %s3245_s23 }
 0x20f   : > { %s4224_s23 = smov %s4226_s27  ;;  %22 = sbr.rel (!%p20_p10) target bundleno = 19 (0x13), region = 69 }
 0x216   :  { %2658 = vsyncpa [#allocation5], 1 }
 0x217   :  { %2660 = vsyncpa [#allocation5 + $0x1], 1 }

</bundles_post_ra>
